<compile_context>
chip_gen: v6e
topology: v6e:2x2x1
jax: 0.10.0
libtpu: 0.0.40
codegen_flags: <defaults>
</compile_context>

<pallas_src>
import functools

import numpy as np

import jax
import jax.numpy as jnp
from jax import lax
from jax.experimental import pallas as pl
from jax.experimental.pallas import tpu as pltpu


# ------------------------------ Pallas kernel ---------------------------------

def _cbam_kernel(x_ref, w1_ref, w2_ref, hmask_ref, wsp_ref, o_ref,
                 *, ksize, width):
    # x_ref/o_ref: (Bt, C, H*W)   w1_ref: (Cr, C)   w2_ref: (C, Cr)
    # hmask_ref:   (ksize, H*W) f32 {0,1} per-kx column-validity masks
    # wsp_ref:     (2*ksize*ksize,) SMEM -- flattened (2, ks, ks) spatial weight
    Bt, C, HW = x_ref.shape
    ks = ksize
    W = width
    pad = (ks - 1) // 2
    P = pad * W + pad                                   # max |flat tap shift|

    x = x_ref[...].astype(jnp.float32)                  # one VMEM read of the block

    # ---------------- channel attention ----------------
    avg = jnp.mean(x, axis=2, keepdims=True)            # (Bt, C, 1) lane reduce
    mx = jnp.max(x, axis=2, keepdims=True)              # (Bt, C, 1)

    # one shared-MLP call on all 2*Bt pooled vectors: columns [avg_0..avg_B, max_0..max_B]
    cols = [avg[b] for b in range(Bt)] + [mx[b] for b in range(Bt)]
    v = jnp.concatenate(cols, axis=1)                   # (C, 2*Bt)
    h = jnp.dot(w1_ref[...], v, preferred_element_type=jnp.float32)   # (Cr, 2*Bt)
    h = jnp.maximum(h, 0.0)                              # ReLU
    z2 = jnp.dot(w2_ref[...], h, preferred_element_type=jnp.float32)  # (C, 2*Bt)
    z = z2[:, :Bt] + z2[:, Bt:]                          # fc(avg) + fc(max): (C, Bt)
    ca_cols = 1.0 / (1.0 + jnp.exp(-z))                  # sigmoid (exp on EUP)
    ca = jnp.stack([ca_cols[:, b:b + 1] for b in range(Bt)], axis=0)  # (Bt, C, 1)

    x_ca = x * ca                                        # lane-broadcast per channel
    # Stage the channel-attended tensor in the VMEM-resident output block so it
    # is not a second full-size live value during the spatial-conv stage.
    o_ref[...] = x_ca.astype(o_ref.dtype)

    # ---------------- spatial attention ----------------
    avg_s = jnp.mean(x_ca, axis=1, keepdims=True)        # (Bt, 1, HW) sublane reduce
    max_s = jnp.max(x_ca, axis=1, keepdims=True)         # (Bt, 1, HW)

    # zero-pad the flat maps once; each tap then becomes a static slice at a
    # constant flat shift dy*W + dx of a register value (no shifted VMEM loads).
    zp = jnp.zeros((Bt, 1, P), jnp.float32)
    pa = jnp.concatenate([zp, avg_s, zp], axis=2)        # (Bt, 1, HW + 2P)
    pm = jnp.concatenate([zp, max_s, zp], axis=2)

    hm = hmask_ref[...]                                   # (ks, HW)
    acc = jnp.zeros((Bt, 1, HW), jnp.float32)
    for kx in range(ks):
        col_acc = jnp.zeros((Bt, 1, HW), jnp.float32)
        for ky in range(ks):
            s = (ky - pad) * W + (kx - pad)
            lo = P + s
            w_a = wsp_ref[ky * ks + kx]                   # scalar from SMEM (avg map)
            w_m = wsp_ref[ks * ks + ky * ks + kx]         # scalar from SMEM (max map)
            col_acc = (col_acc
                       + w_a * pa[:, :, lo:lo + HW]
                       + w_m * pm[:, :, lo:lo + HW])
        # zero the columns whose horizontal source (x + dx) fell outside the row
        acc = acc + col_acc * hm[kx:kx + 1, :]

    sa = 1.0 / (1.0 + jnp.exp(-acc))                      # (Bt, 1, HW)
    o_ref[...] = (o_ref[...].astype(jnp.float32) * sa).astype(o_ref.dtype)


# ------------------------------- wrapper ---------------------------------------

def cbam_forward(x, params):
    """Pallas implementation of CBAM.forward. x is NCHW; returns NCHW (x.dtype)."""
    N, C, H, W = x.shape
    w_fc1 = params["w_fc1"]                 # (Cr, C, 1, 1)
    w_fc2 = params["w_fc2"]                 # (C, Cr, 1, 1)
    w_sp = params["w_sp"]                   # (1, 2, ks, ks)
    Cr = w_fc1.shape[0]
    ks = w_sp.shape[-1]
    pad = (ks - 1) // 2
    HW = H * W

    # Free (bitcast) reshapes only -- no HBM transpose passes around the kernel.
    xf = x.reshape(N, C, HW)
    w1 = w_fc1[:, :, 0, 0].astype(jnp.float32)           # (Cr, C)
    w2 = w_fc2[:, :, 0, 0].astype(jnp.float32)           # (C, Cr)
    wsp = w_sp[0].reshape(2 * ks * ks).astype(jnp.float32)

    # Host-side per-kx column-validity masks for the flat-shift spatial conv.
    col = np.arange(HW, dtype=np.int64) % W
    hmask = np.stack(
        [((col + (kx - pad) >= 0) & (col + (kx - pad) < W)).astype(np.float32)
         for kx in range(ks)], axis=0)                    # (ks, HW)
    hmask = jnp.asarray(hmask)

    # Batch blocking: largest divisor of N whose block stays <= ~1 MiB, capped so
    # the grid length stays >= 2 (v7x megacore can still split the grid).
    sample_bytes = C * HW * x.dtype.itemsize
    cap = max(1, (1 << 20) // max(1, sample_bytes))
    cap = min(cap, 16)
    if N > 1:
        cap = min(cap, N // 2)
    cap = max(cap, 1)
    Bt = max(d for d in range(1, cap + 1) if N % d == 0)
    grid = (N // Bt,)

    block_bytes = Bt * C * HW * 4
    vmem_limit = int(min(64 * 1024 * 1024, max(32 * 1024 * 1024, 6 * block_bytes)))

    kernel = functools.partial(_cbam_kernel, ksize=ks, width=W)

    flops = N * (6 * H * W * C + 4 * ks * ks * H * W + 8 * C * Cr)
    transcendentals = N * (H * W + C)
    bytes_accessed = (2 * N * C * HW * x.dtype.itemsize
                      + 4 * (2 * C * Cr + 2 * ks * ks + ks * HW))

    out = pl.pallas_call(
        kernel,
        out_shape=jax.ShapeDtypeStruct((N, C, HW), x.dtype),
        grid=grid,
        in_specs=[
            pl.BlockSpec((Bt, C, HW), lambda n: (n, 0, 0)),
            pl.BlockSpec((Cr, C), lambda n: (0, 0)),
            pl.BlockSpec((C, Cr), lambda n: (0, 0)),
            pl.BlockSpec((ks, HW), lambda n: (0, 0)),
            pl.BlockSpec(memory_space=pltpu.MemorySpace.SMEM),
        ],
        out_specs=pl.BlockSpec((Bt, C, HW), lambda n: (n, 0, 0)),
        compiler_params=pltpu.CompilerParams(
            dimension_semantics=("parallel",),
            vmem_limit_bytes=vmem_limit),
        cost_estimate=pl.CostEstimate(
            flops=flops, transcendentals=transcendentals,
            bytes_accessed=bytes_accessed),
    )(xf, w1, w2, hmask, wsp)

    return out.reshape(N, C, H, W)


# --------------------------- pure-JAX reference ---------------------------------

def cbam_reference(x, p):
    dn = ("NCHW", "OIHW", "NCHW")
    w1, w2, wsp = p["w_fc1"], p["w_fc2"], p["w_sp"]

    def fc(v):
        h = lax.conv_general_dilated(v, w1, (1, 1), "VALID", dimension_numbers=dn)
        h = jnp.maximum(h, 0.0)
        return lax.conv_general_dilated(h, w2, (1, 1), "VALID", dimension_numbers=dn)

    avg = jnp.mean(x, axis=(2, 3), keepdims=True)
    mx = jnp.max(x, axis=(2, 3), keepdims=True)
    ca = jax.nn.sigmoid(fc(avg) + fc(mx))
    x1 = ca * x

    m = jnp.concatenate([jnp.mean(x1, axis=1, keepdims=True),
                         jnp.max(x1, axis=1, keepdims=True)], axis=1)
    pad = (wsp.shape[-1] - 1) // 2
    s = lax.conv_general_dilated(m, wsp, (1, 1), [(pad, pad), (pad, pad)],
                                 dimension_numbers=dn)
    return jax.nn.sigmoid(s) * x1


# ------------------------------- params ------------------------------------------

def make_params(key, in_channels, reduction=16, kernel_size=7):
    cr = in_channels // reduction
    assert cr >= 1, "in_channels // reduction must be >= 1 (as in the PyTorch module)"
    k1, k2, k3 = jax.random.split(key, 3)
    f = jnp.float32
    return {
        "w_fc1": 0.3 * jax.random.normal(k1, (cr, in_channels, 1, 1), f),
        "w_fc2": 0.3 * jax.random.normal(k2, (in_channels, cr, 1, 1), f),
        "w_sp": 0.3 * jax.random.normal(k3, (1, 2, kernel_size, kernel_size), f),
    }


# --------------------------------- main -------------------------------------------

if __name__ == "__main__":
    key = jax.random.PRNGKey(0)
    kx, kp = jax.random.split(key)

    # module defaults: reduction=16, kernel_size=7  -> need C >= 16; use C=32
    N, C, H, W = 2, 32, 16, 16
    x = jax.random.normal(kx, (N, C, H, W), jnp.float32)
    params = make_params(kp, C, reduction=16, kernel_size=7)

    fwd = jax.jit(cbam_forward)
    out = fwd(x, params)
    out = jax.block_until_ready(out)

    ref = cbam_reference(x, params)
    assert out.shape == (N, C, H, W)
    assert jnp.allclose(out, ref, atol=5e-4, rtol=5e-4), "mismatch vs JAX reference"

    print("KERNEL_OK")
</pallas_src>

<mosaic_0001>
module attributes {stable_mosaic.version = 11 : i64} {
  func.func @_cbam_kernel(%arg0: i32, %arg1: memref<1x32x256xf32, #tpu.memory_space<vmem>>, %arg2: memref<2x32xf32, #tpu.memory_space<vmem>>, %arg3: memref<32x2xf32, #tpu.memory_space<vmem>>, %arg4: memref<7x256xf32, #tpu.memory_space<vmem>>, %arg5: memref<98xf32, #tpu.memory_space<smem>>, %arg6: memref<1x32x256xf32, #tpu.memory_space<vmem>>) attributes {dimension_semantics = [#tpu.dimension_semantics<parallel>], iteration_bounds = array<i64: 2>, scalar_prefetch = 0 : i64, scratch_operands = 0 : i64, tpu.core_type = #tpu.core_type<tc>, window_params = [{transform_indices = @transform_0, window_bounds = array<i64: 1, 32, 256>}, {pipeline_mode = #tpu.pipeline_mode<synchronous>, transform_indices = @transform_1, window_bounds = array<i64: 2, 32>}, {pipeline_mode = #tpu.pipeline_mode<synchronous>, transform_indices = @transform_2, window_bounds = array<i64: 32, 2>}, {pipeline_mode = #tpu.pipeline_mode<synchronous>, transform_indices = @transform_3, window_bounds = array<i64: 7, 256>}, {transform_indices = @transform_4, window_bounds = array<i64: 98>}, {transform_indices = @transform_5, window_bounds = array<i64: 1, 32, 256>}]} {
    %c0 = arith.constant 0 : index
    %c0_0 = arith.constant 0 : index
    %c0_1 = arith.constant 0 : index
    %0 = vector.load %arg1[%c0, %c0_0, %c0_1] : memref<1x32x256xf32, #tpu.memory_space<vmem>>, vector<1x32x256xf32>
    %cst = arith.constant dense<0.000000e+00> : vector<1x32xf32>
    %1 = vector.multi_reduction <add>, %0, %cst [2] : vector<1x32x256xf32> to vector<1x32xf32>
    %2 = vector.shape_cast %1 : vector<1x32xf32> to vector<1x32x1xf32>
    %cst_2 = arith.constant 2.560000e+02 : f32
    %3 = vector.broadcast %cst_2 : f32 to vector<1x32x1xf32>
    %4 = arith.divf %2, %3 : vector<1x32x1xf32>
    %cst_3 = arith.constant dense<0xFF800000> : vector<1x32xf32>
    %5 = vector.multi_reduction <maximumf>, %0, %cst_3 [2] : vector<1x32x256xf32> to vector<1x32xf32>
    %6 = vector.shape_cast %5 : vector<1x32xf32> to vector<1x32x1xf32>
    %7 = vector.shape_cast %4 : vector<1x32x1xf32> to vector<32x1xf32>
    %8 = vector.shape_cast %6 : vector<1x32x1xf32> to vector<32x1xf32>
    %9 = tpu.concatenate %7, %8 in 1 : vector<32x1xf32>, vector<32x1xf32> -> vector<32x2xf32>
    %c0_4 = arith.constant 0 : index
    %c0_5 = arith.constant 0 : index
    %10 = vector.load %arg2[%c0_4, %c0_5] : memref<2x32xf32, #tpu.memory_space<vmem>>, vector<2x32xf32>
    %cst_6 = arith.constant dense<0.000000e+00> : vector<2x2xf32>
    %11 = tpu.matmul %10, %9, %cst_6 {dimension_numbers = #tpu.dot_dimension_numbers<[1], [0], [0], [1], [0, 0, 1, 1], [], []>} : vector<2x32xf32>, vector<32x2xf32>, vector<2x2xf32> -> vector<2x2xf32>
    %cst_7 = arith.constant 0.000000e+00 : f32
    %12 = vector.broadcast %cst_7 : f32 to vector<2x2xf32>
    %13 = arith.maximumf %11, %12 : vector<2x2xf32>
    %c0_8 = arith.constant 0 : index
    %c0_9 = arith.constant 0 : index
    %14 = vector.load %arg3[%c0_8, %c0_9] : memref<32x2xf32, #tpu.memory_space<vmem>>, vector<32x2xf32>
    %cst_10 = arith.constant dense<0.000000e+00> : vector<32x2xf32>
    %15 = tpu.matmul %14, %13, %cst_10 {dimension_numbers = #tpu.dot_dimension_numbers<[1], [0], [0], [1], [0, 0, 1, 1], [], []>} : vector<32x2xf32>, vector<2x2xf32>, vector<32x2xf32> -> vector<32x2xf32>
    %16 = vector.extract_strided_slice %15 {offsets = [0, 0], sizes = [32, 1], strides = [1, 1]} : vector<32x2xf32> to vector<32x1xf32>
    %17 = vector.extract_strided_slice %15 {offsets = [0, 1], sizes = [32, 1], strides = [1, 1]} : vector<32x2xf32> to vector<32x1xf32>
    %18 = arith.addf %16, %17 : vector<32x1xf32>
    %cst_11 = arith.constant 0.000000e+00 : f32
    %19 = vector.broadcast %cst_11 : f32 to vector<32x1xf32>
    %20 = arith.subf %19, %18 : vector<32x1xf32>
    %21 = math.exp %20 : vector<32x1xf32>
    %cst_12 = arith.constant 1.000000e+00 : f32
    %22 = vector.broadcast %cst_12 : f32 to vector<32x1xf32>
    %23 = arith.addf %22, %21 : vector<32x1xf32>
    %cst_13 = arith.constant 1.000000e+00 : f32
    %24 = vector.broadcast %cst_13 : f32 to vector<32x1xf32>
    %25 = arith.divf %24, %23 : vector<32x1xf32>
    %26 = vector.shape_cast %25 : vector<32x1xf32> to vector<1x32x1xf32>
    %27 = vector.broadcast %26 : vector<1x32x1xf32> to vector<1x32x256xf32>
    %28 = arith.mulf %0, %27 : vector<1x32x256xf32>
    %c0_14 = arith.constant 0 : index
    %c0_15 = arith.constant 0 : index
    %c0_16 = arith.constant 0 : index
    %29 = vector.load %arg6[%c0_14, %c0_15, %c0_16] : memref<1x32x256xf32, #tpu.memory_space<vmem>>, vector<1x32x256xf32>
    tpu.vector_store %arg6[%c0_14, %c0_15, %c0_16], %28 {strides = array<i32>} : memref<1x32x256xf32, #tpu.memory_space<vmem>>, vector<1x32x256xf32>,
    %cst_17 = arith.constant dense<0.000000e+00> : vector<1x256xf32>
    %30 = vector.multi_reduction <add>, %28, %cst_17 [1] : vector<1x32x256xf32> to vector<1x256xf32>
    %31 = vector.shape_cast %30 : vector<1x256xf32> to vector<1x1x256xf32>
    %cst_18 = arith.constant 3.200000e+01 : f32
    %32 = vector.broadcast %cst_18 : f32 to vector<1x1x256xf32>
    %33 = arith.divf %31, %32 : vector<1x1x256xf32>
    %cst_19 = arith.constant dense<0xFF800000> : vector<1x256xf32>
    %34 = vector.multi_reduction <maximumf>, %28, %cst_19 [1] : vector<1x32x256xf32> to vector<1x256xf32>
    %35 = vector.shape_cast %34 : vector<1x256xf32> to vector<1x1x256xf32>
    %cst_20 = arith.constant 0.000000e+00 : f32
    %36 = vector.broadcast %cst_20 : f32 to vector<1x1x51xf32>
    %37 = tpu.concatenate %36, %33, %36 in 2 : vector<1x1x51xf32>, vector<1x1x256xf32>, vector<1x1x51xf32> -> vector<1x1x358xf32>
    %38 = tpu.concatenate %36, %35, %36 in 2 : vector<1x1x51xf32>, vector<1x1x256xf32>, vector<1x1x51xf32> -> vector<1x1x358xf32>
    %c0_21 = arith.constant 0 : index
    %c0_22 = arith.constant 0 : index
    %39 = vector.load %arg4[%c0_21, %c0_22] : memref<7x256xf32, #tpu.memory_space<vmem>>, vector<7x256xf32>
    %cst_23 = arith.constant 0.000000e+00 : f32
    %40 = vector.broadcast %cst_23 : f32 to vector<1x1x256xf32>
    %cst_24 = arith.constant 0.000000e+00 : f32
    %41 = vector.broadcast %cst_24 : f32 to vector<1x1x256xf32>
    %c0_25 = arith.constant 0 : index
    %42 = memref.load %arg5[%c0_25] : memref<98xf32, #tpu.memory_space<smem>>
    %c49 = arith.constant 49 : index
    %43 = memref.load %arg5[%c49] : memref<98xf32, #tpu.memory_space<smem>>
    %44 = vector.extract_strided_slice %37 {offsets = [0, 0, 0], sizes = [1, 1, 256], strides = [1, 1, 1]} : vector<1x1x358xf32> to vector<1x1x256xf32>
    %45 = vector.broadcast %42 : f32 to vector<1x1x256xf32>
    %46 = arith.mulf %45, %44 : vector<1x1x256xf32>
    %47 = arith.addf %41, %46 : vector<1x1x256xf32>
    %48 = vector.extract_strided_slice %38 {offsets = [0, 0, 0], sizes = [1, 1, 256], strides = [1, 1, 1]} : vector<1x1x358xf32> to vector<1x1x256xf32>
    %49 = vector.broadcast %43 : f32 to vector<1x1x256xf32>
    %50 = arith.mulf %49, %48 : vector<1x1x256xf32>
    %51 = arith.addf %47, %50 : vector<1x1x256xf32>
    %c7 = arith.constant 7 : index
    %52 = memref.load %arg5[%c7] : memref<98xf32, #tpu.memory_space<smem>>
    %c56 = arith.constant 56 : index
    %53 = memref.load %arg5[%c56] : memref<98xf32, #tpu.memory_space<smem>>
    %54 = vector.extract_strided_slice %37 {offsets = [0, 0, 16], sizes = [1, 1, 256], strides = [1, 1, 1]} : vector<1x1x358xf32> to vector<1x1x256xf32>
    %55 = vector.broadcast %52 : f32 to vector<1x1x256xf32>
    %56 = arith.mulf %55, %54 : vector<1x1x256xf32>
    %57 = arith.addf %51, %56 : vector<1x1x256xf32>
    %58 = vector.extract_strided_slice %38 {offsets = [0, 0, 16], sizes = [1, 1, 256], strides = [1, 1, 1]} : vector<1x1x358xf32> to vector<1x1x256xf32>
    %59 = vector.broadcast %53 : f32 to vector<1x1x256xf32>
    %60 = arith.mulf %59, %58 : vector<1x1x256xf32>
    %61 = arith.addf %57, %60 : vector<1x1x256xf32>
    %c14 = arith.constant 14 : index
    %62 = memref.load %arg5[%c14] : memref<98xf32, #tpu.memory_space<smem>>
    %c63 = arith.constant 63 : index
    %63 = memref.load %arg5[%c63] : memref<98xf32, #tpu.memory_space<smem>>
    %64 = vector.extract_strided_slice %37 {offsets = [0, 0, 32], sizes = [1, 1, 256], strides = [1, 1, 1]} : vector<1x1x358xf32> to vector<1x1x256xf32>
    %65 = vector.broadcast %62 : f32 to vector<1x1x256xf32>
    %66 = arith.mulf %65, %64 : vector<1x1x256xf32>
    %67 = arith.addf %61, %66 : vector<1x1x256xf32>
    %68 = vector.extract_strided_slice %38 {offsets = [0, 0, 32], sizes = [1, 1, 256], strides = [1, 1, 1]} : vector<1x1x358xf32> to vector<1x1x256xf32>
    %69 = vector.broadcast %63 : f32 to vector<1x1x256xf32>
    %70 = arith.mulf %69, %68 : vector<1x1x256xf32>
    %71 = arith.addf %67, %70 : vector<1x1x256xf32>
    %c21 = arith.constant 21 : index
    %72 = memref.load %arg5[%c21] : memref<98xf32, #tpu.memory_space<smem>>
    %c70 = arith.constant 70 : index
    %73 = memref.load %arg5[%c70] : memref<98xf32, #tpu.memory_space<smem>>
    %74 = vector.extract_strided_slice %37 {offsets = [0, 0, 48], sizes = [1, 1, 256], strides = [1, 1, 1]} : vector<1x1x358xf32> to vector<1x1x256xf32>
    %75 = vector.broadcast %72 : f32 to vector<1x1x256xf32>
    %76 = arith.mulf %75, %74 : vector<1x1x256xf32>
    %77 = arith.addf %71, %76 : vector<1x1x256xf32>
    %78 = vector.extract_strided_slice %38 {offsets = [0, 0, 48], sizes = [1, 1, 256], strides = [1, 1, 1]} : vector<1x1x358xf32> to vector<1x1x256xf32>
    %79 = vector.broadcast %73 : f32 to vector<1x1x256xf32>
    %80 = arith.mulf %79, %78 : vector<1x1x256xf32>
    %81 = arith.addf %77, %80 : vector<1x1x256xf32>
    %c28 = arith.constant 28 : index
    %82 = memref.load %arg5[%c28] : memref<98xf32, #tpu.memory_space<smem>>
    %c77 = arith.constant 77 : index
    %83 = memref.load %arg5[%c77] : memref<98xf32, #tpu.memory_space<smem>>
    %84 = vector.extract_strided_slice %37 {offsets = [0, 0, 64], sizes = [1, 1, 256], strides = [1, 1, 1]} : vector<1x1x358xf32> to vector<1x1x256xf32>
    %85 = vector.broadcast %82 : f32 to vector<1x1x256xf32>
    %86 = arith.mulf %85, %84 : vector<1x1x256xf32>
    %87 = arith.addf %81, %86 : vector<1x1x256xf32>
    %88 = vector.extract_strided_slice %38 {offsets = [0, 0, 64], sizes = [1, 1, 256], strides = [1, 1, 1]} : vector<1x1x358xf32> to vector<1x1x256xf32>
    %89 = vector.broadcast %83 : f32 to vector<1x1x256xf32>
    %90 = arith.mulf %89, %88 : vector<1x1x256xf32>
    %91 = arith.addf %87, %90 : vector<1x1x256xf32>
    %c35 = arith.constant 35 : index
    %92 = memref.load %arg5[%c35] : memref<98xf32, #tpu.memory_space<smem>>
    %c84 = arith.constant 84 : index
    %93 = memref.load %arg5[%c84] : memref<98xf32, #tpu.memory_space<smem>>
    %94 = vector.extract_strided_slice %37 {offsets = [0, 0, 80], sizes = [1, 1, 256], strides = [1, 1, 1]} : vector<1x1x358xf32> to vector<1x1x256xf32>
    %95 = vector.broadcast %92 : f32 to vector<1x1x256xf32>
    %96 = arith.mulf %95, %94 : vector<1x1x256xf32>
    %97 = arith.addf %91, %96 : vector<1x1x256xf32>
    %98 = vector.extract_strided_slice %38 {offsets = [0, 0, 80], sizes = [1, 1, 256], strides = [1, 1, 1]} : vector<1x1x358xf32> to vector<1x1x256xf32>
    %99 = vector.broadcast %93 : f32 to vector<1x1x256xf32>
    %100 = arith.mulf %99, %98 : vector<1x1x256xf32>
    %101 = arith.addf %97, %100 : vector<1x1x256xf32>
    %c42 = arith.constant 42 : index
    %102 = memref.load %arg5[%c42] : memref<98xf32, #tpu.memory_space<smem>>
    %c91 = arith.constant 91 : index
    %103 = memref.load %arg5[%c91] : memref<98xf32, #tpu.memory_space<smem>>
    %104 = vector.extract_strided_slice %37 {offsets = [0, 0, 96], sizes = [1, 1, 256], strides = [1, 1, 1]} : vector<1x1x358xf32> to vector<1x1x256xf32>
    %105 = vector.broadcast %102 : f32 to vector<1x1x256xf32>
    %106 = arith.mulf %105, %104 : vector<1x1x256xf32>
    %107 = arith.addf %101, %106 : vector<1x1x256xf32>
    %108 = vector.extract_strided_slice %38 {offsets = [0, 0, 96], sizes = [1, 1, 256], strides = [1, 1, 1]} : vector<1x1x358xf32> to vector<1x1x256xf32>
    %109 = vector.broadcast %103 : f32 to vector<1x1x256xf32>
    %110 = arith.mulf %109, %108 : vector<1x1x256xf32>
    %111 = arith.addf %107, %110 : vector<1x1x256xf32>
    %112 = vector.extract_strided_slice %39 {offsets = [0, 0], sizes = [1, 256], strides = [1, 1]} : vector<7x256xf32> to vector<1x256xf32>
    %113 = vector.shape_cast %112 : vector<1x256xf32> to vector<1x1x256xf32>
    %114 = arith.mulf %111, %113 : vector<1x1x256xf32>
    %115 = arith.addf %40, %114 : vector<1x1x256xf32>
    %cst_26 = arith.constant 0.000000e+00 : f32
    %116 = vector.broadcast %cst_26 : f32 to vector<1x1x256xf32>
    %c1 = arith.constant 1 : index
    %117 = memref.load %arg5[%c1] : memref<98xf32, #tpu.memory_space<smem>>
    %c50 = arith.constant 50 : index
    %118 = memref.load %arg5[%c50] : memref<98xf32, #tpu.memory_space<smem>>
    %119 = vector.extract_strided_slice %37 {offsets = [0, 0, 1], sizes = [1, 1, 256], strides = [1, 1, 1]} : vector<1x1x358xf32> to vector<1x1x256xf32>
    %120 = vector.broadcast %117 : f32 to vector<1x1x256xf32>
    %121 = arith.mulf %120, %119 : vector<1x1x256xf32>
    %122 = arith.addf %116, %121 : vector<1x1x256xf32>
    %123 = vector.extract_strided_slice %38 {offsets = [0, 0, 1], sizes = [1, 1, 256], strides = [1, 1, 1]} : vector<1x1x358xf32> to vector<1x1x256xf32>
    %124 = vector.broadcast %118 : f32 to vector<1x1x256xf32>
    %125 = arith.mulf %124, %123 : vector<1x1x256xf32>
    %126 = arith.addf %122, %125 : vector<1x1x256xf32>
    %c8 = arith.constant 8 : index
    %127 = memref.load %arg5[%c8] : memref<98xf32, #tpu.memory_space<smem>>
    %c57 = arith.constant 57 : index
    %128 = memref.load %arg5[%c57] : memref<98xf32, #tpu.memory_space<smem>>
    %129 = vector.extract_strided_slice %37 {offsets = [0, 0, 17], sizes = [1, 1, 256], strides = [1, 1, 1]} : vector<1x1x358xf32> to vector<1x1x256xf32>
    %130 = vector.broadcast %127 : f32 to vector<1x1x256xf32>
    %131 = arith.mulf %130, %129 : vector<1x1x256xf32>
    %132 = arith.addf %126, %131 : vector<1x1x256xf32>
    %133 = vector.extract_strided_slice %38 {offsets = [0, 0, 17], sizes = [1, 1, 256], strides = [1, 1, 1]} : vector<1x1x358xf32> to vector<1x1x256xf32>
    %134 = vector.broadcast %128 : f32 to vector<1x1x256xf32>
    %135 = arith.mulf %134, %133 : vector<1x1x256xf32>
    %136 = arith.addf %132, %135 : vector<1x1x256xf32>
    %c15 = arith.constant 15 : index
    %137 = memref.load %arg5[%c15] : memref<98xf32, #tpu.memory_space<smem>>
    %c64 = arith.constant 64 : index
    %138 = memref.load %arg5[%c64] : memref<98xf32, #tpu.memory_space<smem>>
    %139 = vector.extract_strided_slice %37 {offsets = [0, 0, 33], sizes = [1, 1, 256], strides = [1, 1, 1]} : vector<1x1x358xf32> to vector<1x1x256xf32>
    %140 = vector.broadcast %137 : f32 to vector<1x1x256xf32>
    %141 = arith.mulf %140, %139 : vector<1x1x256xf32>
    %142 = arith.addf %136, %141 : vector<1x1x256xf32>
    %143 = vector.extract_strided_slice %38 {offsets = [0, 0, 33], sizes = [1, 1, 256], strides = [1, 1, 1]} : vector<1x1x358xf32> to vector<1x1x256xf32>
    %144 = vector.broadcast %138 : f32 to vector<1x1x256xf32>
    %145 = arith.mulf %144, %143 : vector<1x1x256xf32>
    %146 = arith.addf %142, %145 : vector<1x1x256xf32>
    %c22 = arith.constant 22 : index
    %147 = memref.load %arg5[%c22] : memref<98xf32, #tpu.memory_space<smem>>
    %c71 = arith.constant 71 : index
    %148 = memref.load %arg5[%c71] : memref<98xf32, #tpu.memory_space<smem>>
    %149 = vector.extract_strided_slice %37 {offsets = [0, 0, 49], sizes = [1, 1, 256], strides = [1, 1, 1]} : vector<1x1x358xf32> to vector<1x1x256xf32>
    %150 = vector.broadcast %147 : f32 to vector<1x1x256xf32>
    %151 = arith.mulf %150, %149 : vector<1x1x256xf32>
    %152 = arith.addf %146, %151 : vector<1x1x256xf32>
    %153 = vector.extract_strided_slice %38 {offsets = [0, 0, 49], sizes = [1, 1, 256], strides = [1, 1, 1]} : vector<1x1x358xf32> to vector<1x1x256xf32>
    %154 = vector.broadcast %148 : f32 to vector<1x1x256xf32>
    %155 = arith.mulf %154, %153 : vector<1x1x256xf32>
    %156 = arith.addf %152, %155 : vector<1x1x256xf32>
    %c29 = arith.constant 29 : index
    %157 = memref.load %arg5[%c29] : memref<98xf32, #tpu.memory_space<smem>>
    %c78 = arith.constant 78 : index
    %158 = memref.load %arg5[%c78] : memref<98xf32, #tpu.memory_space<smem>>
    %159 = vector.extract_strided_slice %37 {offsets = [0, 0, 65], sizes = [1, 1, 256], strides = [1, 1, 1]} : vector<1x1x358xf32> to vector<1x1x256xf32>
    %160 = vector.broadcast %157 : f32 to vector<1x1x256xf32>
    %161 = arith.mulf %160, %159 : vector<1x1x256xf32>
    %162 = arith.addf %156, %161 : vector<1x1x256xf32>
    %163 = vector.extract_strided_slice %38 {offsets = [0, 0, 65], sizes = [1, 1, 256], strides = [1, 1, 1]} : vector<1x1x358xf32> to vector<1x1x256xf32>
    %164 = vector.broadcast %158 : f32 to vector<1x1x256xf32>
    %165 = arith.mulf %164, %163 : vector<1x1x256xf32>
    %166 = arith.addf %162, %165 : vector<1x1x256xf32>
    %c36 = arith.constant 36 : index
    %167 = memref.load %arg5[%c36] : memref<98xf32, #tpu.memory_space<smem>>
    %c85 = arith.constant 85 : index
    %168 = memref.load %arg5[%c85] : memref<98xf32, #tpu.memory_space<smem>>
    %169 = vector.extract_strided_slice %37 {offsets = [0, 0, 81], sizes = [1, 1, 256], strides = [1, 1, 1]} : vector<1x1x358xf32> to vector<1x1x256xf32>
    %170 = vector.broadcast %167 : f32 to vector<1x1x256xf32>
    %171 = arith.mulf %170, %169 : vector<1x1x256xf32>
    %172 = arith.addf %166, %171 : vector<1x1x256xf32>
    %173 = vector.extract_strided_slice %38 {offsets = [0, 0, 81], sizes = [1, 1, 256], strides = [1, 1, 1]} : vector<1x1x358xf32> to vector<1x1x256xf32>
    %174 = vector.broadcast %168 : f32 to vector<1x1x256xf32>
    %175 = arith.mulf %174, %173 : vector<1x1x256xf32>
    %176 = arith.addf %172, %175 : vector<1x1x256xf32>
    %c43 = arith.constant 43 : index
    %177 = memref.load %arg5[%c43] : memref<98xf32, #tpu.memory_space<smem>>
    %c92 = arith.constant 92 : index
    %178 = memref.load %arg5[%c92] : memref<98xf32, #tpu.memory_space<smem>>
    %179 = vector.extract_strided_slice %37 {offsets = [0, 0, 97], sizes = [1, 1, 256], strides = [1, 1, 1]} : vector<1x1x358xf32> to vector<1x1x256xf32>
    %180 = vector.broadcast %177 : f32 to vector<1x1x256xf32>
    %181 = arith.mulf %180, %179 : vector<1x1x256xf32>
    %182 = arith.addf %176, %181 : vector<1x1x256xf32>
    %183 = vector.extract_strided_slice %38 {offsets = [0, 0, 97], sizes = [1, 1, 256], strides = [1, 1, 1]} : vector<1x1x358xf32> to vector<1x1x256xf32>
    %184 = vector.broadcast %178 : f32 to vector<1x1x256xf32>
    %185 = arith.mulf %184, %183 : vector<1x1x256xf32>
    %186 = arith.addf %182, %185 : vector<1x1x256xf32>
    %187 = vector.extract_strided_slice %39 {offsets = [1, 0], sizes = [1, 256], strides = [1, 1]} : vector<7x256xf32> to vector<1x256xf32>
    %188 = vector.shape_cast %187 : vector<1x256xf32> to vector<1x1x256xf32>
    %189 = arith.mulf %186, %188 : vector<1x1x256xf32>
    %190 = arith.addf %115, %189 : vector<1x1x256xf32>
    %cst_27 = arith.constant 0.000000e+00 : f32
    %191 = vector.broadcast %cst_27 : f32 to vector<1x1x256xf32>
    %c2 = arith.constant 2 : index
    %192 = memref.load %arg5[%c2] : memref<98xf32, #tpu.memory_space<smem>>
    %c51 = arith.constant 51 : index
    %193 = memref.load %arg5[%c51] : memref<98xf32, #tpu.memory_space<smem>>
    %194 = vector.extract_strided_slice %37 {offsets = [0, 0, 2], sizes = [1, 1, 256], strides = [1, 1, 1]} : vector<1x1x358xf32> to vector<1x1x256xf32>
    %195 = vector.broadcast %192 : f32 to vector<1x1x256xf32>
    %196 = arith.mulf %195, %194 : vector<1x1x256xf32>
    %197 = arith.addf %191, %196 : vector<1x1x256xf32>
    %198 = vector.extract_strided_slice %38 {offsets = [0, 0, 2], sizes = [1, 1, 256], strides = [1, 1, 1]} : vector<1x1x358xf32> to vector<1x1x256xf32>
    %199 = vector.broadcast %193 : f32 to vector<1x1x256xf32>
    %200 = arith.mulf %199, %198 : vector<1x1x256xf32>
    %201 = arith.addf %197, %200 : vector<1x1x256xf32>
    %c9 = arith.constant 9 : index
    %202 = memref.load %arg5[%c9] : memref<98xf32, #tpu.memory_space<smem>>
    %c58 = arith.constant 58 : index
    %203 = memref.load %arg5[%c58] : memref<98xf32, #tpu.memory_space<smem>>
    %204 = vector.extract_strided_slice %37 {offsets = [0, 0, 18], sizes = [1, 1, 256], strides = [1, 1, 1]} : vector<1x1x358xf32> to vector<1x1x256xf32>
    %205 = vector.broadcast %202 : f32 to vector<1x1x256xf32>
    %206 = arith.mulf %205, %204 : vector<1x1x256xf32>
    %207 = arith.addf %201, %206 : vector<1x1x256xf32>
    %208 = vector.extract_strided_slice %38 {offsets = [0, 0, 18], sizes = [1, 1, 256], strides = [1, 1, 1]} : vector<1x1x358xf32> to vector<1x1x256xf32>
    %209 = vector.broadcast %203 : f32 to vector<1x1x256xf32>
    %210 = arith.mulf %209, %208 : vector<1x1x256xf32>
    %211 = arith.addf %207, %210 : vector<1x1x256xf32>
    %c16 = arith.constant 16 : index
    %212 = memref.load %arg5[%c16] : memref<98xf32, #tpu.memory_space<smem>>
    %c65 = arith.constant 65 : index
    %213 = memref.load %arg5[%c65] : memref<98xf32, #tpu.memory_space<smem>>
    %214 = vector.extract_strided_slice %37 {offsets = [0, 0, 34], sizes = [1, 1, 256], strides = [1, 1, 1]} : vector<1x1x358xf32> to vector<1x1x256xf32>
    %215 = vector.broadcast %212 : f32 to vector<1x1x256xf32>
    %216 = arith.mulf %215, %214 : vector<1x1x256xf32>
    %217 = arith.addf %211, %216 : vector<1x1x256xf32>
    %218 = vector.extract_strided_slice %38 {offsets = [0, 0, 34], sizes = [1, 1, 256], strides = [1, 1, 1]} : vector<1x1x358xf32> to vector<1x1x256xf32>
    %219 = vector.broadcast %213 : f32 to vector<1x1x256xf32>
    %220 = arith.mulf %219, %218 : vector<1x1x256xf32>
    %221 = arith.addf %217, %220 : vector<1x1x256xf32>
    %c23 = arith.constant 23 : index
    %222 = memref.load %arg5[%c23] : memref<98xf32, #tpu.memory_space<smem>>
    %c72 = arith.constant 72 : index
    %223 = memref.load %arg5[%c72] : memref<98xf32, #tpu.memory_space<smem>>
    %224 = vector.extract_strided_slice %37 {offsets = [0, 0, 50], sizes = [1, 1, 256], strides = [1, 1, 1]} : vector<1x1x358xf32> to vector<1x1x256xf32>
    %225 = vector.broadcast %222 : f32 to vector<1x1x256xf32>
    %226 = arith.mulf %225, %224 : vector<1x1x256xf32>
    %227 = arith.addf %221, %226 : vector<1x1x256xf32>
    %228 = vector.extract_strided_slice %38 {offsets = [0, 0, 50], sizes = [1, 1, 256], strides = [1, 1, 1]} : vector<1x1x358xf32> to vector<1x1x256xf32>
    %229 = vector.broadcast %223 : f32 to vector<1x1x256xf32>
    %230 = arith.mulf %229, %228 : vector<1x1x256xf32>
    %231 = arith.addf %227, %230 : vector<1x1x256xf32>
    %c30 = arith.constant 30 : index
    %232 = memref.load %arg5[%c30] : memref<98xf32, #tpu.memory_space<smem>>
    %c79 = arith.constant 79 : index
    %233 = memref.load %arg5[%c79] : memref<98xf32, #tpu.memory_space<smem>>
    %234 = vector.extract_strided_slice %37 {offsets = [0, 0, 66], sizes = [1, 1, 256], strides = [1, 1, 1]} : vector<1x1x358xf32> to vector<1x1x256xf32>
    %235 = vector.broadcast %232 : f32 to vector<1x1x256xf32>
    %236 = arith.mulf %235, %234 : vector<1x1x256xf32>
    %237 = arith.addf %231, %236 : vector<1x1x256xf32>
    %238 = vector.extract_strided_slice %38 {offsets = [0, 0, 66], sizes = [1, 1, 256], strides = [1, 1, 1]} : vector<1x1x358xf32> to vector<1x1x256xf32>
    %239 = vector.broadcast %233 : f32 to vector<1x1x256xf32>
    %240 = arith.mulf %239, %238 : vector<1x1x256xf32>
    %241 = arith.addf %237, %240 : vector<1x1x256xf32>
    %c37 = arith.constant 37 : index
    %242 = memref.load %arg5[%c37] : memref<98xf32, #tpu.memory_space<smem>>
    %c86 = arith.constant 86 : index
    %243 = memref.load %arg5[%c86] : memref<98xf32, #tpu.memory_space<smem>>
    %244 = vector.extract_strided_slice %37 {offsets = [0, 0, 82], sizes = [1, 1, 256], strides = [1, 1, 1]} : vector<1x1x358xf32> to vector<1x1x256xf32>
    %245 = vector.broadcast %242 : f32 to vector<1x1x256xf32>
    %246 = arith.mulf %245, %244 : vector<1x1x256xf32>
    %247 = arith.addf %241, %246 : vector<1x1x256xf32>
    %248 = vector.extract_strided_slice %38 {offsets = [0, 0, 82], sizes = [1, 1, 256], strides = [1, 1, 1]} : vector<1x1x358xf32> to vector<1x1x256xf32>
    %249 = vector.broadcast %243 : f32 to vector<1x1x256xf32>
    %250 = arith.mulf %249, %248 : vector<1x1x256xf32>
    %251 = arith.addf %247, %250 : vector<1x1x256xf32>
    %c44 = arith.constant 44 : index
    %252 = memref.load %arg5[%c44] : memref<98xf32, #tpu.memory_space<smem>>
    %c93 = arith.constant 93 : index
    %253 = memref.load %arg5[%c93] : memref<98xf32, #tpu.memory_space<smem>>
    %254 = vector.extract_strided_slice %37 {offsets = [0, 0, 98], sizes = [1, 1, 256], strides = [1, 1, 1]} : vector<1x1x358xf32> to vector<1x1x256xf32>
    %255 = vector.broadcast %252 : f32 to vector<1x1x256xf32>
    %256 = arith.mulf %255, %254 : vector<1x1x256xf32>
    %257 = arith.addf %251, %256 : vector<1x1x256xf32>
    %258 = vector.extract_strided_slice %38 {offsets = [0, 0, 98], sizes = [1, 1, 256], strides = [1, 1, 1]} : vector<1x1x358xf32> to vector<1x1x256xf32>
    %259 = vector.broadcast %253 : f32 to vector<1x1x256xf32>
    %260 = arith.mulf %259, %258 : vector<1x1x256xf32>
    %261 = arith.addf %257, %260 : vector<1x1x256xf32>
    %262 = vector.extract_strided_slice %39 {offsets = [2, 0], sizes = [1, 256], strides = [1, 1]} : vector<7x256xf32> to vector<1x256xf32>
    %263 = vector.shape_cast %262 : vector<1x256xf32> to vector<1x1x256xf32>
    %264 = arith.mulf %261, %263 : vector<1x1x256xf32>
    %265 = arith.addf %190, %264 : vector<1x1x256xf32>
    %cst_28 = arith.constant 0.000000e+00 : f32
    %266 = vector.broadcast %cst_28 : f32 to vector<1x1x256xf32>
    %c3 = arith.constant 3 : index
    %267 = memref.load %arg5[%c3] : memref<98xf32, #tpu.memory_space<smem>>
    %c52 = arith.constant 52 : index
    %268 = memref.load %arg5[%c52] : memref<98xf32, #tpu.memory_space<smem>>
    %269 = vector.extract_strided_slice %37 {offsets = [0, 0, 3], sizes = [1, 1, 256], strides = [1, 1, 1]} : vector<1x1x358xf32> to vector<1x1x256xf32>
    %270 = vector.broadcast %267 : f32 to vector<1x1x256xf32>
    %271 = arith.mulf %270, %269 : vector<1x1x256xf32>
    %272 = arith.addf %266, %271 : vector<1x1x256xf32>
    %273 = vector.extract_strided_slice %38 {offsets = [0, 0, 3], sizes = [1, 1, 256], strides = [1, 1, 1]} : vector<1x1x358xf32> to vector<1x1x256xf32>
    %274 = vector.broadcast %268 : f32 to vector<1x1x256xf32>
    %275 = arith.mulf %274, %273 : vector<1x1x256xf32>
    %276 = arith.addf %272, %275 : vector<1x1x256xf32>
    %c10 = arith.constant 10 : index
    %277 = memref.load %arg5[%c10] : memref<98xf32, #tpu.memory_space<smem>>
    %c59 = arith.constant 59 : index
    %278 = memref.load %arg5[%c59] : memref<98xf32, #tpu.memory_space<smem>>
    %279 = vector.extract_strided_slice %37 {offsets = [0, 0, 19], sizes = [1, 1, 256], strides = [1, 1, 1]} : vector<1x1x358xf32> to vector<1x1x256xf32>
    %280 = vector.broadcast %277 : f32 to vector<1x1x256xf32>
    %281 = arith.mulf %280, %279 : vector<1x1x256xf32>
    %282 = arith.addf %276, %281 : vector<1x1x256xf32>
    %283 = vector.extract_strided_slice %38 {offsets = [0, 0, 19], sizes = [1, 1, 256], strides = [1, 1, 1]} : vector<1x1x358xf32> to vector<1x1x256xf32>
    %284 = vector.broadcast %278 : f32 to vector<1x1x256xf32>
    %285 = arith.mulf %284, %283 : vector<1x1x256xf32>
    %286 = arith.addf %282, %285 : vector<1x1x256xf32>
    %c17 = arith.constant 17 : index
    %287 = memref.load %arg5[%c17] : memref<98xf32, #tpu.memory_space<smem>>
    %c66 = arith.constant 66 : index
    %288 = memref.load %arg5[%c66] : memref<98xf32, #tpu.memory_space<smem>>
    %289 = vector.extract_strided_slice %37 {offsets = [0, 0, 35], sizes = [1, 1, 256], strides = [1, 1, 1]} : vector<1x1x358xf32> to vector<1x1x256xf32>
    %290 = vector.broadcast %287 : f32 to vector<1x1x256xf32>
    %291 = arith.mulf %290, %289 : vector<1x1x256xf32>
    %292 = arith.addf %286, %291 : vector<1x1x256xf32>
    %293 = vector.extract_strided_slice %38 {offsets = [0, 0, 35], sizes = [1, 1, 256], strides = [1, 1, 1]} : vector<1x1x358xf32> to vector<1x1x256xf32>
    %294 = vector.broadcast %288 : f32 to vector<1x1x256xf32>
    %295 = arith.mulf %294, %293 : vector<1x1x256xf32>
    %296 = arith.addf %292, %295 : vector<1x1x256xf32>
    %c24 = arith.constant 24 : index
    %297 = memref.load %arg5[%c24] : memref<98xf32, #tpu.memory_space<smem>>
    %c73 = arith.constant 73 : index
    %298 = memref.load %arg5[%c73] : memref<98xf32, #tpu.memory_space<smem>>
    %299 = vector.extract_strided_slice %37 {offsets = [0, 0, 51], sizes = [1, 1, 256], strides = [1, 1, 1]} : vector<1x1x358xf32> to vector<1x1x256xf32>
    %300 = vector.broadcast %297 : f32 to vector<1x1x256xf32>
    %301 = arith.mulf %300, %299 : vector<1x1x256xf32>
    %302 = arith.addf %296, %301 : vector<1x1x256xf32>
    %303 = vector.extract_strided_slice %38 {offsets = [0, 0, 51], sizes = [1, 1, 256], strides = [1, 1, 1]} : vector<1x1x358xf32> to vector<1x1x256xf32>
    %304 = vector.broadcast %298 : f32 to vector<1x1x256xf32>
    %305 = arith.mulf %304, %303 : vector<1x1x256xf32>
    %306 = arith.addf %302, %305 : vector<1x1x256xf32>
    %c31 = arith.constant 31 : index
    %307 = memref.load %arg5[%c31] : memref<98xf32, #tpu.memory_space<smem>>
    %c80 = arith.constant 80 : index
    %308 = memref.load %arg5[%c80] : memref<98xf32, #tpu.memory_space<smem>>
    %309 = vector.extract_strided_slice %37 {offsets = [0, 0, 67], sizes = [1, 1, 256], strides = [1, 1, 1]} : vector<1x1x358xf32> to vector<1x1x256xf32>
    %310 = vector.broadcast %307 : f32 to vector<1x1x256xf32>
    %311 = arith.mulf %310, %309 : vector<1x1x256xf32>
    %312 = arith.addf %306, %311 : vector<1x1x256xf32>
    %313 = vector.extract_strided_slice %38 {offsets = [0, 0, 67], sizes = [1, 1, 256], strides = [1, 1, 1]} : vector<1x1x358xf32> to vector<1x1x256xf32>
    %314 = vector.broadcast %308 : f32 to vector<1x1x256xf32>
    %315 = arith.mulf %314, %313 : vector<1x1x256xf32>
    %316 = arith.addf %312, %315 : vector<1x1x256xf32>
    %c38 = arith.constant 38 : index
    %317 = memref.load %arg5[%c38] : memref<98xf32, #tpu.memory_space<smem>>
    %c87 = arith.constant 87 : index
    %318 = memref.load %arg5[%c87] : memref<98xf32, #tpu.memory_space<smem>>
    %319 = vector.extract_strided_slice %37 {offsets = [0, 0, 83], sizes = [1, 1, 256], strides = [1, 1, 1]} : vector<1x1x358xf32> to vector<1x1x256xf32>
    %320 = vector.broadcast %317 : f32 to vector<1x1x256xf32>
    %321 = arith.mulf %320, %319 : vector<1x1x256xf32>
    %322 = arith.addf %316, %321 : vector<1x1x256xf32>
    %323 = vector.extract_strided_slice %38 {offsets = [0, 0, 83], sizes = [1, 1, 256], strides = [1, 1, 1]} : vector<1x1x358xf32> to vector<1x1x256xf32>
    %324 = vector.broadcast %318 : f32 to vector<1x1x256xf32>
    %325 = arith.mulf %324, %323 : vector<1x1x256xf32>
    %326 = arith.addf %322, %325 : vector<1x1x256xf32>
    %c45 = arith.constant 45 : index
    %327 = memref.load %arg5[%c45] : memref<98xf32, #tpu.memory_space<smem>>
    %c94 = arith.constant 94 : index
    %328 = memref.load %arg5[%c94] : memref<98xf32, #tpu.memory_space<smem>>
    %329 = vector.extract_strided_slice %37 {offsets = [0, 0, 99], sizes = [1, 1, 256], strides = [1, 1, 1]} : vector<1x1x358xf32> to vector<1x1x256xf32>
    %330 = vector.broadcast %327 : f32 to vector<1x1x256xf32>
    %331 = arith.mulf %330, %329 : vector<1x1x256xf32>
    %332 = arith.addf %326, %331 : vector<1x1x256xf32>
    %333 = vector.extract_strided_slice %38 {offsets = [0, 0, 99], sizes = [1, 1, 256], strides = [1, 1, 1]} : vector<1x1x358xf32> to vector<1x1x256xf32>
    %334 = vector.broadcast %328 : f32 to vector<1x1x256xf32>
    %335 = arith.mulf %334, %333 : vector<1x1x256xf32>
    %336 = arith.addf %332, %335 : vector<1x1x256xf32>
    %337 = vector.extract_strided_slice %39 {offsets = [3, 0], sizes = [1, 256], strides = [1, 1]} : vector<7x256xf32> to vector<1x256xf32>
    %338 = vector.shape_cast %337 : vector<1x256xf32> to vector<1x1x256xf32>
    %339 = arith.mulf %336, %338 : vector<1x1x256xf32>
    %340 = arith.addf %265, %339 : vector<1x1x256xf32>
    %cst_29 = arith.constant 0.000000e+00 : f32
    %341 = vector.broadcast %cst_29 : f32 to vector<1x1x256xf32>
    %c4 = arith.constant 4 : index
    %342 = memref.load %arg5[%c4] : memref<98xf32, #tpu.memory_space<smem>>
    %c53 = arith.constant 53 : index
    %343 = memref.load %arg5[%c53] : memref<98xf32, #tpu.memory_space<smem>>
    %344 = vector.extract_strided_slice %37 {offsets = [0, 0, 4], sizes = [1, 1, 256], strides = [1, 1, 1]} : vector<1x1x358xf32> to vector<1x1x256xf32>
    %345 = vector.broadcast %342 : f32 to vector<1x1x256xf32>
    %346 = arith.mulf %345, %344 : vector<1x1x256xf32>
    %347 = arith.addf %341, %346 : vector<1x1x256xf32>
    %348 = vector.extract_strided_slice %38 {offsets = [0, 0, 4], sizes = [1, 1, 256], strides = [1, 1, 1]} : vector<1x1x358xf32> to vector<1x1x256xf32>
    %349 = vector.broadcast %343 : f32 to vector<1x1x256xf32>
    %350 = arith.mulf %349, %348 : vector<1x1x256xf32>
    %351 = arith.addf %347, %350 : vector<1x1x256xf32>
    %c11 = arith.constant 11 : index
    %352 = memref.load %arg5[%c11] : memref<98xf32, #tpu.memory_space<smem>>
    %c60 = arith.constant 60 : index
    %353 = memref.load %arg5[%c60] : memref<98xf32, #tpu.memory_space<smem>>
    %354 = vector.extract_strided_slice %37 {offsets = [0, 0, 20], sizes = [1, 1, 256], strides = [1, 1, 1]} : vector<1x1x358xf32> to vector<1x1x256xf32>
    %355 = vector.broadcast %352 : f32 to vector<1x1x256xf32>
    %356 = arith.mulf %355, %354 : vector<1x1x256xf32>
    %357 = arith.addf %351, %356 : vector<1x1x256xf32>
    %358 = vector.extract_strided_slice %38 {offsets = [0, 0, 20], sizes = [1, 1, 256], strides = [1, 1, 1]} : vector<1x1x358xf32> to vector<1x1x256xf32>
    %359 = vector.broadcast %353 : f32 to vector<1x1x256xf32>
    %360 = arith.mulf %359, %358 : vector<1x1x256xf32>
    %361 = arith.addf %357, %360 : vector<1x1x256xf32>
    %c18 = arith.constant 18 : index
    %362 = memref.load %arg5[%c18] : memref<98xf32, #tpu.memory_space<smem>>
    %c67 = arith.constant 67 : index
    %363 = memref.load %arg5[%c67] : memref<98xf32, #tpu.memory_space<smem>>
    %364 = vector.extract_strided_slice %37 {offsets = [0, 0, 36], sizes = [1, 1, 256], strides = [1, 1, 1]} : vector<1x1x358xf32> to vector<1x1x256xf32>
    %365 = vector.broadcast %362 : f32 to vector<1x1x256xf32>
    %366 = arith.mulf %365, %364 : vector<1x1x256xf32>
    %367 = arith.addf %361, %366 : vector<1x1x256xf32>
    %368 = vector.extract_strided_slice %38 {offsets = [0, 0, 36], sizes = [1, 1, 256], strides = [1, 1, 1]} : vector<1x1x358xf32> to vector<1x1x256xf32>
    %369 = vector.broadcast %363 : f32 to vector<1x1x256xf32>
    %370 = arith.mulf %369, %368 : vector<1x1x256xf32>
    %371 = arith.addf %367, %370 : vector<1x1x256xf32>
    %c25 = arith.constant 25 : index
    %372 = memref.load %arg5[%c25] : memref<98xf32, #tpu.memory_space<smem>>
    %c74 = arith.constant 74 : index
    %373 = memref.load %arg5[%c74] : memref<98xf32, #tpu.memory_space<smem>>
    %374 = vector.extract_strided_slice %37 {offsets = [0, 0, 52], sizes = [1, 1, 256], strides = [1, 1, 1]} : vector<1x1x358xf32> to vector<1x1x256xf32>
    %375 = vector.broadcast %372 : f32 to vector<1x1x256xf32>
    %376 = arith.mulf %375, %374 : vector<1x1x256xf32>
    %377 = arith.addf %371, %376 : vector<1x1x256xf32>
    %378 = vector.extract_strided_slice %38 {offsets = [0, 0, 52], sizes = [1, 1, 256], strides = [1, 1, 1]} : vector<1x1x358xf32> to vector<1x1x256xf32>
    %379 = vector.broadcast %373 : f32 to vector<1x1x256xf32>
    %380 = arith.mulf %379, %378 : vector<1x1x256xf32>
    %381 = arith.addf %377, %380 : vector<1x1x256xf32>
    %c32 = arith.constant 32 : index
    %382 = memref.load %arg5[%c32] : memref<98xf32, #tpu.memory_space<smem>>
    %c81 = arith.constant 81 : index
    %383 = memref.load %arg5[%c81] : memref<98xf32, #tpu.memory_space<smem>>
    %384 = vector.extract_strided_slice %37 {offsets = [0, 0, 68], sizes = [1, 1, 256], strides = [1, 1, 1]} : vector<1x1x358xf32> to vector<1x1x256xf32>
    %385 = vector.broadcast %382 : f32 to vector<1x1x256xf32>
    %386 = arith.mulf %385, %384 : vector<1x1x256xf32>
    %387 = arith.addf %381, %386 : vector<1x1x256xf32>
    %388 = vector.extract_strided_slice %38 {offsets = [0, 0, 68], sizes = [1, 1, 256], strides = [1, 1, 1]} : vector<1x1x358xf32> to vector<1x1x256xf32>
    %389 = vector.broadcast %383 : f32 to vector<1x1x256xf32>
    %390 = arith.mulf %389, %388 : vector<1x1x256xf32>
    %391 = arith.addf %387, %390 : vector<1x1x256xf32>
    %c39 = arith.constant 39 : index
    %392 = memref.load %arg5[%c39] : memref<98xf32, #tpu.memory_space<smem>>
    %c88 = arith.constant 88 : index
    %393 = memref.load %arg5[%c88] : memref<98xf32, #tpu.memory_space<smem>>
    %394 = vector.extract_strided_slice %37 {offsets = [0, 0, 84], sizes = [1, 1, 256], strides = [1, 1, 1]} : vector<1x1x358xf32> to vector<1x1x256xf32>
    %395 = vector.broadcast %392 : f32 to vector<1x1x256xf32>
    %396 = arith.mulf %395, %394 : vector<1x1x256xf32>
    %397 = arith.addf %391, %396 : vector<1x1x256xf32>
    %398 = vector.extract_strided_slice %38 {offsets = [0, 0, 84], sizes = [1, 1, 256], strides = [1, 1, 1]} : vector<1x1x358xf32> to vector<1x1x256xf32>
    %399 = vector.broadcast %393 : f32 to vector<1x1x256xf32>
    %400 = arith.mulf %399, %398 : vector<1x1x256xf32>
    %401 = arith.addf %397, %400 : vector<1x1x256xf32>
    %c46 = arith.constant 46 : index
    %402 = memref.load %arg5[%c46] : memref<98xf32, #tpu.memory_space<smem>>
    %c95 = arith.constant 95 : index
    %403 = memref.load %arg5[%c95] : memref<98xf32, #tpu.memory_space<smem>>
    %404 = vector.extract_strided_slice %37 {offsets = [0, 0, 100], sizes = [1, 1, 256], strides = [1, 1, 1]} : vector<1x1x358xf32> to vector<1x1x256xf32>
    %405 = vector.broadcast %402 : f32 to vector<1x1x256xf32>
    %406 = arith.mulf %405, %404 : vector<1x1x256xf32>
    %407 = arith.addf %401, %406 : vector<1x1x256xf32>
    %408 = vector.extract_strided_slice %38 {offsets = [0, 0, 100], sizes = [1, 1, 256], strides = [1, 1, 1]} : vector<1x1x358xf32> to vector<1x1x256xf32>
    %409 = vector.broadcast %403 : f32 to vector<1x1x256xf32>
    %410 = arith.mulf %409, %408 : vector<1x1x256xf32>
    %411 = arith.addf %407, %410 : vector<1x1x256xf32>
    %412 = vector.extract_strided_slice %39 {offsets = [4, 0], sizes = [1, 256], strides = [1, 1]} : vector<7x256xf32> to vector<1x256xf32>
    %413 = vector.shape_cast %412 : vector<1x256xf32> to vector<1x1x256xf32>
    %414 = arith.mulf %411, %413 : vector<1x1x256xf32>
    %415 = arith.addf %340, %414 : vector<1x1x256xf32>
    %cst_30 = arith.constant 0.000000e+00 : f32
    %416 = vector.broadcast %cst_30 : f32 to vector<1x1x256xf32>
    %c5 = arith.constant 5 : index
    %417 = memref.load %arg5[%c5] : memref<98xf32, #tpu.memory_space<smem>>
    %c54 = arith.constant 54 : index
    %418 = memref.load %arg5[%c54] : memref<98xf32, #tpu.memory_space<smem>>
    %419 = vector.extract_strided_slice %37 {offsets = [0, 0, 5], sizes = [1, 1, 256], strides = [1, 1, 1]} : vector<1x1x358xf32> to vector<1x1x256xf32>
    %420 = vector.broadcast %417 : f32 to vector<1x1x256xf32>
    %421 = arith.mulf %420, %419 : vector<1x1x256xf32>
    %422 = arith.addf %416, %421 : vector<1x1x256xf32>
    %423 = vector.extract_strided_slice %38 {offsets = [0, 0, 5], sizes = [1, 1, 256], strides = [1, 1, 1]} : vector<1x1x358xf32> to vector<1x1x256xf32>
    %424 = vector.broadcast %418 : f32 to vector<1x1x256xf32>
    %425 = arith.mulf %424, %423 : vector<1x1x256xf32>
    %426 = arith.addf %422, %425 : vector<1x1x256xf32>
    %c12 = arith.constant 12 : index
    %427 = memref.load %arg5[%c12] : memref<98xf32, #tpu.memory_space<smem>>
    %c61 = arith.constant 61 : index
    %428 = memref.load %arg5[%c61] : memref<98xf32, #tpu.memory_space<smem>>
    %429 = vector.extract_strided_slice %37 {offsets = [0, 0, 21], sizes = [1, 1, 256], strides = [1, 1, 1]} : vector<1x1x358xf32> to vector<1x1x256xf32>
    %430 = vector.broadcast %427 : f32 to vector<1x1x256xf32>
    %431 = arith.mulf %430, %429 : vector<1x1x256xf32>
    %432 = arith.addf %426, %431 : vector<1x1x256xf32>
    %433 = vector.extract_strided_slice %38 {offsets = [0, 0, 21], sizes = [1, 1, 256], strides = [1, 1, 1]} : vector<1x1x358xf32> to vector<1x1x256xf32>
    %434 = vector.broadcast %428 : f32 to vector<1x1x256xf32>
    %435 = arith.mulf %434, %433 : vector<1x1x256xf32>
    %436 = arith.addf %432, %435 : vector<1x1x256xf32>
    %c19 = arith.constant 19 : index
    %437 = memref.load %arg5[%c19] : memref<98xf32, #tpu.memory_space<smem>>
    %c68 = arith.constant 68 : index
    %438 = memref.load %arg5[%c68] : memref<98xf32, #tpu.memory_space<smem>>
    %439 = vector.extract_strided_slice %37 {offsets = [0, 0, 37], sizes = [1, 1, 256], strides = [1, 1, 1]} : vector<1x1x358xf32> to vector<1x1x256xf32>
    %440 = vector.broadcast %437 : f32 to vector<1x1x256xf32>
    %441 = arith.mulf %440, %439 : vector<1x1x256xf32>
    %442 = arith.addf %436, %441 : vector<1x1x256xf32>
    %443 = vector.extract_strided_slice %38 {offsets = [0, 0, 37], sizes = [1, 1, 256], strides = [1, 1, 1]} : vector<1x1x358xf32> to vector<1x1x256xf32>
    %444 = vector.broadcast %438 : f32 to vector<1x1x256xf32>
    %445 = arith.mulf %444, %443 : vector<1x1x256xf32>
    %446 = arith.addf %442, %445 : vector<1x1x256xf32>
    %c26 = arith.constant 26 : index
    %447 = memref.load %arg5[%c26] : memref<98xf32, #tpu.memory_space<smem>>
    %c75 = arith.constant 75 : index
    %448 = memref.load %arg5[%c75] : memref<98xf32, #tpu.memory_space<smem>>
    %449 = vector.extract_strided_slice %37 {offsets = [0, 0, 53], sizes = [1, 1, 256], strides = [1, 1, 1]} : vector<1x1x358xf32> to vector<1x1x256xf32>
    %450 = vector.broadcast %447 : f32 to vector<1x1x256xf32>
    %451 = arith.mulf %450, %449 : vector<1x1x256xf32>
    %452 = arith.addf %446, %451 : vector<1x1x256xf32>
    %453 = vector.extract_strided_slice %38 {offsets = [0, 0, 53], sizes = [1, 1, 256], strides = [1, 1, 1]} : vector<1x1x358xf32> to vector<1x1x256xf32>
    %454 = vector.broadcast %448 : f32 to vector<1x1x256xf32>
    %455 = arith.mulf %454, %453 : vector<1x1x256xf32>
    %456 = arith.addf %452, %455 : vector<1x1x256xf32>
    %c33 = arith.constant 33 : index
    %457 = memref.load %arg5[%c33] : memref<98xf32, #tpu.memory_space<smem>>
    %c82 = arith.constant 82 : index
    %458 = memref.load %arg5[%c82] : memref<98xf32, #tpu.memory_space<smem>>
    %459 = vector.extract_strided_slice %37 {offsets = [0, 0, 69], sizes = [1, 1, 256], strides = [1, 1, 1]} : vector<1x1x358xf32> to vector<1x1x256xf32>
    %460 = vector.broadcast %457 : f32 to vector<1x1x256xf32>
    %461 = arith.mulf %460, %459 : vector<1x1x256xf32>
    %462 = arith.addf %456, %461 : vector<1x1x256xf32>
    %463 = vector.extract_strided_slice %38 {offsets = [0, 0, 69], sizes = [1, 1, 256], strides = [1, 1, 1]} : vector<1x1x358xf32> to vector<1x1x256xf32>
    %464 = vector.broadcast %458 : f32 to vector<1x1x256xf32>
    %465 = arith.mulf %464, %463 : vector<1x1x256xf32>
    %466 = arith.addf %462, %465 : vector<1x1x256xf32>
    %c40 = arith.constant 40 : index
    %467 = memref.load %arg5[%c40] : memref<98xf32, #tpu.memory_space<smem>>
    %c89 = arith.constant 89 : index
    %468 = memref.load %arg5[%c89] : memref<98xf32, #tpu.memory_space<smem>>
    %469 = vector.extract_strided_slice %37 {offsets = [0, 0, 85], sizes = [1, 1, 256], strides = [1, 1, 1]} : vector<1x1x358xf32> to vector<1x1x256xf32>
    %470 = vector.broadcast %467 : f32 to vector<1x1x256xf32>
    %471 = arith.mulf %470, %469 : vector<1x1x256xf32>
    %472 = arith.addf %466, %471 : vector<1x1x256xf32>
    %473 = vector.extract_strided_slice %38 {offsets = [0, 0, 85], sizes = [1, 1, 256], strides = [1, 1, 1]} : vector<1x1x358xf32> to vector<1x1x256xf32>
    %474 = vector.broadcast %468 : f32 to vector<1x1x256xf32>
    %475 = arith.mulf %474, %473 : vector<1x1x256xf32>
    %476 = arith.addf %472, %475 : vector<1x1x256xf32>
    %c47 = arith.constant 47 : index
    %477 = memref.load %arg5[%c47] : memref<98xf32, #tpu.memory_space<smem>>
    %c96 = arith.constant 96 : index
    %478 = memref.load %arg5[%c96] : memref<98xf32, #tpu.memory_space<smem>>
    %479 = vector.extract_strided_slice %37 {offsets = [0, 0, 101], sizes = [1, 1, 256], strides = [1, 1, 1]} : vector<1x1x358xf32> to vector<1x1x256xf32>
    %480 = vector.broadcast %477 : f32 to vector<1x1x256xf32>
    %481 = arith.mulf %480, %479 : vector<1x1x256xf32>
    %482 = arith.addf %476, %481 : vector<1x1x256xf32>
    %483 = vector.extract_strided_slice %38 {offsets = [0, 0, 101], sizes = [1, 1, 256], strides = [1, 1, 1]} : vector<1x1x358xf32> to vector<1x1x256xf32>
    %484 = vector.broadcast %478 : f32 to vector<1x1x256xf32>
    %485 = arith.mulf %484, %483 : vector<1x1x256xf32>
    %486 = arith.addf %482, %485 : vector<1x1x256xf32>
    %487 = vector.extract_strided_slice %39 {offsets = [5, 0], sizes = [1, 256], strides = [1, 1]} : vector<7x256xf32> to vector<1x256xf32>
    %488 = vector.shape_cast %487 : vector<1x256xf32> to vector<1x1x256xf32>
    %489 = arith.mulf %486, %488 : vector<1x1x256xf32>
    %490 = arith.addf %415, %489 : vector<1x1x256xf32>
    %cst_31 = arith.constant 0.000000e+00 : f32
    %491 = vector.broadcast %cst_31 : f32 to vector<1x1x256xf32>
    %c6 = arith.constant 6 : index
    %492 = memref.load %arg5[%c6] : memref<98xf32, #tpu.memory_space<smem>>
    %c55 = arith.constant 55 : index
    %493 = memref.load %arg5[%c55] : memref<98xf32, #tpu.memory_space<smem>>
    %494 = vector.extract_strided_slice %37 {offsets = [0, 0, 6], sizes = [1, 1, 256], strides = [1, 1, 1]} : vector<1x1x358xf32> to vector<1x1x256xf32>
    %495 = vector.broadcast %492 : f32 to vector<1x1x256xf32>
    %496 = arith.mulf %495, %494 : vector<1x1x256xf32>
    %497 = arith.addf %491, %496 : vector<1x1x256xf32>
    %498 = vector.extract_strided_slice %38 {offsets = [0, 0, 6], sizes = [1, 1, 256], strides = [1, 1, 1]} : vector<1x1x358xf32> to vector<1x1x256xf32>
    %499 = vector.broadcast %493 : f32 to vector<1x1x256xf32>
    %500 = arith.mulf %499, %498 : vector<1x1x256xf32>
    %501 = arith.addf %497, %500 : vector<1x1x256xf32>
    %c13 = arith.constant 13 : index
    %502 = memref.load %arg5[%c13] : memref<98xf32, #tpu.memory_space<smem>>
    %c62 = arith.constant 62 : index
    %503 = memref.load %arg5[%c62] : memref<98xf32, #tpu.memory_space<smem>>
    %504 = vector.extract_strided_slice %37 {offsets = [0, 0, 22], sizes = [1, 1, 256], strides = [1, 1, 1]} : vector<1x1x358xf32> to vector<1x1x256xf32>
    %505 = vector.broadcast %502 : f32 to vector<1x1x256xf32>
    %506 = arith.mulf %505, %504 : vector<1x1x256xf32>
    %507 = arith.addf %501, %506 : vector<1x1x256xf32>
    %508 = vector.extract_strided_slice %38 {offsets = [0, 0, 22], sizes = [1, 1, 256], strides = [1, 1, 1]} : vector<1x1x358xf32> to vector<1x1x256xf32>
    %509 = vector.broadcast %503 : f32 to vector<1x1x256xf32>
    %510 = arith.mulf %509, %508 : vector<1x1x256xf32>
    %511 = arith.addf %507, %510 : vector<1x1x256xf32>
    %c20 = arith.constant 20 : index
    %512 = memref.load %arg5[%c20] : memref<98xf32, #tpu.memory_space<smem>>
    %c69 = arith.constant 69 : index
    %513 = memref.load %arg5[%c69] : memref<98xf32, #tpu.memory_space<smem>>
    %514 = vector.extract_strided_slice %37 {offsets = [0, 0, 38], sizes = [1, 1, 256], strides = [1, 1, 1]} : vector<1x1x358xf32> to vector<1x1x256xf32>
    %515 = vector.broadcast %512 : f32 to vector<1x1x256xf32>
    %516 = arith.mulf %515, %514 : vector<1x1x256xf32>
    %517 = arith.addf %511, %516 : vector<1x1x256xf32>
    %518 = vector.extract_strided_slice %38 {offsets = [0, 0, 38], sizes = [1, 1, 256], strides = [1, 1, 1]} : vector<1x1x358xf32> to vector<1x1x256xf32>
    %519 = vector.broadcast %513 : f32 to vector<1x1x256xf32>
    %520 = arith.mulf %519, %518 : vector<1x1x256xf32>
    %521 = arith.addf %517, %520 : vector<1x1x256xf32>
    %c27 = arith.constant 27 : index
    %522 = memref.load %arg5[%c27] : memref<98xf32, #tpu.memory_space<smem>>
    %c76 = arith.constant 76 : index
    %523 = memref.load %arg5[%c76] : memref<98xf32, #tpu.memory_space<smem>>
    %524 = vector.extract_strided_slice %37 {offsets = [0, 0, 54], sizes = [1, 1, 256], strides = [1, 1, 1]} : vector<1x1x358xf32> to vector<1x1x256xf32>
    %525 = vector.broadcast %522 : f32 to vector<1x1x256xf32>
    %526 = arith.mulf %525, %524 : vector<1x1x256xf32>
    %527 = arith.addf %521, %526 : vector<1x1x256xf32>
    %528 = vector.extract_strided_slice %38 {offsets = [0, 0, 54], sizes = [1, 1, 256], strides = [1, 1, 1]} : vector<1x1x358xf32> to vector<1x1x256xf32>
    %529 = vector.broadcast %523 : f32 to vector<1x1x256xf32>
    %530 = arith.mulf %529, %528 : vector<1x1x256xf32>
    %531 = arith.addf %527, %530 : vector<1x1x256xf32>
    %c34 = arith.constant 34 : index
    %532 = memref.load %arg5[%c34] : memref<98xf32, #tpu.memory_space<smem>>
    %c83 = arith.constant 83 : index
    %533 = memref.load %arg5[%c83] : memref<98xf32, #tpu.memory_space<smem>>
    %534 = vector.extract_strided_slice %37 {offsets = [0, 0, 70], sizes = [1, 1, 256], strides = [1, 1, 1]} : vector<1x1x358xf32> to vector<1x1x256xf32>
    %535 = vector.broadcast %532 : f32 to vector<1x1x256xf32>
    %536 = arith.mulf %535, %534 : vector<1x1x256xf32>
    %537 = arith.addf %531, %536 : vector<1x1x256xf32>
    %538 = vector.extract_strided_slice %38 {offsets = [0, 0, 70], sizes = [1, 1, 256], strides = [1, 1, 1]} : vector<1x1x358xf32> to vector<1x1x256xf32>
    %539 = vector.broadcast %533 : f32 to vector<1x1x256xf32>
    %540 = arith.mulf %539, %538 : vector<1x1x256xf32>
    %541 = arith.addf %537, %540 : vector<1x1x256xf32>
    %c41 = arith.constant 41 : index
    %542 = memref.load %arg5[%c41] : memref<98xf32, #tpu.memory_space<smem>>
    %c90 = arith.constant 90 : index
    %543 = memref.load %arg5[%c90] : memref<98xf32, #tpu.memory_space<smem>>
    %544 = vector.extract_strided_slice %37 {offsets = [0, 0, 86], sizes = [1, 1, 256], strides = [1, 1, 1]} : vector<1x1x358xf32> to vector<1x1x256xf32>
    %545 = vector.broadcast %542 : f32 to vector<1x1x256xf32>
    %546 = arith.mulf %545, %544 : vector<1x1x256xf32>
    %547 = arith.addf %541, %546 : vector<1x1x256xf32>
    %548 = vector.extract_strided_slice %38 {offsets = [0, 0, 86], sizes = [1, 1, 256], strides = [1, 1, 1]} : vector<1x1x358xf32> to vector<1x1x256xf32>
    %549 = vector.broadcast %543 : f32 to vector<1x1x256xf32>
    %550 = arith.mulf %549, %548 : vector<1x1x256xf32>
    %551 = arith.addf %547, %550 : vector<1x1x256xf32>
    %c48 = arith.constant 48 : index
    %552 = memref.load %arg5[%c48] : memref<98xf32, #tpu.memory_space<smem>>
    %c97 = arith.constant 97 : index
    %553 = memref.load %arg5[%c97] : memref<98xf32, #tpu.memory_space<smem>>
    %554 = vector.extract_strided_slice %37 {offsets = [0, 0, 102], sizes = [1, 1, 256], strides = [1, 1, 1]} : vector<1x1x358xf32> to vector<1x1x256xf32>
    %555 = vector.broadcast %552 : f32 to vector<1x1x256xf32>
    %556 = arith.mulf %555, %554 : vector<1x1x256xf32>
    %557 = arith.addf %551, %556 : vector<1x1x256xf32>
    %558 = vector.extract_strided_slice %38 {offsets = [0, 0, 102], sizes = [1, 1, 256], strides = [1, 1, 1]} : vector<1x1x358xf32> to vector<1x1x256xf32>
    %559 = vector.broadcast %553 : f32 to vector<1x1x256xf32>
    %560 = arith.mulf %559, %558 : vector<1x1x256xf32>
    %561 = arith.addf %557, %560 : vector<1x1x256xf32>
    %562 = vector.extract_strided_slice %39 {offsets = [6, 0], sizes = [1, 256], strides = [1, 1]} : vector<7x256xf32> to vector<1x256xf32>
    %563 = vector.shape_cast %562 : vector<1x256xf32> to vector<1x1x256xf32>
    %564 = arith.mulf %561, %563 : vector<1x1x256xf32>
    %565 = arith.addf %490, %564 : vector<1x1x256xf32>
    %cst_32 = arith.constant 0.000000e+00 : f32
    %566 = vector.broadcast %cst_32 : f32 to vector<1x1x256xf32>
    %567 = arith.subf %566, %565 : vector<1x1x256xf32>
    %568 = math.exp %567 : vector<1x1x256xf32>
    %cst_33 = arith.constant 1.000000e+00 : f32
    %569 = vector.broadcast %cst_33 : f32 to vector<1x1x256xf32>
    %570 = arith.addf %569, %568 : vector<1x1x256xf32>
    %cst_34 = arith.constant 1.000000e+00 : f32
    %571 = vector.broadcast %cst_34 : f32 to vector<1x1x256xf32>
    %572 = arith.divf %571, %570 : vector<1x1x256xf32>
    %c0_35 = arith.constant 0 : index
    %c0_36 = arith.constant 0 : index
    %c0_37 = arith.constant 0 : index
    %573 = vector.load %arg6[%c0_35, %c0_36, %c0_37] : memref<1x32x256xf32, #tpu.memory_space<vmem>>, vector<1x32x256xf32>
    %574 = vector.broadcast %572 : vector<1x1x256xf32> to vector<1x32x256xf32>
    %575 = arith.mulf %573, %574 : vector<1x32x256xf32>
    %c0_38 = arith.constant 0 : index
    %c0_39 = arith.constant 0 : index
    %c0_40 = arith.constant 0 : index
    %576 = vector.load %arg6[%c0_38, %c0_39, %c0_40] : memref<1x32x256xf32, #tpu.memory_space<vmem>>, vector<1x32x256xf32>
    tpu.vector_store %arg6[%c0_38, %c0_39, %c0_40], %575 {strides = array<i32>} : memref<1x32x256xf32, #tpu.memory_space<vmem>>, vector<1x32x256xf32>,
    return
  }
  func.func @transform_0(%arg0: i32) -> (i32, i32, i32) {
    %c0_i32 = arith.constant 0 : i32
    %c0_i32_0 = arith.constant 0 : i32
    %c0_i32_1 = arith.constant 0 : i32
    return %arg0, %c0_i32, %c0_i32_0 : i32, i32, i32
  }
  func.func @transform_1(%arg0: i32) -> (i32, i32) {
    %c0_i32 = arith.constant 0 : i32
    %c0_i32_0 = arith.constant 0 : i32
    %c0_i32_1 = arith.constant 0 : i32
    return %c0_i32, %c0_i32_0 : i32, i32
  }
  func.func @transform_2(%arg0: i32) -> (i32, i32) {
    %c0_i32 = arith.constant 0 : i32
    %c0_i32_0 = arith.constant 0 : i32
    %c0_i32_1 = arith.constant 0 : i32
    return %c0_i32, %c0_i32_0 : i32, i32
  }
  func.func @transform_3(%arg0: i32) -> (i32, i32) {
    %c0_i32 = arith.constant 0 : i32
    %c0_i32_0 = arith.constant 0 : i32
    %c0_i32_1 = arith.constant 0 : i32
    return %c0_i32, %c0_i32_0 : i32, i32
  }
  func.func @transform_4(%arg0: i32) -> i32 {
    %c0_i32 = arith.constant 0 : i32
    %c0_i32_0 = arith.constant 0 : i32
    return %c0_i32 : i32
  }
  func.func @transform_5(%arg0: i32) -> (i32, i32, i32) {
    %c0_i32 = arith.constant 0 : i32
    %c0_i32_0 = arith.constant 0 : i32
    %c0_i32_1 = arith.constant 0 : i32
    return %arg0, %c0_i32, %c0_i32_0 : i32, i32, i32
  }
}

</mosaic_0001>

<bundles_post_ra>
// kernel: squeeze.5
= control target key start
LH: loop header
LB: loop body
LE: loop exit
PB: predicated region body
PF: predicated region fallthrough
CT: control target
= control target key end

     0   :  { %s117_s10 = smov 91   ;;  %s118_s11 = smov 77   ;;  %vm3_vm0 = vcmask 56320   ;;  %vm9_vm1 = vcmask 802520   ;;  %vm15_vm2 = vcmask 745120   ;;  %vm21_vm3 = vcmask 687720   ;;  %s185_s0 = inlined_call_operand.vmem [shape: f32[1,2,7,7], index: 0, kind: input, shape index: {}]   ;;  %s186_s1 = inlined_call_operand.vmem [shape: f32[98], index: 1, kind: output, shape index: {}]  }
   0x1   :  { %v91_v0 = vld [vmem:[%s185_s0 + $0xe] sm:$0x1]   ;;  %v93_v1 = vld [vmem:[%s185_s0 + $0xc] sm:$0x1]   ;;  %v92_v2 = vld [vmem:[%s185_s0 + $0xd] sm:$0x1]  }
   0x2   :  { %7 = vrot.lane.b32.xlu0 %v91_v0, %s117_s10  ;;  %19 = vrot.lane.b32.xlu1 %v93_v1, %s118_s11  ;;  %v94_v3 = vld [vmem:[%s185_s0 + $0xb] sm:$0x1]   ;;  %s119_s16 = smov 84   ;;  %s120_s17 = smov 70   ;;  %v95_v4 = vld [vmem:[%s185_s0 + $0xa] sm:$0x1]  }
   0x3   :  { %v96_v5 = vld [vmem:[%s185_s0 + $0x9] sm:$0x1]   ;;  %v2_v6 = vld [vmem:[%s185_s0] sm:$0x1]   ;;  %s121_s24 = smov 63   ;;  %s122_s25 = smov 56  }
   0x4   :  { %4 = vst.msk [vmem:[#allocation0] sm:$0x1] %vm3_vm0, %v2_v6   ;;  %v97_v7 = vld [vmem:[%s185_s0 + $0x8] sm:$0x1]   ;;  %v98_v8 = vld [vmem:[%s185_s0 + $0x6] sm:$0x1]  }
   0x5   :  { %s123_s30 = smov 49   ;;  %s124_s2 = smov 42   ;;  %v99_v9 = vld [vmem:[%s185_s0 + $0x5] sm:$0x1]   ;;  %v100_v10 = vld [vmem:[%s185_s0 + $0x4] sm:$0x1]  }
   0x6   :  { %13 = vrot.lane.b32.xlu0 %v92_v2, %s119_s16  ;;  %25 = vrot.lane.b32.xlu1 %v94_v3, %s120_s17  ;;  %s125_s7 = smov 35   ;;  %s126_s8 = smov 28   ;;  %v101_v11 = vld [vmem:[%s185_s0 + $0x3] sm:$0x1]   ;;  %v102_v12 = vld [vmem:[%s185_s0 + $0x2] sm:$0x1]  }
   0x7   :  { %s127_s13 = smov 21   ;;  %s128_s14 = smov 14   ;;  %v103_v13 = vld [vmem:[%s185_s0 + $0x1] sm:$0x1]   ;;  %vm27_vm4 = vcmask 630320   ;;  %vm33_vm5 = vcmask 572920  }
   0x8   :  { %s129_s0 = smov 7   ;;  %vm39_vm6 = vcmask 515520   ;;  %vm45_vm7 = vcmask 458120   ;;  %vm51_vm8 = vcmask 400720   ;;  %vm57_vm9 = vcmask 343320  }
   0x9   :  { %vm63_vm10 = vcmask 285920   ;;  %vm69_vm11 = vcmask 228520   ;;  %vm75_vm12 = vcmask 171120   ;;  %vm81_vm13 = vcmask 113720  }
   0xa   :  { %31 = vrot.lane.b32.xlu0 %v95_v4, %s121_s24  ;;  %37 = vrot.lane.b32.xlu1 %v96_v5, %s122_s25 }
   0xe   :  { %43 = vrot.lane.b32.xlu0 %v97_v7, %s123_s30  ;;  %49 = vrot.lane.b32.xlu1 %v98_v8, %s124_s2 }
  0x12   :  { %55 = vrot.lane.b32.xlu0 %v99_v9, %s125_s7  ;;  %61 = vrot.lane.b32.xlu1 %v100_v10, %s126_s8 }
  0x16   :  { %67 = vrot.lane.b32.xlu0 %v101_v11, %s127_s13  ;;  %73 = vrot.lane.b32.xlu1 %v102_v12, %s128_s14 }
  0x1a   :  { %79 = vrot.lane.b32.xlu0 %v103_v13, %s129_s0 }
  0x74   :  { %v8_v14 = vpop.permute.xlu0 %7   ;;  %v20_v15 = vpop.permute.xlu1 %19  }
  0x75   :  { %10 = vst.msk [vmem:[#allocation0] sm:$0x1] %vm9_vm1, %v8_v14  }
  0x78   :  { %v14_v16 = vpop.permute.xlu0 %13   ;;  %v26_v17 = vpop.permute.xlu1 %25  }
  0x79   :  { %16 = vst.msk [vmem:[#allocation0] sm:$0x1] %vm15_vm2, %v14_v16  }
  0x7a   :  { %22 = vst.msk [vmem:[#allocation0] sm:$0x1] %vm21_vm3, %v20_v15  }
  0x7b   :  { %28 = vst.msk [vmem:[#allocation0] sm:$0x1] %vm27_vm4, %v26_v17  }
  0x7c   :  { %v32_v18 = vpop.permute.xlu0 %31   ;;  %v38_v19 = vpop.permute.xlu1 %37  }
  0x7d   :  { %34 = vst.msk [vmem:[#allocation0] sm:$0x1] %vm33_vm5, %v32_v18  }
  0x7e   :  { %40 = vst.msk [vmem:[#allocation0] sm:$0x1] %vm39_vm6, %v38_v19  }
  0x80   :  { %v44_v20 = vpop.permute.xlu0 %43   ;;  %v50_v21 = vpop.permute.xlu1 %49  }
  0x81   :  { %46 = vst.msk [vmem:[#allocation0] sm:$0x1] %vm45_vm7, %v44_v20  }
  0x82   :  { %52 = vst.msk [vmem:[#allocation0] sm:$0x1] %vm51_vm8, %v50_v21  }
  0x84   :  { %v56_v22 = vpop.permute.xlu0 %55   ;;  %v62_v23 = vpop.permute.xlu1 %61  }
  0x85   :  { %58 = vst.msk [vmem:[#allocation0] sm:$0x1] %vm57_vm9, %v56_v22  }
  0x86   :  { %64 = vst.msk [vmem:[#allocation0] sm:$0x1] %vm63_vm10, %v62_v23  }
  0x88   :  { %v68_v24 = vpop.permute.xlu0 %67   ;;  %v74_v25 = vpop.permute.xlu1 %73  }
  0x89   :  { %70 = vst.msk [vmem:[#allocation0] sm:$0x1] %vm69_vm11, %v68_v24  }
  0x8a   :  { %76 = vst.msk [vmem:[#allocation0] sm:$0x1] %vm75_vm12, %v74_v25  }
  0x8c   :  { %v80_v26 = vpop.permute.xlu0 %79  }
  0x8d   :  { %82 = vst.msk [vmem:[#allocation0] sm:$0x1] %vm81_vm13, %v80_v26  }
  0x94   :  { %v87_v27 = vld [vmem:[#allocation0] sm:$0x1] }
  0x95   :  { %90 = vst [vmem:[%s186_s1] sm:$0x1] %v87_v27 }

// kernel: cbam_forward.1
= control target key start
LH: loop header
LB: loop body
LE: loop exit
PB: predicated region body
PF: predicated region fallthrough
CT: control target
= control target key end

     0   :  { %10 = vsyncpa [#allocation3], 0  ;;  %s3137_s18 = smov 0   ;;  %s5054_s0 = inlined_call_operand.vmem [shape: f32[2,32,256], index: 0, kind: input, shape index: {}]   ;;  %s5055_s1 = inlined_call_operand.vmem [shape: f32[2,32], index: 1, kind: input, shape index: {}]   ;;  %s5056_s2 = inlined_call_operand.vmem [shape: f32[32,2], index: 2, kind: input, shape index: {}]   ;;  %s5057_s3 = inlined_call_operand.vmem [shape: f32[7,256], index: 3, kind: input, shape index: {}]   ;;  %s5058_s4 = inlined_call_operand.vmem [shape: f32[98], index: 4, kind: input, shape index: {}]   ;;  %s5059_s5 = inlined_call_operand.vmem [shape: f32[2,32,256], index: 5, kind: output, shape index: {}]  }
   0x1 LB: > { %s2841_s19 = sadd.s32 4294967295, %s3082_s18   ;;  %p2843_p0 = scmp.ge.s32.totalorder %s3082_s18, 1  ;;  %s3082_s18 = sphi %s3137_s18, %s16_s18  }
   0x2   : > { %p157_p1 = scmp.lt.s32.totalorder %s3082_s18, 3  ;;  %s179_s22 = sshll.u32 %s5058_s4, 4  ;;  %s180_s22 = int_to_ptr.vmem [resolvable:$true] %s179_s22 }
   0x3   : > { %p2996_p3 = scmp.eq.s32.totalorder %s2841_s19, 0  ;;  %s3057_s24 = scalar_lea.vmem %s180_s22, 16 }
   0x4   : > { %p3148_p2 = pnand %p2843_p0, %p157_p1  ;;  %p3058_p6 = scmp.ne.s32.totalorder %s180_s22, %s3057_s24 }
   0x5   : > { %p3065_p10 = scmp.lt.s32.totalorder %s180_s22, %s180_s22  ;;  %p3066_p11 = scmp.lt.s32.totalorder %s3057_s24, %s3057_s24 }
   0x6   : > { %p2992_p4 = pneg %p3148_p2 }
   0x7   : > { %p3067_p12 = por %p3066_p11, %p3065_p10 }
   0x8   : > { %p2993_p5 = pnand %p2996_p3, %p2992_p4 }
   0xa   : > { %p3059_p7 = pneg %p2993_p5 }
   0xc   : > { %p3060_p8 = pnand %p3059_p7, %p3058_p6 }
   0xe   : > { %p3061_p9 = pneg %p3060_p8 }
  0x10   : > { %p3068_p13 = pnand %p3067_p12, %p3061_p9 }
  0x12   : > { %3071 = shalt.err (!%p3068_p13)
}
  0x13   : > { %s3084_s25 = smov [#allocation2]   ;;  %200 = sbr.rel (%p3148_p2) target bundleno = 1800 (0x708), region = 40 }
  0x14   : > { %2995 = dma.vmem_to_smem (!%p2993_p5), %s180_s22, 16, %s3084_s25, [#allocation3]  }
  0x18   : > { %3077 = dma.done.wait (%p2996_p3), [#allocation3], 16  }
  0x19   : > { %3079 = vsyncadd (%p2996_p3), [#allocation3], 4294967280 }
  0x1a   : > { %206 = sfence }
  0x1b   : > { %p229_p0 = scmp.lt.s32.totalorder %s2841_s19, 1  ;;  %v3085_v16 = vmov 0.0   ;;  %vm3086_vm0 = vmmov 0   ;;  %vm276_vm1 = vcmask 7168   ;;  %v281_v32 = vld [vmem:[%s5055_s1] sm:$0x3] }
  0x1c   : > { %2969 = vmatprep.subr.mxu0 %v3085_v16  ;;  %2977 = vmatprep.mubr.msk.f32.mxu0 %vm3086_vm0, %v3085_v16  ;;  %vm282_vm2 = vcmask 261120   ;;  %v357_v34 = vld [vmem:[%s5056_s2] sm:$0xff]  ;;  %vm361_vm3 = vcmask 15360   ;;  %v608_v35 = vld [vmem:[%s5057_s3 + $0x8] sm:$0x7f]  ;;  %s3087_s13 = smov 1  }
  0x1d   : > { %s5478_s19 = smov (!%p229_p0, %s2841_s19), 1  ;;  %2982 = vmatprep.mubr.msk.f32.mxu1 %vm361_vm3, %v357_v34  ;;  %v607_v36 = vld [vmem:[%s5057_s3] sm:$0x7f]  ;;  %v1153_v37 = vrot.slane %v608_v35, 1  ;;  %v1462_v40 = vrot.slane %v608_v35, 2  ;;  %s3088_s14 = smov 2  }
  0x1e   : > { %s2957_s26 = sshll.u32 %s5478_s19, 6  ;;  %v1152_v38 = vrot.slane %v607_v36, 1  ;;  %v1461_v39 = vrot.slane %v607_v36, 2  ;;  %v1771_v41 = vrot.slane %v608_v35, 3  ;;  %v1770_v42 = vrot.slane %v607_v36, 3  ;;  %s3089_s15 = smov 3  }
  0x1f   : > { %s233_s29 = scalar_lea.vmem %s5054_s0, %s2957_s26  ;;  %v2081_v43 = vrot.slane %v608_v35, 4  ;;  %v2080_v44 = vrot.slane %v607_v36, 4  ;;  %s3090_s16 = smov 4   ;;  %v2391_v45 = vrot.slane %v608_v35, 5  ;;  %v2390_v46 = vrot.slane %v607_v36, 5  ;;  %v358_v50 = vld [vmem:[%s5056_s2 + $0x8] sm:$0xff] }
  0x20   : > { %v3167_v0 = vld [vmem:[%s233_s29 + $0x30] sm:$0xff]  ;;  %v3169_v1 = vld [vmem:[%s233_s29 + $0x38] sm:$0xff]  ;;  %v3171_v2 = vld [vmem:[%s233_s29 + $0x20] sm:$0xff]  ;;  %s3091_s17 = smov 5   ;;  %vm374_vm4 = vcmask 1041408   ;;  %s3092_s27 = smov 127  }
  0x21   : > { %v273_v3 = vmax.f32 %v3167_v0, %v3169_v1  ;;  %v256_v4 = vadd.f32 %v3169_v1, %v3167_v0  ;;  %v3177_v5 = vld [vmem:[%s233_s29 + $0x28] sm:$0xff]  ;;  %v3179_v6 = vld [vmem:[%s233_s29 + $0x10] sm:$0xff]  ;;  %v3181_v7 = vld [vmem:[%s233_s29 + $0x18] sm:$0xff]  ;;  %v3093_v57 = vmov 0   ;;  %s3258_s30 = scalar_lea.vmem %s5059_s5, %s2957_s26  ;;  %s3094_s19 = smov 51   ;;  %vm588_vm5 = vcmask 416768  }
  0x22   : > { %v253_v8 = vadd.f32 %v3177_v5, %v3171_v2  ;;  %v250_v9 = vadd.f32 %v3181_v7, %v3179_v6  ;;  %v3187_v10 = vld [vmem:[%s233_s29] sm:$0xff]  ;;  %v3189_v11 = vld [vmem:[%s233_s29 + $0x8] sm:$0xff]  ;;  %v270_v12 = vmax.f32 %v3171_v2, %v3177_v5  ;;  %v267_v14 = vmax.f32 %v3179_v6, %v3181_v7  ;;  %v359_v51 = vld [vmem:[%s5056_s2 + $0x10] sm:$0xff]  ;;  %3029 = vset.pattern.permute.xlu1 %v3093_v57  ;;  %s2860_s26 = sld [smem:[#allocation2 + $0x38]]  ;;  %s3095_s9 = smov 112  }
  0x23   : > { %274 = vmax.xlane.f32.xlu1 %v273_v3  ;;  %257 = vadd.xlane.f32.xlu0 %v256_v4  ;;  %v247_v13 = vadd.f32 %v3189_v11, %v3187_v10  ;;  %v264_v15 = vmax.f32 %v3187_v10, %v3189_v11  ;;  %v360_v52 = vld [vmem:[%s5056_s2 + $0x18] sm:$0xff]  ;;  %s2862_s6 = sld [smem:[#allocation2 + $0x3f]]  ;;  %s3096_s11 = smov 96   ;;  %vm636_vm6 = vcmask 916480   ;;  %vm677_vm7 = vcmask 785408  }
  0x24   : > { %3030 = vset.pattern.permute.xlu0 %v3093_v57  ;;  %s2864_s7 = sld [smem:[#allocation2 + $0x46]]  ;;  %s3100_s21 = smov 32   ;;  %vm718_vm8 = vcmask 654336   ;;  %vm759_vm9 = vcmask 523264   ;;  %vm800_vm10 = vcmask 392192   ;;  %vm1776_vm11 = vcmask 23552  }
  0x25   : > { %s2866_s8 = sld [smem:[#allocation2 + $0x4d]]  ;;  %vm2396_vm12 = vcmask 39936   ;;  %vm2086_vm13 = vcmask 31744   ;;  %vm2706_vm14 = vcmask 48128   ;;  %vm1174_vm15 = vcmask 1039360  }
  0x26   : > { %s2868_s10 = sld [smem:[#allocation2 + $0x54]]  ;;  %vm1483_vm0 = vcmask 1031168  }
  0x27   : > { %254 = vadd.xlane.f32.xlu0 %v253_v8  ;;  %251 = vadd.xlane.f32.xlu1 %v250_v9  ;;  %s2870_s12 = sld [smem:[#allocation2 + $0x5b]] }
  0x28   : > { %s2878_s20 = sld [smem:[#allocation2 + $0x47]] }
  0x29   : > { %s2880_s22 = sld [smem:[#allocation2 + $0x4e]] }
  0x2a   : > { %s2882_s23 = sld [smem:[#allocation2 + $0x55]] }
  0x2b   : > { %271 = vmax.xlane.f32.xlu0 %v270_v12  ;;  %248 = vadd.xlane.f32.xlu1 %v247_v13  ;;  %s2884_s24 = sld [smem:[#allocation2 + $0x5c]] }
  0x2c   : > { %s2888_s25 = sld [smem:[#allocation2 + $0x3a]] }
  0x2d   : > { %s2890_s28 = sld [smem:[#allocation2 + $0x41]] }
  0x2e   : > { %s2871_s29 = sld [smem:[#allocation2 + $0x1]] }
  0x2f   : > { %268 = vmax.xlane.f32.xlu0 %v267_v14  ;;  %265 = vmax.xlane.f32.xlu1 %v264_v15 }
  0x40   : > { %1154 = vrot.lane.b32.xlu1 %v1152_v38, %s3087_s13 }
  0x44   : > { %1465 = vrot.lane.b32.xlu1 %v1462_v40, %s3088_s14 }
  0x45   : > { %1156 = vrot.lane.b32.xlu0 %v1153_v37, %s3087_s13  ;;  %s3097_s13 = smov 80  }
  0x48   : > { %1772 = vrot.lane.b32.xlu1 %v1770_v42, %s3089_s15 }
  0x49   : > { %1463 = vrot.lane.b32.xlu0 %v1461_v39, %s3088_s14  ;;  %s2874_s14 = sld [smem:[#allocation2 + $0x39]] }
  0x4c   : > { %2082 = vrot.lane.b32.xlu1 %v2080_v44, %s3090_s16 }
  0x4d   : > { %1774 = vrot.lane.b32.xlu0 %v1771_v41, %s3089_s15  ;;  %s3098_s15 = smov 64  }
  0x50   : > { %2392 = vrot.lane.b32.xlu1 %v2390_v46, %s3091_s17 }
  0x51   : > { %2084 = vrot.lane.b32.xlu0 %v2081_v43, %s3090_s16  ;;  %s2876_s16 = sld [smem:[#allocation2 + $0x40]] }
  0x55   : > { %2394 = vrot.lane.b32.xlu0 %v2391_v45, %s3091_s17  ;;  %s3099_s17 = smov 48  }
  0xac   : > { %v275_v17 = vpop.xlane.xlu1 %274  ;;  %v258_v18 = vpop.xlane.xlu0 %257 }
  0xad   : > { %v263_v19 = vmul.f32 0.00390625, %v258_v18 }
  0xaf   : > { %v280_v20 = vsel %vm276_vm1, %v263_v19, %v275_v17 }
  0xb0   : > { %2970 = vmatpush3.msra.mxu0 %v280_v20  ;;  %v255_v21 = vpop.xlane.xlu0 %254  ;;  %v252_v22 = vpop.xlane.xlu1 %251 }
  0xb1   : > { %2971 = vmatprep.subr.mxu0 %v3085_v16  ;;  %v262_v23 = vmul.f32 0.00390625, %v255_v21  ;;  %v261_v27 = vmul.f32 0.00390625, %v252_v22 }
  0xb4   : > { %v272_v24 = vpop.xlane.xlu0 %271  ;;  %v249_v25 = vpop.xlane.xlu1 %248 }
  0xb5   : > { %v279_v26 = vsel %vm276_vm1, %v262_v23, %v272_v24  ;;  %v260_v28 = vmul.f32 0.00390625, %v249_v25 }
  0xb6   : > { %2972 = vmatpush3.msra.mxu0 %v279_v26 }
  0xb7   : > { %2973 = vmatprep.subr.mxu0 %v3085_v16 }
  0xb8   : > { %v269_v29 = vpop.xlane.xlu0 %268  ;;  %v266_v30 = vpop.xlane.xlu1 %265 }
  0xb9   : > { %v278_v31 = vsel %vm276_vm1, %v261_v27, %v269_v29  ;;  %v277_v33 = vsel %vm276_vm1, %v260_v28, %v266_v30 }
  0xba   : > { %2974 = vmatpush3.msra.mxu0 %v278_v31 }
  0xbb   : > { %2975 = vmatprep.subr.mxu0 %v3085_v16 }
  0xbc   : > { %2976 = vmatpush3.msra.mxu0 %v277_v33  ;;  %v3233_v58 = vpop.permute.xlu1 %1154  ;;  %v3235_v59 = vpop.permute.xlu0 %1156 }
  0xbd   : > { %2978 = vmatmul.mubr.msk.f32.vlgmr.msra.gmra.mxu0 %vm282_vm2, %v281_v32  ;;  %5153 = vst [vmem:[#allocation5_spill] sm:$0xff] %v3233_v58  ;;  %5154 = vst [vmem:[#allocation6_spill] sm:$0xff] %v3235_v59 }
  0xc0   : > { %v3237_v60 = vpop.permute.xlu1 %1465  ;;  %v3239_v61 = vpop.permute.xlu0 %1463 }
  0xc1   : > { %5155 = vst [vmem:[#allocation7_spill] sm:$0xff] %v3237_v60  ;;  %5156 = vst [vmem:[#allocation8_spill] sm:$0xff] %v3239_v61 }
  0xc4   : > { %v3241_v62 = vpop.permute.xlu1 %1772  ;;  %v3243_v63 = vpop.permute.xlu0 %1774 }
  0xc5   : > { %5157 = vst [vmem:[#allocation9_spill] sm:$0xff] %v3241_v62  ;;  %5158 = vst [vmem:[#allocation10_spill] sm:$0xff] %v3243_v63 }
  0xc8   : > { %v3245_v3 = vpop.permute.xlu1 %2082  ;;  %v3247_v4 = vpop.permute.xlu0 %2084 }
  0xc9   : > { %5159 = vst [vmem:[#allocation11_spill] sm:$0xff] %v3245_v3  ;;  %5160 = vst [vmem:[#allocation12_spill] sm:$0xff] %v3247_v4 }
  0xcc   : > { %v3249_v8 = vpop.permute.xlu1 %2392  ;;  %v3251_v9 = vpop.permute.xlu0 %2394 }
  0xcd   : > { %5161 = vst [vmem:[#allocation13_spill] sm:$0xff] %v3249_v8  ;;  %5162 = vst [vmem:[#allocation14_spill] sm:$0xff] %v3251_v9 }
 0x17d   : > { %v352_v47 = vpop.f32.mrf.mxu0 }
 0x17e   : > { %v356_v48 = vmax.f32 %v352_v47, 0.0 }
 0x17f   : > { %v2979_v49 = vpop.f32.mrf.mxu0 }
 0x180   : > { %2980 = vmatprep.subr.msk.mxu1 %vm374_vm4, %v356_v48 }
 0x181   : > { %2981 = vmatpush3.msk.msra.mxu1 %vm374_vm4, %v356_v48  ;;  %vm2723_vm4 = vcmask 998400  }
 0x182   : > { %2983 = vmatmul.mubr.msk.f32.vlgmr.msra.gmra.mxu1 %vm361_vm3, %v358_v50 }
 0x183   : > { %2985 = vmatprep.mubr.msk.f32.mxu1 %vm361_vm3, %v359_v51 }
 0x186   : > { %2986 = vmatmul.mubr.msk.f32.gmra.mxu1 %vm361_vm3, %v360_v52 }
 0x242   : > { %v2984_v53 = vpop.f32.mrf.mxu1 }
 0x243   : > { %469 = vrot.lane.b32.xlu1 %v2984_v53, %s3092_s27 }
 0x244   : > { %v444_v54 = vpop.f32.mrf.mxu1 }
 0x245   : > { %467 = vrot.lane.b32.xlu0 %v444_v54, %s3092_s27 }
 0x246   : > { %v2987_v55 = vpop.f32.mrf.mxu1 }
 0x247   : > { %473 = vrot.lane.b32.xlu1 %v2987_v55, %s3092_s27 }
 0x248   : > { %v454_v56 = vpop.f32.mrf.mxu1 }
 0x24b   : > { %471 = vrot.lane.b32.xlu1 %v454_v56, %s3092_s27 }
 0x2b5   : > { %v470_v12 = vpop.permute.xlu1 %469 }
 0x2b6   : > { %v480_v13 = vadd.f32 %v2984_v53, %v470_v12 }
 0x2b7   : > { %v468_v14 = vpop.permute.xlu0 %467 }
 0x2b8   : > { %v484_v15 = vsub.f32 0.0, %v480_v13  ;;  %v479_v16 = vadd.f32 %v468_v14, %v444_v54 }
 0x2b9   : > { %v474_v17 = vpop.permute.xlu1 %473 }
 0x2ba   : > { %v489_v18 = vmul.f32 1.442695, %v484_v15  ;;  %v483_v19 = vsub.f32 0.0, %v479_v16  ;;  %v482_v20 = vadd.f32 %v2987_v55, %v474_v17 }
 0x2bc   : > { %3031 = vpow2.f32 %v489_v18  ;;  %v487_v21 = vmul.f32 1.442695, %v483_v19  ;;  %v486_v22 = vsub.f32 0.0, %v482_v20 }
 0x2bd   : > { %v472_v23 = vpop.permute.xlu1 %471 }
 0x2be   : > { %3033 = vpow2.f32 %v487_v21  ;;  %v493_v24 = vmul.f32 1.442695, %v486_v22  ;;  %v481_v25 = vadd.f32 %v472_v23, %v454_v56 }
 0x2c0   : > { %3035 = vpow2.f32 %v493_v24  ;;  %v485_v26 = vsub.f32 0.0, %v481_v25 }
 0x2c2   : > { %v491_v27 = vmul.f32 1.442695, %v485_v26 }
 0x2c4   : > { %3037 = vpow2.f32 %v491_v27 }
 0x2c9   : > { %v3032_v28 = vpop.eup %3031 }
 0x2ca   : > { %v496_v29 = vadd.f32 1.0, %v3032_v28 }
 0x2cb   : > { %v3034_v30 = vpop.eup %3033 }
 0x2cc   : > { %3039 = vrcp.f32 %v496_v29  ;;  %v495_v31 = vadd.f32 1.0, %v3034_v30 }
 0x2cd   : > { %v3036_v32 = vpop.eup %3035 }
 0x2ce   : > { %3041 = vrcp.f32 %v495_v31  ;;  %v498_v33 = vadd.f32 1.0, %v3036_v32 }
 0x2d0   : > { %3043 = vrcp.f32 %v498_v33 }
 0x2d1   : > { %v3038_v34 = vpop.eup %3037 }
 0x2d2   : > { %v497_v35 = vadd.f32 1.0, %v3038_v34 }
 0x2d4   : > { %3045 = vrcp.f32 %v497_v35 }
 0x2d9   : > { %v3040_v36 = vpop.eup %3039 }
 0x2da   : > { %514 = vperm.xlu1 %3029, %v3040_v36   ;;  %v643_v36 = vstv %s2860_s26  ;;  %s2892_s26 = sld [smem:[#allocation2 + $0x48]] }
 0x2db   : > { %v3042_v37 = vpop.eup %3041 }
 0x2dc   : > { %509 = vperm.xlu0 %3030, %v3042_v37  }
 0x2dd   : > { %v3044_v38 = vpop.eup %3043 }
 0x2e0   : > { %524 = vperm.xlu0 %3030, %v3044_v38  }
 0x2e1   : > { %v3046_v39 = vpop.eup %3045 }
 0x2e2   : > { %519 = vperm.xlu1 %3029, %v3046_v39  }
 0x355   : > { %v515_v40 = vpop.permute.xlu1 %514 }
 0x356   : > { %v529_v41 = vmul.f32 %v515_v40, %v3179_v6  ;;  %v530_v42 = vmul.f32 %v515_v40, %v3181_v7 }
 0x357   : > { %v510_v43 = vpop.permute.xlu0 %509 }
 0x358   : > { %537 = vst [vmem:[%s3258_s30 + $0x10] sm:$0xff] %v529_v41  ;;  %538 = vst [vmem:[%s3258_s30 + $0x18] sm:$0xff] %v530_v42  ;;  %v527_v44 = vmul.f32 %v510_v43, %v3187_v10  ;;  %v528_v45 = vmul.f32 %v510_v43, %v3189_v11 }
 0x35a   : > { %535 = vst [vmem:[%s3258_s30] sm:$0xff] %v527_v44  ;;  %536 = vst [vmem:[%s3258_s30 + $0x8] sm:$0xff] %v528_v45  ;;  %v543_v49 = vadd.f32 %v529_v41, %v527_v44  ;;  %v552_v50 = vadd.f32 %v530_v42, %v528_v45 }
 0x35b   : > { %v525_v46 = vpop.permute.xlu0 %524 }
 0x35c   : > { %v533_v47 = vmul.f32 %v525_v46, %v3167_v0  ;;  %v534_v48 = vmul.f32 %v525_v46, %v3169_v1 }
 0x35d   : > { %v520_v6 = vpop.permute.xlu1 %519 }
 0x35e   : > { %541 = vst [vmem:[%s3258_s30 + $0x30] sm:$0xff] %v533_v47  ;;  %542 = vst [vmem:[%s3258_s30 + $0x38] sm:$0xff] %v534_v48  ;;  %v531_v7 = vmul.f32 %v520_v6, %v3171_v2  ;;  %v532_v10 = vmul.f32 %v520_v6, %v3177_v5  ;;  %v565_v51 = vmax.f32 %v529_v41, %v533_v47 }
 0x35f   : > { %v574_v52 = vmax.f32 %v530_v42, %v534_v48 }
 0x360   : > { %539 = vst [vmem:[%s3258_s30 + $0x20] sm:$0xff] %v531_v7  ;;  %540 = vst [vmem:[%s3258_s30 + $0x28] sm:$0xff] %v532_v10  ;;  %v544_v11 = vadd.f32 %v543_v49, %v531_v7  ;;  %v553_v53 = vadd.f32 %v552_v50, %v532_v10  ;;  %v564_v54 = vmax.f32 %v527_v44, %v531_v7  ;;  %v684_v44 = vstv %s2862_s6  ;;  %s2885_s6 = sld [smem:[#allocation2 + $0x2]] }
 0x361   : > { %v573_v55 = vmax.f32 %v528_v45, %v532_v10  ;;  %v766_v49 = vstv %s2866_s8  ;;  %v807_v10 = vstv %s2868_s10  ;;  %s2894_s8 = sld [smem:[#allocation2 + $0x4f]] }
 0x362   : > { %v545_v0 = vadd.f32 %v544_v11, %v533_v47  ;;  %v554_v56 = vadd.f32 %v553_v53, %v534_v48  ;;  %v566_v57 = vmax.f32 %v564_v54, %v565_v51  ;;  %v725_v47 = vstv %s2864_s7  ;;  %s2886_s7 = sld [smem:[#allocation2 + $0x33]] }
 0x363   : > { %v575_v1 = vmax.f32 %v573_v55, %v574_v52  ;;  %v847_v11 = vstv %s2870_s12  ;;  %v909_v55 = vstv %s2874_s14  ;;  %s2899_s10 = sld [smem:[#allocation2 + $0x3]] }
 0x364   : > { %v567_v13 = vrot.slane %v566_v57, 4  ;;  %v555_v14 = vrot.slane %v554_v56, 4  ;;  %v546_v15 = vrot.slane %v545_v0, 4  ;;  %s2900_s12 = sld [smem:[#allocation2 + $0x34]] }
 0x365   : > { %v576_v12 = vrot.slane %v575_v1, 4  ;;  %s2896_s14 = sld [smem:[#allocation2 + $0x56]] }
 0x366   : > { %v568_v2 = vmax.f32 %v566_v57, %v567_v13  ;;  %v556_v17 = vadd.f32 %v555_v14, %v554_v56  ;;  %v547_v5 = vadd.f32 %v546_v15, %v545_v0  ;;  %v3318_v13 = vstv %s2878_s20  ;;  %s2902_s20 = sld [smem:[#allocation2 + $0x3b]] }
 0x367   : > { %v577_v16 = vmax.f32 %v575_v1, %v576_v12  ;;  %v3311_v1 = vstv %s2876_s16  ;;  %s2898_s16 = sld [smem:[#allocation2 + $0x5d]] }
 0x368   : > { %v569_v19 = vrot.slane %v568_v2, 2  ;;  %v557_v20 = vrot.slane %v556_v17, 2  ;;  %v548_v21 = vrot.slane %v547_v5, 2 }
 0x369   : > { %v578_v18 = vrot.slane %v577_v16, 2 }
 0x36a   : > { %v570_v23 = vmax.f32 %v568_v2, %v569_v19  ;;  %v558_v24 = vadd.f32 %v557_v20, %v556_v17  ;;  %v549_v25 = vadd.f32 %v548_v21, %v547_v5  ;;  %v3332_v5 = vstv %s2882_s23  ;;  %s2906_s23 = sld [smem:[#allocation2 + $0x49]] }
 0x36b   : > { %v579_v22 = vmax.f32 %v577_v16, %v578_v18  ;;  %v3325_v16 = vstv %s2880_s22  ;;  %v3339_v20 = vstv %s2884_s24  ;;  %s2904_s22 = sld [smem:[#allocation2 + $0x42]] }
 0x36c   : > { %v571_v27 = vrot.slane %v570_v23, 1  ;;  %v559_v28 = vrot.slane %v558_v24, 1  ;;  %v550_v29 = vrot.slane %v549_v25, 1  ;;  %s2908_s24 = sld [smem:[#allocation2 + $0x50]] }
 0x36d   : > { %v580_v26 = vrot.slane %v579_v22, 1 }
 0x36e   : > { %v572_v31 = vmax.f32 %v570_v23, %v571_v27  ;;  %v560_v32 = vadd.f32 %v559_v28, %v558_v24  ;;  %v551_v33 = vadd.f32 %v550_v29, %v549_v25  ;;  %v3346_v23 = vstv %s2888_s25  ;;  %s2910_s25 = sld [smem:[#allocation2 + $0x57]] }
 0x36f   : > { %v581_v30 = vmax.f32 %v579_v22, %v580_v26 }
 0x370   : > { %597 = vrot.lane.b32.xlu1 %v572_v31, %s3094_s19  ;;  %v563_v34 = vmul.f32 0.03125, %v560_v32  ;;  %v562_v35 = vmul.f32 0.03125, %v551_v33  ;;  %v3371_v33 = vstv %s2871_s29  ;;  %s2916_s29 = sld [smem:[#allocation2 + $0x3c]] }
 0x371   : > { %599 = vrot.lane.b32.xlu0 %v581_v30, %s3094_s19  ;;  %v3360_v30 = vstv %s2890_s28  ;;  %s2912_s28 = sld [smem:[#allocation2 + $0x5e]] }
 0x374   : > { %584 = vrot.lane.b32.xlu1 %v562_v35, %s3094_s19 }
 0x375   : > { %586 = vrot.lane.b32.xlu0 %v563_v34, %s3094_s19  ;;  %s2872_s19 = sld [smem:[#allocation2 + $0x32]] }
 0x37b   : > { %v3373_v34 = vstv %s2872_s19  ;;  %s2918_s19 = sld [smem:[#allocation2 + $0x43]] }
 0x3e2   : > { %v598_v38 = vpop.permute.xlu1 %597 }
 0x3e3   : > { %v600_v37 = vpop.permute.xlu0 %599  ;;  %v3280_v40 = vsel %vm588_vm5, 0.0, %v598_v38 }
 0x3e4   : > { %v3277_v39 = vsel %vm588_vm5, %v598_v38, %v600_v37  ;;  %5164 = vst [vmem:[#allocation16_spill] sm:$0xff] %v3280_v40  ;;  %v644_v41 = vmul.f32 %v643_v36, %v3280_v40  ;;  %v3285_v43 = vsel %vm588_vm5, %v600_v37, 0.0  ;;  %v685_v48 = vmul.f32 %v684_v44, %v3280_v40 }
 0x3e5   : > { %5163 = vst [vmem:[#allocation15_spill] sm:$0xff] %v3277_v39  ;;  %v645_v42 = vmul.f32 %v643_v36, %v3277_v39  ;;  %v646_v45 = vmul.f32 %v643_v36, %v3285_v43  ;;  %v686_v46 = vmul.f32 %v684_v44, %v3277_v39  ;;  %v727_v6 = vmul.f32 %v725_v47, %v3277_v39 }
 0x3e6   : > { %650 = vrot.lane.b32.xlu0 %v644_v41, %s3095_s9  ;;  %v687_v50 = vmul.f32 %v684_v44, %v3285_v43  ;;  %v768_v7 = vmul.f32 %v766_v49, %v3277_v39  ;;  %v726_v51 = vmul.f32 %v725_v47, %v3280_v40  ;;  %v809_v52 = vmul.f32 %v807_v10, %v3277_v39  ;;  %v585_v27 = vpop.permute.xlu1 %584 }
 0x3e7   : > { %652 = vrot.lane.b32.xlu1 %v645_v42, %s3095_s9  ;;  %v728_v53 = vmul.f32 %v725_v47, %v3285_v43  ;;  %v849_v54 = vmul.f32 %v847_v11, %v3277_v39  ;;  %v767_v0 = vmul.f32 %v766_v49, %v3280_v40  ;;  %v911_v56 = vmul.f32 %v909_v55, %v3277_v39  ;;  %v3355_v26 = vpop.permute.xlu0 %586 }
 0x3e8   : > { %v769_v57 = vmul.f32 %v766_v49, %v3285_v43  ;;  %v955_v12 = vmul.f32 %v3311_v1, %v3277_v39  ;;  %v808_v14 = vmul.f32 %v807_v10, %v3280_v40  ;;  %v999_v15 = vmul.f32 %v3318_v13, %v3277_v39 }
 0x3e9   : > { %v810_v2 = vmul.f32 %v807_v10, %v3285_v43  ;;  %v1043_v17 = vmul.f32 %v3325_v16, %v3277_v39  ;;  %v848_v18 = vmul.f32 %v847_v11, %v3280_v40  ;;  %v1087_v19 = vmul.f32 %v3332_v5, %v3277_v39 }
 0x3ea   : > { %654 = vrot.lane.b32.xlu0 %v646_v45, %s3095_s9  ;;  %v850_v21 = vmul.f32 %v847_v11, %v3285_v43  ;;  %v1131_v22 = vmul.f32 %v3339_v20, %v3277_v39  ;;  %v910_v24 = vmul.f32 %v909_v55, %v3280_v40  ;;  %v1221_v25 = vmul.f32 %v3346_v23, %v3280_v40 }
 0x3eb   : > { %693 = vrot.lane.b32.xlu1 %v686_v46, %s3096_s11  ;;  %v912_v28 = vmul.f32 %v909_v55, %v3285_v43  ;;  %v1223_v29 = vmul.f32 %v3346_v23, %v3285_v43  ;;  %v3364_v31 = vsel %vm588_vm5, %v585_v27, %v3355_v26  ;;  %v3367_v32 = vsel %vm588_vm5, 0.0, %v585_v27 }
 0x3ec   : > { %5165 = vst [vmem:[#allocation17_spill] sm:$0xff] %v3364_v31  ;;  %5166 = vst [vmem:[#allocation18_spill] sm:$0xff] %v3367_v32  ;;  %v954_v35 = vmul.f32 %v3311_v1, %v3280_v40  ;;  %v1265_v36 = vmul.f32 %v3360_v30, %v3280_v40  ;;  %v873_v37 = vmul.f32 %v3371_v33, %v3367_v32  ;;  %v3403_v49 = vstv %s2886_s7  ;;  %s2924_s7 = sld [smem:[#allocation2 + $0x58]] }
 0x3ed   : > { %v874_v38 = vmul.f32 %v3371_v33, %v3364_v31  ;;  %v880_v41 = vmul.f32 %v3373_v34, %v3280_v40  ;;  %v881_v42 = vmul.f32 %v3373_v34, %v3277_v39  ;;  %v956_v45 = vmul.f32 %v3311_v1, %v3285_v43 }
 0x3ee   : > { %691 = vrot.lane.b32.xlu0 %v685_v48, %s3096_s11  ;;  %v1267_v46 = vmul.f32 %v3360_v30, %v3285_v43  ;;  %v3397_v48 = vstv %s2892_s26  ;;  %v1192_v11 = vmul.f32 %v3403_v49, %v3277_v39  ;;  %v1352_v1 = vstv %s2894_s8  ;;  %s2920_s26 = sld [smem:[#allocation2 + $0x4a]] }
 0x3ef   : > { %734 = vrot.lane.b32.xlu1 %v727_v6, %s3097_s13  ;;  %v3389_v44 = vadd.f32 %v880_v41, %v873_v37  ;;  %v3395_v47 = vadd.f32 %v881_v42, %v874_v38  ;;  %v3401_v6 = vstv %s2885_s6  ;;  %v1311_v55 = vmul.f32 %v3397_v48, %v3285_v43  ;;  %s2922_s6 = sld [smem:[#allocation2 + $0x51]] }
 0x3f0   : > { %v1184_v10 = vmul.f32 %v3401_v6, %v3367_v32  ;;  %v1529_v38 = vstv %s2902_s20  ;;  %v1222_v41 = vmul.f32 %v3346_v23, %v3277_v39  ;;  %v1310_v23 = vmul.f32 %v3397_v48, %v3277_v39  ;;  %s2930_s8 = sld [smem:[#allocation2 + $0x3d]] }
 0x3f1   : > { %5167 = vst [vmem:[#allocation19_spill] sm:$0xff] %v3389_v44  ;;  %5168 = vst [vmem:[#allocation20_spill] sm:$0xff] %v3395_v47  ;;  %v1531_v42 = vmul.f32 %v1529_v38, %v3277_v39  ;;  %s2948_s20 = sld [smem:[#allocation2 + $0x4c]] }
 0x3f2   : > { %695 = vrot.lane.b32.xlu0 %v687_v50, %s3096_s11  ;;  %v998_v50 = vmul.f32 %v3318_v13, %v3280_v40 }
 0x3f3   : > { %775 = vrot.lane.b32.xlu1 %v768_v7, %s3098_s15  ;;  %v1309_v7 = vmul.f32 %v3397_v48, %v3280_v40 }
 0x3f6   : > { %732 = vrot.lane.b32.xlu0 %v726_v51, %s3097_s13  ;;  %v1185_v51 = vmul.f32 %v3401_v6, %v3364_v31 }
 0x3f7   : > { %816 = vrot.lane.b32.xlu1 %v809_v52, %s3099_s17  ;;  %v1191_v52 = vmul.f32 %v3403_v49, %v3280_v40 }
 0x3fa   : > { %736 = vrot.lane.b32.xlu0 %v728_v53, %s3097_s13  ;;  %v3419_v53 = vadd.f32 %v1191_v52, %v1184_v10  ;;  %v3491_v10 = vstv %s2908_s24  ;;  %v3498_v52 = vstv %s2910_s25  ;;  %s2938_s24 = sld [smem:[#allocation2 + $0x59]] }
 0x3fb   : > { %856 = vrot.lane.b32.xlu1 %v849_v54, %s3100_s21  ;;  %v1000_v54 = vmul.f32 %v3318_v13, %v3285_v43  ;;  %s2926_s25 = sld [smem:[#allocation2 + $0x5f]] }
 0x3fe   : > { %773 = vrot.lane.b32.xlu0 %v767_v0, %s3098_s15  ;;  %v3425_v0 = vadd.f32 %v1192_v11, %v1185_v51  ;;  %v1663_v51 = vmul.f32 %v3491_v10, %v3277_v39  ;;  %v1707_v11 = vmul.f32 %v3498_v52, %v3277_v39 }
 0x3ff   : > { %918 = vrot.lane.b32.xlu1 %v911_v56, %s3095_s9  ;;  %v3427_v56 = vstv %s2899_s10  ;;  %s2944_s10 = sld [smem:[#allocation2 + $0x3e]] }
 0x400   : > { %v1493_v13 = vmul.f32 %v3427_v56, %v3367_v32  ;;  %v3725_v4 = vstv %s2938_s24  ;;  %s2883_s24 = sld [smem:[#allocation2 + $0x2b]] }
 0x402   : > { %777 = vrot.lane.b32.xlu0 %v769_v57, %s3098_s15  ;;  %v3429_v57 = vstv %s2900_s12  ;;  %s2932_s12 = sld [smem:[#allocation2 + $0x44]] }
 0x403   : > { %962 = vrot.lane.b32.xlu1 %v955_v12, %s3096_s11  ;;  %v1042_v12 = vmul.f32 %v3325_v16, %v3280_v40 }
 0x406   : > { %814 = vrot.lane.b32.xlu0 %v808_v14, %s3099_s17  ;;  %v1353_v14 = vmul.f32 %v1352_v1, %v3280_v40 }
 0x407   : > { %1006 = vrot.lane.b32.xlu1 %v999_v15, %s3097_s13  ;;  %v1494_v15 = vmul.f32 %v3427_v56, %v3364_v31 }
 0x40a   : > { %818 = vrot.lane.b32.xlu0 %v810_v2, %s3099_s17  ;;  %v1500_v2 = vmul.f32 %v3429_v57, %v3280_v40 }
 0x40b   : > { %1050 = vrot.lane.b32.xlu1 %v1043_v17, %s3098_s15  ;;  %v1501_v17 = vmul.f32 %v3429_v57, %v3277_v39 }
 0x40e   : > { %854 = vrot.lane.b32.xlu0 %v848_v18, %s3100_s21  ;;  %v3446_v18 = vadd.f32 %v1500_v2, %v1493_v13 }
 0x40f   : > { %1094 = vrot.lane.b32.xlu1 %v1087_v19, %s3099_s17  ;;  %v3448_v19 = vadd.f32 %v1501_v17, %v1494_v15  ;;  %v1530_v17 = vmul.f32 %v1529_v38, %v3280_v40 }
 0x412   : > { %858 = vrot.lane.b32.xlu0 %v850_v21, %s3100_s21  ;;  %v1044_v21 = vmul.f32 %v3325_v16, %v3285_v43  ;;  %v1088_v16 = vmul.f32 %v3332_v5, %v3285_v43 }
 0x413   : > { %1138 = vrot.lane.b32.xlu1 %v1131_v22, %s3100_s21  ;;  %v1355_v22 = vmul.f32 %v1352_v1, %v3285_v43 }
 0x416   : > { %916 = vrot.lane.b32.xlu0 %v910_v24, %s3095_s9  ;;  %v1396_v24 = vstv %s2896_s14  ;;  %s2946_s14 = sld [smem:[#allocation2 + $0x45]] }
 0x417   : > { %1227 = vrot.lane.b32.xlu1 %v1221_v25, %s3095_s9  ;;  %v1086_v25 = vmul.f32 %v3332_v5, %v3280_v40  ;;  %v1397_v27 = vmul.f32 %v1396_v24, %v3280_v40  ;;  %v1132_v5 = vmul.f32 %v3339_v20, %v3285_v43  ;;  %v1398_v48 = vmul.f32 %v1396_v24, %v3277_v39 }
 0x41a   : > { %920 = vrot.lane.b32.xlu0 %v912_v28, %s3095_s9  ;;  %v1399_v28 = vmul.f32 %v1396_v24, %v3285_v43 }
 0x41b   : > { %1231 = vrot.lane.b32.xlu1 %v1223_v29, %s3095_s9  ;;  %v1440_v29 = vstv %s2898_s16  ;;  %s2934_s16 = sld [smem:[#allocation2 + $0x4b]] }
 0x41c   : > { %v1443_v37 = vmul.f32 %v1440_v29, %v3285_v43 }
 0x41e   : > { %960 = vrot.lane.b32.xlu0 %v954_v35, %s3096_s11  ;;  %v1130_v35 = vmul.f32 %v3339_v20, %v3280_v40  ;;  %v1266_v20 = vmul.f32 %v3360_v30, %v3277_v39  ;;  %v1354_v30 = vmul.f32 %v1352_v1, %v3277_v39 }
 0x41f   : > { %1271 = vrot.lane.b32.xlu1 %v1265_v36, %s3096_s11  ;;  %v1441_v36 = vmul.f32 %v1440_v29, %v3280_v40 }
 0x422   : > { %964 = vrot.lane.b32.xlu0 %v956_v45, %s3096_s11  ;;  %v1573_v45 = vstv %s2904_s22  ;;  %s2936_s22 = sld [smem:[#allocation2 + $0x52]] }
 0x423   : > { %1275 = vrot.lane.b32.xlu1 %v1267_v46, %s3096_s11  ;;  %v1575_v46 = vmul.f32 %v1573_v45, %v3277_v39 }
 0x426   : > { %1004 = vrot.lane.b32.xlu0 %v998_v50, %s3097_s13  ;;  %v3483_v50 = vstv %s2906_s23  ;;  %s2950_s23 = sld [smem:[#allocation2 + $0x53]] }
 0x427   : > { %1315 = vrot.lane.b32.xlu1 %v1309_v7, %s3097_s13  ;;  %v1619_v7 = vmul.f32 %v3483_v50, %v3277_v39 }
 0x42a   : > { %1008 = vrot.lane.b32.xlu0 %v1000_v54, %s3097_s13  ;;  %v3505_v54 = vstv %s2912_s28  ;;  %s2952_s28 = sld [smem:[#allocation2 + $0x5a]] }
 0x42b   : > { %1319 = vrot.lane.b32.xlu1 %v1311_v55, %s3097_s13  ;;  %v1751_v13 = vmul.f32 %v3505_v54, %v3277_v39 }
 0x42c   : > { %v2591_v3 = vstv %s2950_s23  ;;  %s2881_s23 = sld [smem:[#allocation2 + $0x24]] }
 0x42e   : > { %1048 = vrot.lane.b32.xlu0 %v1042_v12, %s3098_s15  ;;  %v1442_v12 = vmul.f32 %v1440_v29, %v3277_v39 }
 0x42f   : > { %1359 = vrot.lane.b32.xlu1 %v1353_v14, %s3098_s15  ;;  %v3516_v14 = vstv %s2916_s29  ;;  %s2940_s29 = sld [smem:[#allocation2 + $0x60]] }
 0x432   : > { %1052 = vrot.lane.b32.xlu0 %v1044_v21, %s3098_s15  ;;  %v1840_v21 = vmul.f32 %v3516_v14, %v3280_v40 }
 0x433   : > { %1363 = vrot.lane.b32.xlu1 %v1355_v22, %s3098_s15 }
 0x436   : > { %1092 = vrot.lane.b32.xlu0 %v1086_v25, %s3099_s17  ;;  %v1532_v25 = vmul.f32 %v1529_v38, %v3285_v43  ;;  %v1576_v38 = vmul.f32 %v1573_v45, %v3285_v43 }
 0x437   : > { %1403 = vrot.lane.b32.xlu1 %v1397_v27, %s3099_s17  ;;  %v1842_v27 = vmul.f32 %v3516_v14, %v3285_v43 }
 0x43a   : > { %1096 = vrot.lane.b32.xlu0 %v1088_v16, %s3099_s17  ;;  %v3536_v16 = vstv %s2918_s19  ;;  %s2954_s19 = sld [smem:[#allocation2 + $0x61]] }
 0x43b   : > { %1407 = vrot.lane.b32.xlu1 %v1399_v28, %s3099_s17 }
 0x43e   : > { %1136 = vrot.lane.b32.xlu0 %v1130_v35, %s3100_s21  ;;  %v1574_v35 = vmul.f32 %v1573_v45, %v3280_v40 }
 0x43f   : > { %1447 = vrot.lane.b32.xlu1 %v1441_v36, %s3100_s21  ;;  %v1884_v36 = vmul.f32 %v3536_v16, %v3280_v40 }
 0x440   : > { %v3778_v9 = vstv %s2954_s19  ;;  %s2893_s19 = sld [smem:[#allocation2 + $0x1e]] }
 0x441   : > { %v2680_v62 = vmul.f32 %v3778_v9, %v3280_v40 }
 0x442   : > { %1140 = vrot.lane.b32.xlu0 %v1132_v5, %s3100_s21 }
 0x443   : > { %1451 = vrot.lane.b32.xlu1 %v1443_v37, %s3100_s21 }
 0x446   : > { %1229 = vrot.lane.b32.xlu0 %v1222_v41, %s3095_s9  ;;  %v1886_v41 = vmul.f32 %v3536_v16, %v3285_v43 }
 0x447   : > { %1538 = vrot.lane.b32.xlu1 %v1531_v42, %s3095_s9  ;;  %v3556_v42 = vstv %s2920_s26  ;;  %s2859_s26 = sld [smem:[#allocation2 + $0x7]] }
 0x448   : > { %v1928_v45 = vmul.f32 %v3556_v42, %v3280_v40 }
 0x44a   : > { %1273 = vrot.lane.b32.xlu0 %v1266_v20, %s3096_s11 }
 0x44b   : > { %1582 = vrot.lane.b32.xlu1 %v1575_v46, %s3096_s11 }
 0x44e   : > { %1317 = vrot.lane.b32.xlu0 %v1310_v23, %s3097_s13  ;;  %v1618_v23 = vmul.f32 %v3483_v50, %v3280_v40 }
 0x44f   : > { %1626 = vrot.lane.b32.xlu1 %v1619_v7, %s3097_s13 }
 0x452   : > { %1361 = vrot.lane.b32.xlu0 %v1354_v30, %s3098_s15 }
 0x453   : > { %1670 = vrot.lane.b32.xlu1 %v1663_v51, %s3098_s15  ;;  %v1620_v51 = vmul.f32 %v3483_v50, %v3285_v43 }
 0x456   : > { %1405 = vrot.lane.b32.xlu0 %v1398_v48, %s3099_s17  ;;  %v1930_v48 = vmul.f32 %v3556_v42, %v3285_v43 }
 0x457   : > { %1714 = vrot.lane.b32.xlu1 %v1707_v11, %s3099_s17  ;;  %v3578_v11 = vstv %s2922_s6  ;;  %s2861_s6 = sld [smem:[#allocation2 + $0xe]] }
 0x458   : > { %v3509_v55 = vpop.permute.xlu0 %650  ;;  %v1972_v50 = vmul.f32 %v3578_v11, %v3280_v40 }
 0x459   : > { %5169 = vst [vmem:[#allocation21_spill] sm:$0xff] %v3509_v55  ;;  %v3511_v1 = vpop.permute.xlu1 %652 }
 0x45a   : > { %5170 = vst [vmem:[#allocation22_spill] sm:$0xff] %v3511_v1  ;;  %1449 = vrot.lane.b32.xlu0 %v1442_v12, %s3100_s21 }
 0x45b   : > { %1758 = vrot.lane.b32.xlu1 %v1751_v13, %s3100_s21 }
 0x45c   : > { %v3520_v15 = vpop.permute.xlu0 %654 }
 0x45d   : > { %5171 = vst [vmem:[#allocation23_spill] sm:$0xff] %v3520_v15  ;;  %v3522_v2 = vpop.permute.xlu1 %693 }
 0x45e   : > { %5172 = vst [vmem:[#allocation24_spill] sm:$0xff] %v3522_v2  ;;  %1536 = vrot.lane.b32.xlu0 %v1530_v17, %s3095_s9  ;;  %v1662_v17 = vmul.f32 %v3491_v10, %v3280_v40 }
 0x45f   : > { %1846 = vrot.lane.b32.xlu1 %v1840_v21, %s3095_s9 }
 0x460   : > { %v3529_v22 = vpop.permute.xlu0 %691 }
 0x461   : > { %5173 = vst [vmem:[#allocation25_spill] sm:$0xff] %v3529_v22  ;;  %v3531_v24 = vpop.permute.xlu1 %734  ;;  %v2547_v22 = vstv %s2948_s20  ;;  %s2877_s20 = sld [smem:[#allocation2 + $0x16]] }
 0x462   : > { %5174 = vst [vmem:[#allocation26_spill] sm:$0xff] %v3531_v24  ;;  %1540 = vrot.lane.b32.xlu0 %v1532_v25, %s3095_s9 }
 0x463   : > { %1850 = vrot.lane.b32.xlu1 %v1842_v27, %s3095_s9  ;;  %v1664_v27 = vmul.f32 %v3491_v10, %v3285_v43 }
 0x464   : > { %v3540_v28 = vpop.permute.xlu0 %695 }
 0x465   : > { %5175 = vst [vmem:[#allocation27_spill] sm:$0xff] %v3540_v28  ;;  %v3542_v29 = vpop.permute.xlu1 %775  ;;  %v2281_v28 = vstv %s2936_s22  ;;  %s2879_s22 = sld [smem:[#allocation2 + $0x1d]] }
 0x466   : > { %5176 = vst [vmem:[#allocation28_spill] sm:$0xff] %v3542_v29  ;;  %1580 = vrot.lane.b32.xlu0 %v1574_v35, %s3096_s11  ;;  %v1974_v35 = vmul.f32 %v3578_v11, %v3285_v43  ;;  %v2503_v29 = vstv %s2946_s14  ;;  %s2873_s14 = sld [smem:[#allocation2 + $0x8]] }
 0x467   : > { %1890 = vrot.lane.b32.xlu1 %v1884_v36, %s3096_s11  ;;  %v3600_v36 = vstv %s2924_s7  ;;  %s2863_s7 = sld [smem:[#allocation2 + $0x15]] }
 0x468   : > { %v3549_v5 = vpop.permute.xlu0 %732  ;;  %v2016_v10 = vmul.f32 %v3600_v36, %v3280_v40 }
 0x469   : > { %5177 = vst [vmem:[#allocation29_spill] sm:$0xff] %v3549_v5  ;;  %v3551_v37 = vpop.permute.xlu1 %816  ;;  %v2237_v5 = vstv %s2934_s16  ;;  %s2875_s16 = sld [smem:[#allocation2 + $0xf]] }
 0x46a   : > { %5178 = vst [vmem:[#allocation30_spill] sm:$0xff] %v3551_v37  ;;  %1584 = vrot.lane.b32.xlu0 %v1576_v38, %s3096_s11  ;;  %v2193_v37 = vstv %s2932_s12  ;;  %v2238_v24 = vmul.f32 %v2237_v5, %v3280_v40  ;;  %s2869_s12 = sld [smem:[#allocation2 + $0x2a]] }
 0x46b   : > { %1894 = vrot.lane.b32.xlu1 %v1886_v41, %s3096_s11 }
 0x46c   : > { %v3560_v20 = vpop.permute.xlu0 %736 }
 0x46d   : > { %5179 = vst [vmem:[#allocation31_spill] sm:$0xff] %v3560_v20  ;;  %v3562_v46 = vpop.permute.xlu1 %856 }
 0x46e   : > { %5180 = vst [vmem:[#allocation32_spill] sm:$0xff] %v3562_v46  ;;  %1624 = vrot.lane.b32.xlu0 %v1618_v23, %s3097_s13  ;;  %v1706_v23 = vmul.f32 %v3498_v52, %v3280_v40  ;;  %v2459_v46 = vstv %s2944_s10  ;;  %s2867_s10 = sld [smem:[#allocation2 + $0x23]] }
 0x46f   : > { %1934 = vrot.lane.b32.xlu1 %v1928_v45, %s3097_s13 }
 0x470   : > { %v3570_v7 = vpop.permute.xlu0 %773 }
 0x471   : > { %5181 = vst [vmem:[#allocation33_spill] sm:$0xff] %v3570_v7  ;;  %v3572_v30 = vpop.permute.xlu1 %918 }
 0x472   : > { %5182 = vst [vmem:[#allocation34_spill] sm:$0xff] %v3572_v30  ;;  %1628 = vrot.lane.b32.xlu0 %v1620_v51, %s3097_s13 }
 0x473   : > { %1938 = vrot.lane.b32.xlu1 %v1930_v48, %s3097_s13  ;;  %v1708_v48 = vmul.f32 %v3498_v52, %v3285_v43 }
 0x474   : > { %v3582_v12 = vpop.permute.xlu0 %777 }
 0x475   : > { %5183 = vst [vmem:[#allocation35_spill] sm:$0xff] %v3582_v12  ;;  %v3584_v13 = vpop.permute.xlu1 %962 }
 0x476   : > { %5184 = vst [vmem:[#allocation36_spill] sm:$0xff] %v3584_v13  ;;  %1668 = vrot.lane.b32.xlu0 %v1662_v17, %s3098_s15  ;;  %v2018_v17 = vmul.f32 %v3600_v36, %v3285_v43  ;;  %v664_v13 = vstv %s2861_s6  ;;  %s2897_s6 = sld [smem:[#allocation2 + $0x2c]] }
 0x477   : > { %1978 = vrot.lane.b32.xlu1 %v1972_v50, %s3098_s15  ;;  %v2149_v50 = vstv %s2930_s8  ;;  %v665_v30 = vmul.f32 %v664_v13, %v3367_v32  ;;  %s2865_s8 = sld [smem:[#allocation2 + $0x1c]] }
 0x478   : > { %v3592_v21 = vpop.permute.xlu0 %814 }
 0x479   : > { %5185 = vst [vmem:[#allocation37_spill] sm:$0xff] %v3592_v21  ;;  %v3594_v25 = vpop.permute.xlu1 %1006 }
 0x47a   : > { %5186 = vst [vmem:[#allocation38_spill] sm:$0xff] %v3594_v25  ;;  %1672 = vrot.lane.b32.xlu0 %v1664_v27, %s3098_s15  ;;  %v3798_v25 = vstv %s2859_s26  ;;  %s2895_s26 = sld [smem:[#allocation2 + $0x25]] }
 0x47b   : > { %1982 = vrot.lane.b32.xlu1 %v1974_v35, %s3098_s15 }
 0x47c   : > { %v3604_v38 = vpop.permute.xlu0 %818 }
 0x47d   : > { %5187 = vst [vmem:[#allocation39_spill] sm:$0xff] %v3604_v38  ;;  %v3606_v41 = vpop.permute.xlu1 %1050  ;;  %v2194_v38 = vmul.f32 %v2193_v37, %v3280_v40  ;;  %v746_v63 = vstv %s2865_s8  ;;  %s2903_s8 = sld [smem:[#allocation2 + $0x11]] }
 0x47e   : > { %5188 = vst [vmem:[#allocation40_spill] sm:$0xff] %v3606_v41  ;;  %1712 = vrot.lane.b32.xlu0 %v1706_v23, %s3099_s17  ;;  %v1750_v23 = vmul.f32 %v3505_v54, %v3280_v40  ;;  %v3758_v41 = vstv %s2940_s29  ;;  %s2891_s29 = sld [smem:[#allocation2 + $0x17]] }
 0x47f   : > { %2022 = vrot.lane.b32.xlu1 %v2016_v10, %s3099_s17  ;;  %v2150_v10 = vmul.f32 %v2149_v50, %v3280_v40 }
 0x480   : > { %v3614_v45 = vpop.permute.xlu0 %854 }
 0x481   : > { %5189 = vst [vmem:[#allocation41_spill] sm:$0xff] %v3614_v45  ;;  %v3616_v51 = vpop.permute.xlu1 %1094 }
 0x482   : > { %5190 = vst [vmem:[#allocation42_spill] sm:$0xff] %v3616_v51  ;;  %1716 = vrot.lane.b32.xlu0 %v1708_v48, %s3099_s17  ;;  %v1752_v48 = vmul.f32 %v3505_v54, %v3285_v43 }
 0x483   : > { %2026 = vrot.lane.b32.xlu1 %v2018_v17, %s3099_s17  ;;  %v2152_v17 = vmul.f32 %v2149_v50, %v3285_v43 }
 0x484   : > { %v3624_v27 = vpop.permute.xlu0 %858 }
 0x485   : > { %5191 = vst [vmem:[#allocation43_spill] sm:$0xff] %v3624_v27  ;;  %v3626_v35 = vpop.permute.xlu1 %1138 }
 0x486   : > { %5192 = vst [vmem:[#allocation44_spill] sm:$0xff] %v3626_v35  ;;  %1756 = vrot.lane.b32.xlu0 %v1750_v23, %s3100_s21  ;;  %v1841_v23 = vmul.f32 %v3516_v14, %v3277_v39 }
 0x487   : > { %2156 = vrot.lane.b32.xlu1 %v2150_v10, %s3095_s9  ;;  %v2461_v10 = vmul.f32 %v2459_v46, %v3277_v39 }
 0x488   : > { %v3633_v52 = vpop.permute.xlu0 %916 }
 0x489   : > { %5193 = vst [vmem:[#allocation45_spill] sm:$0xff] %v3633_v52  ;;  %v3635_v45 = vpop.permute.xlu1 %1227 }
 0x48a   : > { %1760 = vrot.lane.b32.xlu0 %v1752_v48, %s3100_s21 }
 0x48b   : > { %2160 = vrot.lane.b32.xlu1 %v2152_v17, %s3095_s9  ;;  %v1885_v17 = vmul.f32 %v3536_v16, %v3277_v39 }
 0x48c   : > { %v3642_v27 = vpop.permute.xlu0 %920 }
 0x48d   : > { %v3644_v21 = vpop.permute.xlu1 %1231 }
 0x48e   : > { %1848 = vrot.lane.b32.xlu0 %v1841_v23, %s3095_s9  ;;  %v1929_v23 = vmul.f32 %v3556_v42, %v3277_v39 }
 0x48f   : > { %2468 = vrot.lane.b32.xlu1 %v2461_v10, %s3095_s9  ;;  %v2196_v10 = vmul.f32 %v2193_v37, %v3285_v43 }
 0x490   : > { %v3651_v54 = vpop.permute.xlu0 %960 }
 0x491   : > { %5194 = vst [vmem:[#allocation46_spill] sm:$0xff] %v3651_v54  ;;  %v3653_v48 = vpop.permute.xlu1 %1271 }
 0x492   : > { %1892 = vrot.lane.b32.xlu0 %v1885_v17, %s3096_s11  ;;  %v2505_v17 = vmul.f32 %v2503_v29, %v3277_v39 }
 0x493   : > { %2200 = vrot.lane.b32.xlu1 %v2194_v38, %s3096_s11  ;;  %v1973_v38 = vmul.f32 %v3578_v11, %v3277_v39 }
 0x494   : > { %v3660_v14 = vpop.permute.xlu0 %964 }
 0x495   : > { %v3662_v7 = vpop.permute.xlu1 %1275 }
 0x496   : > { %1936 = vrot.lane.b32.xlu0 %v1929_v23, %s3097_s13 }
 0x497   : > { %2204 = vrot.lane.b32.xlu1 %v2196_v10, %s3096_s11  ;;  %v2017_v10 = vmul.f32 %v3600_v36, %v3277_v39 }
 0x498   : > { %v3669_v16 = vpop.permute.xlu0 %1004 }
 0x499   : > { %5195 = vst [vmem:[#allocation47_spill] sm:$0xff] %v3669_v16  ;;  %v3671_v12 = vpop.permute.xlu1 %1315  ;;  %v2370_v16 = vmul.f32 %v3758_v41, %v3280_v40 }
 0x49a   : > { %1980 = vrot.lane.b32.xlu0 %v1973_v38, %s3098_s15  ;;  %v2151_v38 = vmul.f32 %v2149_v50, %v3277_v39 }
 0x49b   : > { %2512 = vrot.lane.b32.xlu1 %v2505_v17, %s3096_s11  ;;  %v2240_v17 = vmul.f32 %v2237_v5, %v3285_v43 }
 0x49c   : > { %v3678_v42 = vpop.permute.xlu0 %1008 }
 0x49d   : > { %v3680_v23 = vpop.permute.xlu1 %1319 }
 0x49e   : > { %2024 = vrot.lane.b32.xlu0 %v2017_v10, %s3099_s17  ;;  %v2460_v10 = vmul.f32 %v2459_v46, %v3280_v40 }
 0x49f   : > { %2244 = vrot.lane.b32.xlu1 %v2238_v24, %s3097_s13  ;;  %v2549_v24 = vmul.f32 %v2547_v22, %v3277_v39 }
 0x4a0   : > { %v3687_v11 = vpop.permute.xlu0 %1048 }
 0x4a1   : > { %5196 = vst [vmem:[#allocation48_spill] sm:$0xff] %v3687_v11  ;;  %v3689_v20 = vpop.permute.xlu1 %1359 }
 0x4a2   : > { %2158 = vrot.lane.b32.xlu0 %v2151_v38, %s3095_s9  ;;  %v2462_v38 = vmul.f32 %v2459_v46, %v3285_v43 }
 0x4a3   : > { %2248 = vrot.lane.b32.xlu1 %v2240_v17, %s3097_s13  ;;  %v2282_v17 = vmul.f32 %v2281_v28, %v3280_v40 }
 0x4a4   : > { %v3695_v36 = vpop.permute.xlu0 %1052 }
 0x4a5   : > { %v3697_v2 = vpop.permute.xlu1 %1363 }
 0x4a6   : > { %2466 = vrot.lane.b32.xlu0 %v2460_v10, %s3095_s9  ;;  %v2195_v10 = vmul.f32 %v2193_v37, %v3277_v39 }
 0x4a7   : > { %2556 = vrot.lane.b32.xlu1 %v2549_v24, %s3097_s13  ;;  %v2284_v24 = vmul.f32 %v2281_v28, %v3285_v43 }
 0x4a8   : > { %v3703_v50 = vpop.permute.xlu0 %1092 }
 0x4a9   : > { %5197 = vst [vmem:[#allocation49_spill] sm:$0xff] %v3703_v50  ;;  %v3705_v55 = vpop.permute.xlu1 %1403 }
 0x4aa   : > { %2470 = vrot.lane.b32.xlu0 %v2462_v38, %s3095_s9  ;;  %v2504_v38 = vmul.f32 %v2503_v29, %v3280_v40 }
 0x4ab   : > { %2288 = vrot.lane.b32.xlu1 %v2282_v17, %s3098_s15  ;;  %v2593_v17 = vmul.f32 %v2591_v3, %v3277_v39 }
 0x4ac   : > { %v3711_v1 = vpop.permute.xlu0 %1096 }
 0x4ad   : > { %5198 = vst [vmem:[#allocation50_spill] sm:$0xff] %v3711_v1  ;;  %v3713_v15 = vpop.permute.xlu1 %1407 }
 0x4ae   : > { %2202 = vrot.lane.b32.xlu0 %v2195_v10, %s3096_s11 }
 0x4af   : > { %2292 = vrot.lane.b32.xlu1 %v2284_v24, %s3098_s15  ;;  %v2506_v24 = vmul.f32 %v2503_v29, %v3285_v43  ;;  %v3747_v29 = vstv %s2952_s28  ;;  %s2889_s28 = sld [smem:[#allocation2 + $0x10]] }
 0x4b0   : > { %v3719_v46 = vpop.permute.xlu0 %1136  ;;  %v2637_v11 = vmul.f32 %v3747_v29, %v3277_v39 }
 0x4b1   : > { %5199 = vst [vmem:[#allocation51_spill] sm:$0xff] %v3719_v46  ;;  %v3721_v61 = vpop.permute.xlu1 %1447  ;;  %v2327_v46 = vmul.f32 %v3725_v4, %v3277_v39 }
 0x4b2   : > { %5200 = vst [vmem:[#allocation52_spill] sm:$0xff] %v3721_v61  ;;  %2510 = vrot.lane.b32.xlu0 %v2504_v38, %s3096_s11  ;;  %v3736_v61 = vstv %s2926_s25  ;;  %s2887_s25 = sld [smem:[#allocation2 + $0x9]] }
 0x4b3   : > { %2600 = vrot.lane.b32.xlu1 %v2593_v17, %s3098_s15  ;;  %v2239_v17 = vmul.f32 %v2237_v5, %v3277_v39  ;;  %v2061_v50 = vmul.f32 %v3736_v61, %v3277_v39 }
 0x4b4   : > { %v3729_v37 = vpop.permute.xlu0 %1140 }
 0x4b5   : > { %5201 = vst [vmem:[#allocation53_spill] sm:$0xff] %v3729_v37  ;;  %v3731_v10 = vpop.permute.xlu1 %1451 }
 0x4b6   : > { %5202 = vst [vmem:[#allocation54_spill] sm:$0xff] %v3731_v10  ;;  %2514 = vrot.lane.b32.xlu0 %v2506_v24, %s3096_s11 }
 0x4b7   : > { %2334 = vrot.lane.b32.xlu1 %v2327_v46, %s3099_s17  ;;  %v2548_v46 = vmul.f32 %v2547_v22, %v3280_v40 }
 0x4b8   : > { %v3740_v35 = vpop.permute.xlu0 %1229 }
 0x4b9   : > { %v3742_v38 = vpop.permute.xlu1 %1538 }
 0x4ba   : > { %2246 = vrot.lane.b32.xlu0 %v2239_v17, %s3097_s13 }
 0x4bb   : > { %2068 = vrot.lane.b32.xlu1 %v2061_v50, %s3100_s21  ;;  %v2550_v50 = vmul.f32 %v2547_v22, %v3285_v43 }
 0x4bc   : > { %v3751_v51 = vpop.permute.xlu0 %1273 }
 0x4bd   : > { %v3753_v24 = vpop.permute.xlu1 %1582 }
 0x4be   : > { %2554 = vrot.lane.b32.xlu0 %v2548_v46, %s3097_s13  ;;  %v2283_v46 = vmul.f32 %v2281_v28, %v3277_v39 }
 0x4bf   : > { %2644 = vrot.lane.b32.xlu1 %v2637_v11, %s3099_s17  ;;  %v2372_v11 = vmul.f32 %v3758_v41, %v3285_v43 }
 0x4c0   : > { %v3762_v5 = vpop.permute.xlu0 %1317 }
 0x4c1   : > { %v3764_v17 = vpop.permute.xlu1 %1626 }
 0x4c2   : > { %2558 = vrot.lane.b32.xlu0 %v2550_v50, %s3097_s13 }
 0x4c3   : > { %2376 = vrot.lane.b32.xlu1 %v2370_v16, %s3100_s21  ;;  %v2592_v16 = vmul.f32 %v2591_v3, %v3280_v40 }
 0x4c4   : > { %v3771_v54 = vpop.permute.xlu0 %1361 }
 0x4c5   : > { %v3773_v8 = vpop.permute.xlu1 %1670 }
 0x4c6   : > { %5203 = vst [vmem:[#allocation55_spill] sm:$0xff] %v3773_v8  ;;  %2290 = vrot.lane.b32.xlu0 %v2283_v46, %s3098_s15  ;;  %v2594_v46 = vmul.f32 %v2591_v3, %v3285_v43  ;;  %v624_v3 = vmul.f32 %v3798_v25, %v3367_v32 }
 0x4c7   : > { %2380 = vrot.lane.b32.xlu1 %v2372_v11, %s3100_s21  ;;  %v2682_v11 = vmul.f32 %v3778_v9, %v3285_v43 }
 0x4c8   : > { %v3782_v22 = vpop.permute.xlu0 %1405 }
 0x4c9   : > { %v3784_v50 = vpop.permute.xlu1 %1714 }
 0x4ca   : > { %5204 = vst [vmem:[#allocation56_spill] sm:$0xff] %v3784_v50  ;;  %2598 = vrot.lane.b32.xlu0 %v2592_v16, %s3098_s15  ;;  %v787_v50 = vstv %s2867_s10  ;;  %s2905_s10 = sld [smem:[#allocation2 + $0x18]] }
 0x4cb   : > { %2686 = vrot.lane.b32.xlu1 %v2680_v62, %s3100_s21  ;;  %v2326_v62 = vmul.f32 %v3725_v4, %v3280_v40 }
 0x4cc   : > { %v3791_v28 = vpop.permute.xlu0 %1449 }
 0x4cd   : > { %5205 = vst [vmem:[#allocation57_spill] sm:$0xff] %v3791_v28  ;;  %v3793_v58 = vpop.permute.xlu1 %1758  ;;  %v2328_v28 = vmul.f32 %v3725_v4, %v3285_v43 }
 0x4ce   : > { %5206 = vst [vmem:[#allocation58_spill] sm:$0xff] %v3793_v58  ;;  %2602 = vrot.lane.b32.xlu0 %v2594_v46, %s3098_s15  ;;  %v3812_v58 = vsel %vm588_vm5, %v3355_v26, 0.0 }
 0x4cf   : > { %2690 = vrot.lane.b32.xlu1 %v2682_v11, %s3100_s21  ;;  %v626_v44 = vmul.f32 %v3798_v25, %v3812_v58 }
 0x4d0   : > { %v3802_v52 = vpop.permute.xlu0 %1536 }
 0x4d1   : > { %v3804_v16 = vpop.permute.xlu1 %1846 }
 0x4d2   : > { %5207 = vst [vmem:[#allocation59_spill] sm:$0xff] %v3804_v16  ;;  %2332 = vrot.lane.b32.xlu0 %v2326_v62, %s3099_s17 }
 0x4d3   : > { %630 = vrot.lane.b32.xlu1 %v624_v3, %s3095_s9  ;;  %v2060_v3 = vmul.f32 %v3736_v61, %v3280_v40 }
 0x4d4   : > { %v3816_v46 = vpop.permute.xlu0 %1540 }
 0x4d5   : > { %v3818_v11 = vpop.permute.xlu1 %1850 }
 0x4d6   : > { %5208 = vst [vmem:[#allocation60_spill] sm:$0xff] %v3818_v11  ;;  %2336 = vrot.lane.b32.xlu0 %v2328_v28, %s3099_s17  ;;  %v667_v28 = vmul.f32 %v664_v13, %v3812_v58  ;;  %v705_v11 = vstv %s2863_s7  ;;  %s2901_s7 = sld [smem:[#allocation2 + $0xa]] }
 0x4d7   : > { %634 = vrot.lane.b32.xlu1 %v626_v44, %s3095_s9  ;;  %v2062_v44 = vmul.f32 %v3736_v61, %v3285_v43 }
 0x4d8   : > { %v3826_v26 = vpop.permute.xlu0 %1580 }
 0x4d9   : > { %v3828_v62 = vpop.permute.xlu1 %1890 }
 0x4da   : > { %5209 = vst [vmem:[#allocation61_spill] sm:$0xff] %v3828_v62  ;;  %2066 = vrot.lane.b32.xlu0 %v2060_v3, %s3100_s21 }
 0x4db   : > { %671 = vrot.lane.b32.xlu1 %v665_v30, %s3096_s11  ;;  %v2636_v30 = vmul.f32 %v3747_v29, %v3280_v40 }
 0x4dc   : > { %v3835_v4 = vpop.permute.xlu0 %1584 }
 0x4dd   : > { %v3837_v47 = vpop.permute.xlu1 %1894 }
 0x4de   : > { %5210 = vst [vmem:[#allocation62_spill] sm:$0xff] %v3837_v47  ;;  %2070 = vrot.lane.b32.xlu0 %v2062_v44, %s3100_s21  ;;  %v706_v47 = vmul.f32 %v705_v11, %v3367_v32  ;;  %v2638_v44 = vmul.f32 %v3747_v29, %v3285_v43 }
 0x4df   : > { %675 = vrot.lane.b32.xlu1 %v667_v28, %s3096_s11  ;;  %v708_v28 = vmul.f32 %v705_v11, %v3812_v58 }
 0x4e0   : > { %v3844_v62 = vpop.permute.xlu0 %1624 }
 0x4e1   : > { %5211 = vst [vmem:[#allocation63_spill] sm:$0xff] %v3844_v62  ;;  %v3846_v3 = vpop.permute.xlu1 %1934 }
 0x4e2   : > { %5212 = vst [vmem:[#allocation64_spill] sm:$0xff] %v3846_v3  ;;  %2642 = vrot.lane.b32.xlu0 %v2636_v30, %s3099_s17 }
 0x4e3   : > { %712 = vrot.lane.b32.xlu1 %v706_v47, %s3097_s13  ;;  %v2371_v47 = vmul.f32 %v3758_v41, %v3277_v39 }
 0x4e4   : > { %v3853_v61 = vpop.permute.xlu0 %1628 }
 0x4e5   : > { %5213 = vst [vmem:[#allocation65_spill] sm:$0xff] %v3853_v61  ;;  %v3855_v16 = vpop.permute.xlu1 %1938 }
 0x4e6   : > { %5214 = vst [vmem:[#allocation66_spill] sm:$0xff] %v3855_v16  ;;  %2646 = vrot.lane.b32.xlu0 %v2638_v44, %s3099_s17  ;;  %v747_v16 = vmul.f32 %v746_v63, %v3367_v32  ;;  %v2681_v44 = vmul.f32 %v3778_v9, %v3277_v39  ;;  %v828_v39 = vstv %s2869_s12  ;;  %s2907_s12 = sld [smem:[#allocation2 + $0x1f]] }
 0x4e7   : > { %716 = vrot.lane.b32.xlu1 %v708_v28, %s3097_s13  ;;  %v749_v28 = vmul.f32 %v746_v63, %v3812_v58 }
 0x4e8   : > { %v3862_v3 = vpop.permute.xlu0 %1668 }
 0x4e9   : > { %5215 = vst [vmem:[#allocation67_spill] sm:$0xff] %v3862_v3  ;;  %v3864_v30 = vpop.permute.xlu1 %1978 }
 0x4ea   : > { %5216 = vst [vmem:[#allocation68_spill] sm:$0xff] %v3864_v30  ;;  %2378 = vrot.lane.b32.xlu0 %v2371_v47, %s3100_s21 }
 0x4eb   : > { %753 = vrot.lane.b32.xlu1 %v747_v16, %s3098_s15  ;;  %v625_v16 = vmul.f32 %v3798_v25, %v3364_v31 }
 0x4ec   : > { %v3871_v29 = vpop.permute.xlu0 %1672 }
 0x4ed   : > { %5217 = vst [vmem:[#allocation69_spill] sm:$0xff] %v3871_v29  ;;  %v3873_v40 = vpop.permute.xlu1 %1982 }
 0x4ee   : > { %5218 = vst [vmem:[#allocation70_spill] sm:$0xff] %v3873_v40  ;;  %2688 = vrot.lane.b32.xlu0 %v2681_v44, %s3100_s21  ;;  %v788_v40 = vmul.f32 %v787_v50, %v3367_v32  ;;  %v666_v44 = vmul.f32 %v664_v13, %v3364_v31 }
 0x4ef   : > { %757 = vrot.lane.b32.xlu1 %v749_v28, %s3098_s15  ;;  %v790_v28 = vmul.f32 %v787_v50, %v3812_v58 }
 0x4f0   : > { %v3880_v41 = vpop.permute.xlu0 %1712 }
 0x4f1   : > { %5219 = vst [vmem:[#allocation71_spill] sm:$0xff] %v3880_v41  ;;  %v3882_v47 = vpop.permute.xlu1 %2022 }
 0x4f2   : > { %5220 = vst [vmem:[#allocation72_spill] sm:$0xff] %v3882_v47  ;;  %632 = vrot.lane.b32.xlu0 %v625_v16, %s3095_s9  ;;  %v829_v16 = vmul.f32 %v828_v39, %v3367_v32 }
 0x4f3   : > { %794 = vrot.lane.b32.xlu1 %v788_v40, %s3099_s17  ;;  %v707_v40 = vmul.f32 %v705_v11, %v3364_v31 }
 0x4f4   : > { %v3889_v9 = vpop.permute.xlu0 %1716 }
 0x4f5   : > { %5221 = vst [vmem:[#allocation73_spill] sm:$0xff] %v3889_v9  ;;  %v3891_v30 = vpop.permute.xlu1 %2026  ;;  %v888_v9 = vstv %s2873_s14  ;;  %s2909_s14 = sld [smem:[#allocation2 + $0x26]] }
 0x4f6   : > { %5222 = vst [vmem:[#allocation74_spill] sm:$0xff] %v3891_v30  ;;  %673 = vrot.lane.b32.xlu0 %v666_v44, %s3096_s11  ;;  %v748_v44 = vmul.f32 %v746_v63, %v3364_v31 }
 0x4f7   : > { %798 = vrot.lane.b32.xlu1 %v790_v28, %s3099_s17  ;;  %v831_v28 = vmul.f32 %v828_v39, %v3812_v58 }
 0x4f8   : > { %v3897_v25 = vpop.permute.xlu0 %1756 }
 0x4f9   : > { %5223 = vst [vmem:[#allocation75_spill] sm:$0xff] %v3897_v25  ;;  %v3899_v47 = vpop.permute.xlu1 %2156 }
 0x4fa   : > { %5224 = vst [vmem:[#allocation76_spill] sm:$0xff] %v3899_v47  ;;  %714 = vrot.lane.b32.xlu0 %v707_v40, %s3097_s13  ;;  %v789_v40 = vmul.f32 %v787_v50, %v3364_v31  ;;  %v932_v47 = vstv %s2875_s16  ;;  %s2911_s16 = sld [smem:[#allocation2 + $0x2d]] }
 0x4fb   : > { %835 = vrot.lane.b32.xlu1 %v829_v16, %s3100_s21  ;;  %v889_v16 = vmul.f32 %v888_v9, %v3367_v32 }
 0x4fc   : > { %v3905_v13 = vpop.permute.xlu0 %1760 }
 0x4fd   : > { %5225 = vst [vmem:[#allocation77_spill] sm:$0xff] %v3905_v13  ;;  %v3907_v30 = vpop.permute.xlu1 %2160 }
 0x4fe   : > { %5226 = vst [vmem:[#allocation78_spill] sm:$0xff] %v3907_v30  ;;  %755 = vrot.lane.b32.xlu0 %v748_v44, %s3098_s15  ;;  %v830_v44 = vmul.f32 %v828_v39, %v3364_v31 }
 0x4ff   : > { %839 = vrot.lane.b32.xlu1 %v831_v28, %s3100_s21  ;;  %v891_v28 = vmul.f32 %v888_v9, %v3812_v58 }
 0x500   : > { %v3913_v11 = vpop.permute.xlu0 %1848 }
 0x501   : > { %5227 = vst [vmem:[#allocation79_spill] sm:$0xff] %v3913_v11  ;;  %v3915_v25 = vpop.permute.xlu1 %2468 }
 0x502   : > { %5228 = vst [vmem:[#allocation80_spill] sm:$0xff] %v3915_v25  ;;  %796 = vrot.lane.b32.xlu0 %v789_v40, %s3099_s17  ;;  %v890_v40 = vmul.f32 %v888_v9, %v3364_v31 }
 0x503   : > { %895 = vrot.lane.b32.xlu1 %v889_v16, %s3095_s9  ;;  %v933_v16 = vmul.f32 %v932_v47, %v3367_v32 }
 0x504   : > { %v3921_v63 = vpop.permute.xlu0 %1892 }
 0x505   : > { %5229 = vst [vmem:[#allocation81_spill] sm:$0xff] %v3921_v63  ;;  %v3923_v30 = vpop.permute.xlu1 %2200 }
 0x506   : > { %5230 = vst [vmem:[#allocation82_spill] sm:$0xff] %v3923_v30  ;;  %837 = vrot.lane.b32.xlu0 %v830_v44, %s3100_s21  ;;  %v934_v44 = vmul.f32 %v932_v47, %v3364_v31 }
 0x507   : > { %899 = vrot.lane.b32.xlu1 %v891_v28, %s3095_s9  ;;  %v935_v28 = vmul.f32 %v932_v47, %v3812_v58 }
 0x508   : > { %v3929_v50 = vpop.permute.xlu0 %1936 }
 0x509   : > { %5231 = vst [vmem:[#allocation83_spill] sm:$0xff] %v3929_v50  ;;  %v3931_v25 = vpop.permute.xlu1 %2204  ;;  %v976_v50 = vstv %s2877_s20  ;;  %s2915_s20 = sld [smem:[#allocation2 + $0xb]] }
 0x50a   : > { %5232 = vst [vmem:[#allocation84_spill] sm:$0xff] %v3931_v25  ;;  %897 = vrot.lane.b32.xlu0 %v890_v40, %s3095_s9  ;;  %v978_v40 = vmul.f32 %v976_v50, %v3364_v31 }
 0x50b   : > { %939 = vrot.lane.b32.xlu1 %v933_v16, %s3096_s11  ;;  %v977_v16 = vmul.f32 %v976_v50, %v3367_v32 }
 0x50c   : > { %v3937_v39 = vpop.permute.xlu0 %1980 }
 0x50d   : > { %5233 = vst [vmem:[#allocation85_spill] sm:$0xff] %v3937_v39  ;;  %v3939_v30 = vpop.permute.xlu1 %2512  ;;  %v1020_v39 = vstv %s2879_s22  ;;  %s2917_s22 = sld [smem:[#allocation2 + $0x12]] }
 0x50e   : > { %5234 = vst [vmem:[#allocation86_spill] sm:$0xff] %v3939_v30  ;;  %941 = vrot.lane.b32.xlu0 %v934_v44, %s3096_s11  ;;  %v1022_v44 = vmul.f32 %v1020_v39, %v3364_v31 }
 0x50f   : > { %943 = vrot.lane.b32.xlu1 %v935_v28, %s3096_s11  ;;  %v979_v28 = vmul.f32 %v976_v50, %v3812_v58 }
 0x510   : > { %v3945_v9 = vpop.permute.xlu0 %2024 }
 0x511   : > { %5235 = vst [vmem:[#allocation87_spill] sm:$0xff] %v3945_v9  ;;  %v3947_v25 = vpop.permute.xlu1 %2244  ;;  %v1064_v9 = vstv %s2881_s23  ;;  %s2919_s23 = sld [smem:[#allocation2 + $0x19]] }
 0x512   : > { %5236 = vst [vmem:[#allocation88_spill] sm:$0xff] %v3947_v25  ;;  %985 = vrot.lane.b32.xlu0 %v978_v40, %s3097_s13  ;;  %v1066_v40 = vmul.f32 %v1064_v9, %v3364_v31 }
 0x513   : > { %983 = vrot.lane.b32.xlu1 %v977_v16, %s3097_s13  ;;  %v1021_v16 = vmul.f32 %v1020_v39, %v3367_v32 }
 0x514   : > { %v3953_v47 = vpop.permute.xlu0 %2158 }
 0x515   : > { %5237 = vst [vmem:[#allocation89_spill] sm:$0xff] %v3953_v47  ;;  %v3955_v30 = vpop.permute.xlu1 %2248  ;;  %v1108_v47 = vstv %s2883_s24  ;;  %s2921_s24 = sld [smem:[#allocation2 + $0x20]] }
 0x516   : > { %5238 = vst [vmem:[#allocation90_spill] sm:$0xff] %v3955_v30  ;;  %1029 = vrot.lane.b32.xlu0 %v1022_v44, %s3098_s15  ;;  %v1110_v44 = vmul.f32 %v1108_v47, %v3364_v31 }
 0x517   : > { %987 = vrot.lane.b32.xlu1 %v979_v28, %s3097_s13  ;;  %v1023_v28 = vmul.f32 %v1020_v39, %v3812_v58 }
 0x518   : > { %v3961_v25 = vpop.permute.xlu0 %2466 }
 0x519   : > { %5239 = vst [vmem:[#allocation91_spill] sm:$0xff] %v3961_v25  ;;  %v3963_v63 = vpop.permute.xlu1 %2556  ;;  %v1199_v25 = vstv %s2887_s25  ;;  %s2923_s25 = sld [smem:[#allocation2 + $0x27]] }
 0x51a   : > { %5240 = vst [vmem:[#allocation92_spill] sm:$0xff] %v3963_v63  ;;  %1073 = vrot.lane.b32.xlu0 %v1066_v40, %s3099_s17  ;;  %v1200_v40 = vmul.f32 %v1199_v25, %v3367_v32 }
 0x51b   : > { %1027 = vrot.lane.b32.xlu1 %v1021_v16, %s3098_s15  ;;  %v1065_v16 = vmul.f32 %v1064_v9, %v3367_v32 }
 0x51c   : > { %v3969_v50 = vpop.permute.xlu0 %2470 }
 0x51d   : > { %5241 = vst [vmem:[#allocation93_spill] sm:$0xff] %v3969_v50  ;;  %v3971_v30 = vpop.permute.xlu1 %2288  ;;  %v1243_v50 = vstv %s2889_s28  ;;  %s2929_s28 = sld [smem:[#allocation2 + $0xc]] }
 0x51e   : > { %5242 = vst [vmem:[#allocation94_spill] sm:$0xff] %v3971_v30  ;;  %1117 = vrot.lane.b32.xlu0 %v1110_v44, %s3100_s21  ;;  %v1202_v44 = vmul.f32 %v1199_v25, %v3812_v58 }
 0x51f   : > { %1031 = vrot.lane.b32.xlu1 %v1023_v28, %s3098_s15  ;;  %v1067_v28 = vmul.f32 %v1064_v9, %v3812_v58 }
 0x520   : > { %v3977_v63 = vpop.permute.xlu0 %2202 }
 0x521   : > { %5243 = vst [vmem:[#allocation95_spill] sm:$0xff] %v3977_v63  ;;  %v3979_v11 = vpop.permute.xlu1 %2292 }
 0x522   : > { %5244 = vst [vmem:[#allocation96_spill] sm:$0xff] %v3979_v11  ;;  %1206 = vrot.lane.b32.xlu0 %v1200_v40, %s3095_s9  ;;  %v1244_v40 = vmul.f32 %v1243_v50, %v3367_v32 }
 0x523   : > { %1071 = vrot.lane.b32.xlu1 %v1065_v16, %s3099_s17  ;;  %v1109_v16 = vmul.f32 %v1108_v47, %v3367_v32 }
 0x524   : > { %v3985_v30 = vpop.permute.xlu0 %2510 }
 0x525   : > { %5245 = vst [vmem:[#allocation97_spill] sm:$0xff] %v3985_v30  ;;  %v3987_v39 = vpop.permute.xlu1 %2600  ;;  %v1287_v30 = vstv %s2891_s29  ;;  %s2943_s29 = sld [smem:[#allocation2 + $0xd]] }
 0x526   : > { %5246 = vst [vmem:[#allocation98_spill] sm:$0xff] %v3987_v39  ;;  %1210 = vrot.lane.b32.xlu0 %v1202_v44, %s3095_s9  ;;  %v1246_v44 = vmul.f32 %v1243_v50, %v3812_v58 }
 0x527   : > { %1075 = vrot.lane.b32.xlu1 %v1067_v28, %s3099_s17  ;;  %v1111_v28 = vmul.f32 %v1108_v47, %v3812_v58 }
 0x528   : > { %v3993_v11 = vpop.permute.xlu0 %2514 }
 0x529   : > { %5247 = vst [vmem:[#allocation99_spill] sm:$0xff] %v3993_v11  ;;  %v3995_v63 = vpop.permute.xlu1 %2334 }
 0x52a   : > { %5248 = vst [vmem:[#allocation100_spill] sm:$0xff] %v3995_v63  ;;  %1250 = vrot.lane.b32.xlu0 %v1244_v40, %s3096_s11  ;;  %v1288_v40 = vmul.f32 %v1287_v30, %v3367_v32 }
 0x52b   : > { %1115 = vrot.lane.b32.xlu1 %v1109_v16, %s3100_s21  ;;  %v1201_v16 = vmul.f32 %v1199_v25, %v3364_v31 }
 0x52c   : > { %v4001_v39 = vpop.permute.xlu0 %2246 }
 0x52d   : > { %5249 = vst [vmem:[#allocation101_spill] sm:$0xff] %v4001_v39  ;;  %v4003_v9 = vpop.permute.xlu1 %2068  ;;  %v1331_v39 = vstv %s2893_s19  ;;  %s2931_s19 = sld [smem:[#allocation2 + $0x13]] }
 0x52e   : > { %5250 = vst [vmem:[#allocation102_spill] sm:$0xff] %v4003_v9  ;;  %1254 = vrot.lane.b32.xlu0 %v1246_v44, %s3096_s11  ;;  %v1290_v44 = vmul.f32 %v1287_v30, %v3812_v58 }
 0x52f   : > { %1119 = vrot.lane.b32.xlu1 %v1111_v28, %s3100_s21  ;;  %v1245_v28 = vmul.f32 %v1243_v50, %v3364_v31 }
 0x530   : > { %v4009_v63 = vpop.permute.xlu0 %2554 }
 0x531   : > { %5251 = vst [vmem:[#allocation103_spill] sm:$0xff] %v4009_v63  ;;  %v4011_v11 = vpop.permute.xlu1 %2644 }
 0x532   : > { %5252 = vst [vmem:[#allocation104_spill] sm:$0xff] %v4011_v11  ;;  %1294 = vrot.lane.b32.xlu0 %v1288_v40, %s3097_s13  ;;  %v1332_v40 = vmul.f32 %v1331_v39, %v3367_v32 }
 0x533   : > { %1208 = vrot.lane.b32.xlu1 %v1201_v16, %s3095_s9  ;;  %v1289_v16 = vmul.f32 %v1287_v30, %v3364_v31 }
 0x534   : > { %v4017_v9 = vpop.permute.xlu0 %2558 }
 0x535   : > { %5253 = vst [vmem:[#allocation105_spill] sm:$0xff] %v4017_v9  ;;  %v4019_v47 = vpop.permute.xlu1 %2376  ;;  %v1375_v9 = vstv %s2895_s26  ;;  %s2945_s26 = sld [smem:[#allocation2 + $0x14]] }
 0x536   : > { %5254 = vst [vmem:[#allocation106_spill] sm:$0xff] %v4019_v47  ;;  %1298 = vrot.lane.b32.xlu0 %v1290_v44, %s3097_s13  ;;  %v1334_v44 = vmul.f32 %v1331_v39, %v3812_v58 }
 0x537   : > { %1252 = vrot.lane.b32.xlu1 %v1245_v28, %s3096_s11  ;;  %v1333_v28 = vmul.f32 %v1331_v39, %v3364_v31 }
 0x538   : > { %v4025_v11 = vpop.permute.xlu0 %2290 }
 0x539   : > { %5255 = vst [vmem:[#allocation107_spill] sm:$0xff] %v4025_v11  ;;  %v4027_v25 = vpop.permute.xlu1 %2380 }
 0x53a   : > { %5256 = vst [vmem:[#allocation108_spill] sm:$0xff] %v4027_v25  ;;  %1338 = vrot.lane.b32.xlu0 %v1332_v40, %s3098_s15  ;;  %v1376_v40 = vmul.f32 %v1375_v9, %v3367_v32 }
 0x53b   : > { %1296 = vrot.lane.b32.xlu1 %v1289_v16, %s3097_s13  ;;  %v1377_v16 = vmul.f32 %v1375_v9, %v3364_v31  ;;  %v2482_v60 = vstv %s2945_s26  ;;  %s2942_s26 = sld [smem:[#allocation2 + $0x37]] }
 0x53c   : > { %v4033_v50 = vpop.permute.xlu0 %2598 }
 0x53d   : > { %5257 = vst [vmem:[#allocation109_spill] sm:$0xff] %v4033_v50  ;;  %v4035_v47 = vpop.permute.xlu1 %2686  ;;  %v1419_v50 = vstv %s2897_s6  ;;  %s2933_s6 = sld [smem:[#allocation2 + $0x1a]] }
 0x53e   : > { %5258 = vst [vmem:[#allocation110_spill] sm:$0xff] %v4035_v47  ;;  %1342 = vrot.lane.b32.xlu0 %v1334_v44, %s3098_s15  ;;  %v1378_v44 = vmul.f32 %v1375_v9, %v3812_v58 }
 0x53f   : > { %1340 = vrot.lane.b32.xlu1 %v1333_v28, %s3098_s15  ;;  %v1421_v28 = vmul.f32 %v1419_v50, %v3364_v31 }
 0x540   : > { %v4041_v30 = vpop.permute.xlu0 %2602 }
 0x541   : > { %5259 = vst [vmem:[#allocation111_spill] sm:$0xff] %v4041_v30  ;;  %v4043_v25 = vpop.permute.xlu1 %2690  ;;  %v1508_v30 = vstv %s2901_s7  ;;  %s2947_s7 = sld [smem:[#allocation2 + $0x1b]] }
 0x542   : > { %5260 = vst [vmem:[#allocation112_spill] sm:$0xff] %v4043_v25  ;;  %1382 = vrot.lane.b32.xlu0 %v1376_v40, %s3099_s17  ;;  %v1420_v40 = vmul.f32 %v1419_v50, %v3367_v32 }
 0x543   : > { %1384 = vrot.lane.b32.xlu1 %v1377_v16, %s3099_s17  ;;  %v1509_v16 = vmul.f32 %v1508_v30, %v3367_v32  ;;  %v2216_v29 = vstv %s2933_s6  ;;  %s3104_s6 = smov 124  }
 0x544   : > { %v4049_v39 = vpop.permute.xlu0 %2332 }
 0x545   : > { %5261 = vst [vmem:[#allocation113_spill] sm:$0xff] %v4049_v39  ;;  %v4051_v47 = vpop.permute.xlu1 %630  ;;  %v1552_v39 = vstv %s2903_s8  ;;  %s2935_s8 = sld [smem:[#allocation2 + $0x21]] }
 0x546   : > { %5262 = vst [vmem:[#allocation114_spill] sm:$0xff] %v4051_v47  ;;  %1386 = vrot.lane.b32.xlu0 %v1378_v44, %s3099_s17  ;;  %v1422_v44 = vmul.f32 %v1419_v50, %v3812_v58 }
 0x547   : > { %1428 = vrot.lane.b32.xlu1 %v1421_v28, %s3100_s21  ;;  %v1511_v28 = vmul.f32 %v1508_v30, %v3812_v58 }
 0x548   : > { %v4057_v25 = vpop.permute.xlu0 %2336 }
 0x549   : > { %5263 = vst [vmem:[#allocation115_spill] sm:$0xff] %v4057_v25  ;;  %v4059_v11 = vpop.permute.xlu1 %634 }
 0x54a   : > { %5264 = vst [vmem:[#allocation116_spill] sm:$0xff] %v4059_v11  ;;  %1426 = vrot.lane.b32.xlu0 %v1420_v40, %s3100_s21  ;;  %v1510_v40 = vmul.f32 %v1508_v30, %v3364_v31 }
 0x54b   : > { %1515 = vrot.lane.b32.xlu1 %v1509_v16, %s3095_s9  ;;  %v1553_v16 = vmul.f32 %v1552_v39, %v3367_v32 }
 0x54c   : > { %v4065_v9 = vpop.permute.xlu0 %2066 }
 0x54d   : > { %5265 = vst [vmem:[#allocation117_spill] sm:$0xff] %v4065_v9  ;;  %v4067_v47 = vpop.permute.xlu1 %671  ;;  %v1596_v9 = vstv %s2905_s10  ;;  %s2925_s10 = sld [smem:[#allocation2 + $0x2e]] }
 0x54e   : > { %5266 = vst [vmem:[#allocation118_spill] sm:$0xff] %v4067_v47  ;;  %1430 = vrot.lane.b32.xlu0 %v1422_v44, %s3100_s21  ;;  %v1554_v44 = vmul.f32 %v1552_v39, %v3364_v31 }
 0x54f   : > { %1519 = vrot.lane.b32.xlu1 %v1511_v28, %s3095_s9  ;;  %v1555_v28 = vmul.f32 %v1552_v39, %v3812_v58 }
 0x550   : > { %v4073_v11 = vpop.permute.xlu0 %2070 }
 0x551   : > { %5267 = vst [vmem:[#allocation119_spill] sm:$0xff] %v4073_v11  ;;  %v4075_v25 = vpop.permute.xlu1 %675 }
 0x552   : > { %5268 = vst [vmem:[#allocation120_spill] sm:$0xff] %v4075_v25  ;;  %1517 = vrot.lane.b32.xlu0 %v1510_v40, %s3095_s9  ;;  %v1598_v40 = vmul.f32 %v1596_v9, %v3364_v31 }
 0x553   : > { %1559 = vrot.lane.b32.xlu1 %v1553_v16, %s3096_s11  ;;  %v1597_v16 = vmul.f32 %v1596_v9, %v3367_v32 }
 0x554   : > { %v4081_v50 = vpop.permute.xlu0 %2642 }
 0x555   : > { %5269 = vst [vmem:[#allocation121_spill] sm:$0xff] %v4081_v50  ;;  %v4083_v47 = vpop.permute.xlu1 %712  ;;  %v1640_v50 = vstv %s2907_s12  ;;  %s4352_s12 = sld [smem:[#allocation2 + $0x2f]] }
 0x556   : > { %5270 = vst [vmem:[#allocation122_spill] sm:$0xff] %v4083_v47  ;;  %1561 = vrot.lane.b32.xlu0 %v1554_v44, %s3096_s11  ;;  %v1642_v44 = vmul.f32 %v1640_v50, %v3364_v31 }
 0x557   : > { %1563 = vrot.lane.b32.xlu1 %v1555_v28, %s3096_s11  ;;  %v1599_v28 = vmul.f32 %v1596_v9, %v3812_v58 }
 0x558   : > { %v4089_v30 = vpop.permute.xlu0 %2646 }
 0x559   : > { %5271 = vst [vmem:[#allocation123_spill] sm:$0xff] %v4089_v30  ;;  %v4091_v25 = vpop.permute.xlu1 %716  ;;  %v1684_v30 = vstv %s2909_s14  ;;  %s4401_s14 = sld [smem:[#allocation2 + $0x4]] }
 0x55a   : > { %5272 = vst [vmem:[#allocation124_spill] sm:$0xff] %v4091_v25  ;;  %1605 = vrot.lane.b32.xlu0 %v1598_v40, %s3097_s13  ;;  %v1686_v40 = vmul.f32 %v1684_v30, %v3364_v31 }
 0x55b   : > { %1603 = vrot.lane.b32.xlu1 %v1597_v16, %s3097_s13  ;;  %v1641_v16 = vmul.f32 %v1640_v50, %v3367_v32 }
 0x55c   : > { %v4097_v39 = vpop.permute.xlu0 %2378 }
 0x55d   : > { %5273 = vst [vmem:[#allocation125_spill] sm:$0xff] %v4097_v39  ;;  %v4099_v47 = vpop.permute.xlu1 %753  ;;  %v1728_v39 = vstv %s2911_s16 }
 0x55e   : > { %5274 = vst [vmem:[#allocation126_spill] sm:$0xff] %v4099_v47  ;;  %1649 = vrot.lane.b32.xlu0 %v1642_v44, %s3098_s15  ;;  %v1730_v44 = vmul.f32 %v1728_v39, %v3364_v31 }
 0x55f   : > { %1607 = vrot.lane.b32.xlu1 %v1599_v28, %s3097_s13  ;;  %v1643_v28 = vmul.f32 %v1640_v50, %v3812_v58 }
 0x560   : > { %v4105_v25 = vpop.permute.xlu0 %2688 }
 0x561   : > { %5275 = vst [vmem:[#allocation127_spill] sm:$0xff] %v4105_v25  ;;  %v4107_v63 = vpop.permute.xlu1 %757  ;;  %v1818_v25 = vstv %s2915_s20 }
 0x562   : > { %5276 = vst [vmem:[#allocation128_spill] sm:$0xff] %v4107_v63  ;;  %1693 = vrot.lane.b32.xlu0 %v1686_v40, %s3099_s17  ;;  %v1819_v40 = vmul.f32 %v1818_v25, %v3367_v32 }
 0x563   : > { %1647 = vrot.lane.b32.xlu1 %v1641_v16, %s3098_s15  ;;  %v1685_v16 = vmul.f32 %v1684_v30, %v3367_v32 }
 0x564   : > { %v4113_v9 = vpop.permute.xlu0 %632 }
 0x565   : > { %5277 = vst [vmem:[#allocation129_spill] sm:$0xff] %v4113_v9  ;;  %v4115_v47 = vpop.permute.xlu1 %794  ;;  %v1862_v9 = vstv %s2917_s22 }
 0x566   : > { %5278 = vst [vmem:[#allocation130_spill] sm:$0xff] %v4115_v47  ;;  %1737 = vrot.lane.b32.xlu0 %v1730_v44, %s3100_s21  ;;  %v1821_v44 = vmul.f32 %v1818_v25, %v3812_v58 }
 0x567   : > { %1651 = vrot.lane.b32.xlu1 %v1643_v28, %s3098_s15  ;;  %v1687_v28 = vmul.f32 %v1684_v30, %v3812_v58 }
 0x568   : > { %v4121_v63 = vpop.permute.xlu0 %673 }
 0x569   : > { %5279 = vst [vmem:[#allocation131_spill] sm:$0xff] %v4121_v63  ;;  %v4123_v11 = vpop.permute.xlu1 %798 }
 0x56a   : > { %5280 = vst [vmem:[#allocation132_spill] sm:$0xff] %v4123_v11  ;;  %1825 = vrot.lane.b32.xlu0 %v1819_v40, %s3095_s9  ;;  %v1863_v40 = vmul.f32 %v1862_v9, %v3367_v32 }
 0x56b   : > { %1691 = vrot.lane.b32.xlu1 %v1685_v16, %s3099_s17  ;;  %v1729_v16 = vmul.f32 %v1728_v39, %v3367_v32 }
 0x56c   : > { %v4129_v47 = vpop.permute.xlu0 %714 }
 0x56d   : > { %5281 = vst [vmem:[#allocation133_spill] sm:$0xff] %v4129_v47  ;;  %v4131_v50 = vpop.permute.xlu1 %835  ;;  %v1906_v47 = vstv %s2919_s23 }
 0x56e   : > { %5282 = vst [vmem:[#allocation134_spill] sm:$0xff] %v4131_v50  ;;  %1829 = vrot.lane.b32.xlu0 %v1821_v44, %s3095_s9  ;;  %v1865_v44 = vmul.f32 %v1862_v9, %v3812_v58 }
 0x56f   : > { %1695 = vrot.lane.b32.xlu1 %v1687_v28, %s3099_s17  ;;  %v1731_v28 = vmul.f32 %v1728_v39, %v3812_v58 }
 0x570   : > { %v4137_v11 = vpop.permute.xlu0 %755 }
 0x571   : > { %5283 = vst [vmem:[#allocation135_spill] sm:$0xff] %v4137_v11  ;;  %v4139_v63 = vpop.permute.xlu1 %839 }
 0x572   : > { %5284 = vst [vmem:[#allocation136_spill] sm:$0xff] %v4139_v63  ;;  %1869 = vrot.lane.b32.xlu0 %v1863_v40, %s3096_s11  ;;  %v1907_v40 = vmul.f32 %v1906_v47, %v3367_v32 }
 0x573   : > { %1735 = vrot.lane.b32.xlu1 %v1729_v16, %s3100_s21  ;;  %v1820_v16 = vmul.f32 %v1818_v25, %v3364_v31 }
 0x574   : > { %v4145_v50 = vpop.permute.xlu0 %796 }
 0x575   : > { %5285 = vst [vmem:[#allocation137_spill] sm:$0xff] %v4145_v50  ;;  %v4147_v30 = vpop.permute.xlu1 %895 }
 0x576   : > { %5286 = vst [vmem:[#allocation138_spill] sm:$0xff] %v4147_v30  ;;  %1873 = vrot.lane.b32.xlu0 %v1865_v44, %s3096_s11  ;;  %v1909_v44 = vmul.f32 %v1906_v47, %v3812_v58  ;;  %v1950_v30 = vstv %s2921_s24  ;;  %s3102_s24 = smov 126  }
 0x577   : > { %1739 = vrot.lane.b32.xlu1 %v1731_v28, %s3100_s21  ;;  %v1864_v28 = vmul.f32 %v1862_v9, %v3364_v31 }
 0x578   : > { %v4153_v63 = vpop.permute.xlu0 %837 }
 0x579   : > { %5287 = vst [vmem:[#allocation139_spill] sm:$0xff] %v4153_v63  ;;  %v4155_v11 = vpop.permute.xlu1 %899 }
 0x57a   : > { %1913 = vrot.lane.b32.xlu0 %v1907_v40, %s3097_s13  ;;  %v1951_v40 = vmul.f32 %v1950_v30, %v3367_v32 }
 0x57b   : > { %1827 = vrot.lane.b32.xlu1 %v1820_v16, %s3095_s9  ;;  %v1908_v16 = vmul.f32 %v1906_v47, %v3364_v31 }
 0x57c   : > { %v4161_v50 = vpop.permute.xlu0 %897 }
 0x57d   : > { %5288 = vst [vmem:[#allocation140_spill] sm:$0xff] %v4161_v50  ;;  %v4163_v39 = vpop.permute.xlu1 %939 }
 0x57e   : > { %5289 = vst [vmem:[#allocation141_spill] sm:$0xff] %v4163_v39  ;;  %1917 = vrot.lane.b32.xlu0 %v1909_v44, %s3097_s13  ;;  %v1953_v44 = vmul.f32 %v1950_v30, %v3812_v58 }
 0x57f   : > { %1871 = vrot.lane.b32.xlu1 %v1864_v28, %s3096_s11  ;;  %v1952_v28 = vmul.f32 %v1950_v30, %v3364_v31 }
 0x580   : > { %v4169_v63 = vpop.permute.xlu0 %941 }
 0x581   : > { %5290 = vst [vmem:[#allocation142_spill] sm:$0xff] %v4169_v63  ;;  %v4171_v25 = vpop.permute.xlu1 %943  ;;  %v1994_v63 = vstv %s2923_s25  ;;  %s3103_s25 = smov 125  }
 0x582   : > { %1957 = vrot.lane.b32.xlu0 %v1951_v40, %s3098_s15  ;;  %v1995_v40 = vmul.f32 %v1994_v63, %v3367_v32 }
 0x583   : > { %1915 = vrot.lane.b32.xlu1 %v1908_v16, %s3097_s13  ;;  %v1996_v16 = vmul.f32 %v1994_v63, %v3364_v31 }
 0x584   : > { %v4177_v9 = vpop.permute.xlu0 %985 }
 0x585   : > { %5291 = vst [vmem:[#allocation143_spill] sm:$0xff] %v4177_v9  ;;  %v4179_v39 = vpop.permute.xlu1 %983  ;;  %v2128_v9 = vstv %s2929_s28  ;;  %s2927_s28 = sld [smem:[#allocation2 + $0x5]] }
 0x586   : > { %5292 = vst [vmem:[#allocation144_spill] sm:$0xff] %v4179_v39  ;;  %1961 = vrot.lane.b32.xlu0 %v1953_v44, %s3098_s15  ;;  %v1997_v44 = vmul.f32 %v1994_v63, %v3812_v58 }
 0x587   : > { %1959 = vrot.lane.b32.xlu1 %v1952_v28, %s3098_s15  ;;  %v2130_v28 = vmul.f32 %v2128_v9, %v3364_v31 }
 0x588   : > { %v4185_v47 = vpop.permute.xlu0 %1029 }
 0x589   : > { %5293 = vst [vmem:[#allocation145_spill] sm:$0xff] %v4185_v47  ;;  %v4187_v50 = vpop.permute.xlu1 %987  ;;  %v2438_v47 = vstv %s2943_s29  ;;  %s2928_s29 = sld [smem:[#allocation2 + $0x36]] }
 0x58a   : > { %2001 = vrot.lane.b32.xlu0 %v1995_v40, %s3099_s17  ;;  %v2129_v40 = vmul.f32 %v2128_v9, %v3367_v32 }
 0x58b   : > { %2003 = vrot.lane.b32.xlu1 %v1996_v16, %s3099_s17  ;;  %v2440_v16 = vmul.f32 %v2438_v47, %v3364_v31 }
 0x58c   : > { %v4193_v30 = vpop.permute.xlu0 %1073 }
 0x58d   : > { %5294 = vst [vmem:[#allocation146_spill] sm:$0xff] %v4193_v30  ;;  %v4195_v39 = vpop.permute.xlu1 %1027  ;;  %v2172_v30 = vstv %s2931_s19  ;;  %s2941_s19 = sld [smem:[#allocation2 + $0x6]] }
 0x58e   : > { %5295 = vst [vmem:[#allocation147_spill] sm:$0xff] %v4195_v39  ;;  %2005 = vrot.lane.b32.xlu0 %v1997_v44, %s3099_s17  ;;  %v2131_v44 = vmul.f32 %v2128_v9, %v3812_v58 }
 0x58f   : > { %2137 = vrot.lane.b32.xlu1 %v2130_v28, %s3095_s9  ;;  %v2173_v28 = vmul.f32 %v2172_v30, %v3367_v32 }
 0x590   : > { %v4201_v13 = vpop.permute.xlu0 %1117 }
 0x591   : > { %5296 = vst [vmem:[#allocation148_spill] sm:$0xff] %v4201_v13  ;;  %v4203_v41 = vpop.permute.xlu1 %1031 }
 0x592   : > { %2135 = vrot.lane.b32.xlu0 %v2129_v40, %s3095_s9  ;;  %v2439_v40 = vmul.f32 %v2438_v47, %v3367_v32 }
 0x593   : > { %2447 = vrot.lane.b32.xlu1 %v2440_v16, %s3095_s9  ;;  %v2175_v16 = vmul.f32 %v2172_v30, %v3812_v58 }
 0x594   : > { %v1207_v63 = vpop.permute.xlu0 %1206 }
 0x595   : > { %v4209_v39 = vpop.permute.xlu1 %1071 }
 0x596   : > { %5297 = vst [vmem:[#allocation149_spill] sm:$0xff] %v4209_v39  ;;  %2139 = vrot.lane.b32.xlu0 %v2131_v44, %s3095_s9  ;;  %v2441_v44 = vmul.f32 %v2438_v47, %v3812_v58 }
 0x597   : > { %2179 = vrot.lane.b32.xlu1 %v2173_v28, %s3096_s11  ;;  %v2484_v28 = vmul.f32 %v2482_v60, %v3364_v31 }
 0x598   : > { %v4215_v13 = vpop.permute.xlu0 %1210 }
 0x599   : > { %v4217_v59 = vpop.permute.xlu1 %1075 }
 0x59a   : > { %2445 = vrot.lane.b32.xlu0 %v2439_v40, %s3095_s9  ;;  %v2174_v40 = vmul.f32 %v2172_v30, %v3364_v31  ;;  %v2526_v30 = vstv %s2947_s7  ;;  %s3105_s7 = smov 123  }
 0x59b   : > { %2183 = vrot.lane.b32.xlu1 %v2175_v16, %s3096_s11  ;;  %v2217_v16 = vmul.f32 %v2216_v29, %v3367_v32 }
 0x59c   : > { %v1251_v9 = vpop.permute.xlu0 %1250 }
 0x59d   : > { %v4223_v39 = vpop.permute.xlu1 %1115 }
 0x59e   : > { %5298 = vst [vmem:[#allocation150_spill] sm:$0xff] %v4223_v39  ;;  %2449 = vrot.lane.b32.xlu0 %v2441_v44, %s3095_s9  ;;  %v2483_v44 = vmul.f32 %v2482_v60, %v3367_v32  ;;  %s4259_s9 = sld [smem:[#allocation2 + $0x22]] }
 0x59f   : > { %2491 = vrot.lane.b32.xlu1 %v2484_v28, %s3096_s11  ;;  %v2219_v28 = vmul.f32 %v2216_v29, %v3812_v58 }
 0x5a0   : > { %v4229_v10 = vpop.permute.xlu0 %1254 }
 0x5a1   : > { %v4231_v37 = vpop.permute.xlu1 %1119 }
 0x5a2   : > { %5299 = vst [vmem:[#allocation151_spill] sm:$0xff] %v4231_v37  ;;  %2181 = vrot.lane.b32.xlu0 %v2174_v40, %s3096_s11  ;;  %v1233_v40 = vsel %vm636_vm6, %v3635_v45, %v3740_v35 }
 0x5a3   : > { %2223 = vrot.lane.b32.xlu1 %v2217_v16, %s3097_s13 }
 0x5a4   : > { %v1295_v47 = vpop.permute.xlu0 %1294 }
 0x5a5   : > { %v1209_v39 = vpop.permute.xlu1 %1208 }
 0x5a6   : > { %v1212_v3 = vsel %vm636_vm6, %v1207_v63, %v1209_v39  ;;  %v1213_v8 = vsel %vm636_vm6, %v1209_v39, %v4215_v13  ;;  %2489 = vrot.lane.b32.xlu0 %v2483_v44, %s3096_s11  ;;  %v1234_v63 = vsel %vm636_vm6, %v3740_v35, %v3644_v21  ;;  %v1278_v35 = vsel %vm677_vm7, %v3751_v51, %v3662_v7 }
 0x5a7   : > { %v1217_v37 = vadd.f32 %v1212_v3, %v3419_v53  ;;  %v1218_v61 = vadd.f32 %v1213_v8, %v3425_v0  ;;  %2227 = vrot.lane.b32.xlu1 %v2219_v28, %s3097_s13  ;;  %v2485_v8 = vmul.f32 %v2482_v60, %v3812_v58  ;;  %v2528_v0 = vmul.f32 %v2526_v30, %v3364_v31 }
 0x5a8   : > { %v4252_v16 = vpop.permute.xlu0 %1298  ;;  %v2260_v28 = vstv %s2935_s8  ;;  %v1277_v60 = vsel %vm677_vm7, %v3653_v48, %v3751_v51  ;;  %v1321_v51 = vsel %vm718_vm8, %v3671_v12, %v3762_v5  ;;  %s609_s8 = sld [smem:[#allocation2]] }
 0x5a9   : > { %v1238_v39 = vadd.f32 %v1233_v40, %v1217_v37  ;;  %v1239_v1 = vadd.f32 %v1234_v63, %v1218_v61  ;;  %v1253_v53 = vpop.permute.xlu1 %1252  ;;  %v2218_v63 = vmul.f32 %v2216_v29, %v3364_v31 }
 0x5aa   : > { %v1256_v3 = vsel %vm677_vm7, %v1251_v9, %v1253_v53  ;;  %v1257_v44 = vsel %vm677_vm7, %v1253_v53, %v4229_v10  ;;  %2493 = vrot.lane.b32.xlu0 %v2485_v8, %s3096_s11  ;;  %s4274_s11 = sld [smem:[#allocation2 + $0x28]] }
 0x5ab   : > { %v1261_v45 = vadd.f32 %v1256_v3, %v1238_v39  ;;  %v1262_v62 = vadd.f32 %v1257_v44, %v1239_v1  ;;  %2535 = vrot.lane.b32.xlu1 %v2528_v0, %s3097_s13  ;;  %v2261_v1 = vmul.f32 %v2260_v28, %v3367_v32  ;;  %v2527_v44 = vmul.f32 %v2526_v30, %v3367_v32 }
 0x5ac   : > { %v1339_v37 = vpop.permute.xlu0 %1338 }
 0x5ad   : > { %v1282_v61 = vadd.f32 %v1277_v60, %v1261_v45  ;;  %v1283_v9 = vadd.f32 %v1278_v35, %v1262_v62  ;;  %v1297_v40 = vpop.permute.xlu1 %1296  ;;  %v1322_v62 = vsel %vm718_vm8, %v3762_v5, %v3680_v23  ;;  %v2263_v45 = vmul.f32 %v2260_v28, %v3812_v58 }
 0x5ae   : > { %v1300_v39 = vsel %vm718_vm8, %v1295_v47, %v1297_v40  ;;  %v1301_v53 = vsel %vm718_vm8, %v1297_v40, %v4252_v16  ;;  %2225 = vrot.lane.b32.xlu0 %v2218_v63, %s3097_s13  ;;  %v1365_v5 = vsel %vm759_vm9, %v3689_v20, %v3771_v54 }
 0x5af   : > { %v1305_v48 = vadd.f32 %v1300_v39, %v1282_v61  ;;  %v1306_v8 = vadd.f32 %v1301_v53, %v1283_v9  ;;  %2267 = vrot.lane.b32.xlu1 %v2261_v1, %s3098_s15  ;;  %v2570_v61 = vstv %s4259_s9  ;;  %v875_v9 = vmul.f32 %v3371_v33, %v3812_v58  ;;  %s2858_s9 = sld [smem:[#allocation2 + $0x31]] }
 0x5b0   : > { %v4284_v29 = vpop.permute.xlu0 %1342  ;;  %v2529_v53 = vmul.f32 %v2526_v30, %v3812_v58  ;;  %v2304_v20 = vstv %s4274_s11  ;;  %v1193_v33 = vmul.f32 %v3403_v49, %v3285_v43 }
 0x5b1   : > { %v1326_v47 = vadd.f32 %v1321_v51, %v1305_v48  ;;  %v1327_v0 = vadd.f32 %v1322_v62, %v1306_v8  ;;  %v1341_v3 = vpop.permute.xlu1 %1340  ;;  %v2572_v48 = vmul.f32 %v2570_v61, %v3364_v31  ;;  %v882_v8 = vmul.f32 %v3373_v34, %v3285_v43 }
 0x5b2   : > { %v1344_v60 = vsel %vm759_vm9, %v1339_v37, %v1341_v3  ;;  %v1345_v35 = vsel %vm759_vm9, %v1341_v3, %v4284_v29  ;;  %2533 = vrot.lane.b32.xlu0 %v2527_v44, %s3097_s13  ;;  %v1186_v37 = vmul.f32 %v3401_v6, %v3812_v58  ;;  %v1366_v6 = vsel %vm759_vm9, %v3771_v54, %v3697_v2 }
 0x5b3   : > { %v1349_v12 = vadd.f32 %v1344_v60, %v1326_v47  ;;  %2271 = vrot.lane.b32.xlu1 %v2263_v45, %s3098_s15  ;;  %v1350_v40 = vadd.f32 %v1345_v35, %v1327_v0  ;;  %v885_v30 = vadd.f32 %v882_v8, %v875_v9  ;;  %v2262_v44 = vmul.f32 %v2260_v28, %v3364_v31 }
 0x5b4   : > { %v1383_v63 = vpop.permute.xlu0 %1382  ;;  %v1196_v47 = vadd.f32 %v1193_v33, %v1186_v37  ;;  %v2305_v45 = vmul.f32 %v2304_v20, %v3367_v32  ;;  %v1409_v54 = vsel %vm800_vm10, %v3705_v55, %v3782_v22  ;;  %v2571_v37 = vmul.f32 %v2570_v61, %v3367_v32 }
 0x5b5   : > { %v1370_v1 = vadd.f32 %v1365_v5, %v1349_v12  ;;  %v1385_v39 = vpop.permute.xlu1 %1384  ;;  %v1371_v34 = vadd.f32 %v1366_v6, %v1350_v40  ;;  %v908_v49 = vadd.f32 %v4155_v11, %v885_v30  ;;  %v2307_v40 = vmul.f32 %v2304_v20, %v3812_v58 }
 0x5b6   : > { %v1388_v51 = vsel %vm800_vm10, %v1383_v63, %v1385_v39  ;;  %2537 = vrot.lane.b32.xlu0 %v2529_v53, %s3097_s13  ;;  %v1219_v35 = vadd.f32 %v4215_v13, %v1196_v47  ;;  %s2951_s13 = sld [smem:[#allocation2 + $0x29]]  ;;  %v1410_v55 = vsel %vm800_vm10, %v3782_v22, %v3713_v15 }
 0x5b7   : > { %v1393_v62 = vadd.f32 %v1388_v51, %v1370_v1  ;;  %2579 = vrot.lane.b32.xlu1 %v2572_v48, %s3098_s15  ;;  %v929_v63 = vadd.f32 %v3642_v27, %v908_v49  ;;  %v2038_v1 = vstv %s2925_s10 }
 0x5b8   : > { %v4314_v0 = vpop.permute.xlu0 %1386  ;;  %v2039_v6 = vmul.f32 %v2038_v1, %v3367_v32 }
 0x5b9   : > { %v1429_v3 = vpop.permute.xlu1 %1428  ;;  %v1389_v60 = vsel %vm800_vm10, %v1385_v39, %v4314_v0  ;;  %v1414_v28 = vadd.f32 %v1409_v54, %v1393_v62  ;;  %v1240_v39 = vadd.f32 %v3644_v21, %v1219_v35  ;;  %v952_v48 = vadd.f32 %v4171_v25, %v929_v63 }
 0x5ba   : > { %v1394_v12 = vadd.f32 %v1389_v60, %v1371_v34  ;;  %2269 = vrot.lane.b32.xlu0 %v2262_v44, %s3098_s15  ;;  %v2573_v21 = vmul.f32 %v2570_v61, %v3812_v58  ;;  %v2306_v61 = vmul.f32 %v2304_v20, %v3364_v31  ;;  %v1495_v60 = vmul.f32 %v3427_v56, %v3812_v58 }
 0x5bb   : > { %2311 = vrot.lane.b32.xlu1 %v2305_v45, %s3099_s17  ;;  %v1263_v8 = vadd.f32 %v4229_v10, %v1240_v39  ;;  %v973_v22 = vadd.f32 %v3660_v14, %v952_v48  ;;  %v2041_v45 = vmul.f32 %v2038_v1, %v3812_v58  ;;  %v1542_v20 = vsel %vm636_vm6, %v3802_v52, %v3742_v38 }
 0x5bc   : > { %v1427_v5 = vpop.permute.xlu0 %1426  ;;  %v1415_v33 = vadd.f32 %v1410_v55, %v1394_v12  ;;  %v2614_v49 = vstv %s2951_s13  ;;  %v1543_v56 = vsel %vm636_vm6, %v3742_v38, %v3816_v46 }
 0x5bd   : > { %v1516_v9 = vpop.permute.xlu1 %1515  ;;  %v1432_v13 = vsel %vm282_vm2, %v1427_v5, %v1429_v3  ;;  %v1284_v10 = vadd.f32 %v3662_v7, %v1263_v8  ;;  %v2616_v8 = vmul.f32 %v2614_v49, %v3364_v31 }
 0x5be   : > { %v4332_v53 = vadd.f32 %v1432_v13, %v1414_v28  ;;  %2577 = vrot.lane.b32.xlu0 %v2571_v37, %s3098_s15  ;;  %v1502_v28 = vmul.f32 %v3429_v57, %v3285_v43 }
 0x5bf   : > { %2315 = vrot.lane.b32.xlu1 %v2307_v40, %s3099_s17  ;;  %v1307_v54 = vadd.f32 %v4252_v16, %v1284_v10  ;;  %v2615_v40 = vmul.f32 %v2614_v49, %v3367_v32  ;;  %v2617_v10 = vmul.f32 %v2614_v49, %v3812_v58 }
 0x5c0   : > { %v4341_v51 = vpop.permute.xlu0 %1430  ;;  %v1505_v13 = vadd.f32 %v1502_v28, %v1495_v60 }
 0x5c1   : > { %v1520_v62 = vpop.permute.xlu1 %1519  ;;  %v1433_v30 = vsel %vm282_vm2, %v1429_v3, %v4341_v51  ;;  %v996_v3 = vadd.f32 %v4187_v50, %v973_v22  ;;  %v1328_v57 = vadd.f32 %v3680_v23, %v1307_v54 }
 0x5c2   : > { %v4347_v47 = vadd.f32 %v1433_v30, %v1415_v33  ;;  %2581 = vrot.lane.b32.xlu0 %v2573_v21, %s3098_s15  ;;  %s4380_s15 = sld [smem:[#allocation2 + $0x30]]  ;;  %v1528_v48 = vadd.f32 %v1520_v62, %v1505_v13  ;;  %v2348_v33 = vstv %s4352_s12 }
 0x5c3   : > { %2045 = vrot.lane.b32.xlu1 %v2039_v6, %s3100_s21  ;;  %v1017_v63 = vadd.f32 %v3678_v42, %v996_v3  ;;  %v1351_v6 = vadd.f32 %v4284_v29, %v1328_v57  ;;  %v2350_v29 = vmul.f32 %v2348_v33, %v3364_v31 }
 0x5c4   : > { %5300 = vst [vmem:[#allocation152_spill] sm:$0xff] %v4347_v47  ;;  %v1518_v34 = vpop.permute.xlu0 %1517 }
 0x5c5   : > { %v1560_v44 = vpop.permute.xlu1 %1559  ;;  %v1521_v35 = vsel %vm636_vm6, %v1516_v9, %v1518_v34  ;;  %v1522_v12 = vsel %vm636_vm6, %v1518_v34, %v1520_v62  ;;  %v1040_v21 = vadd.f32 %v4203_v41, %v1017_v63  ;;  %v1549_v62 = vadd.f32 %v3816_v46, %v1528_v48 }
 0x5c6   : > { %v1526_v7 = vadd.f32 %v1521_v35, %v3446_v18  ;;  %v1527_v5 = vadd.f32 %v1522_v12, %v3448_v19  ;;  %2313 = vrot.lane.b32.xlu0 %v2306_v61, %s3099_s17  ;;  %v2040_v19 = vmul.f32 %v2038_v1, %v3364_v31  ;;  %v1586_v1 = vsel %vm677_vm7, %v3826_v26, %v3753_v24 }
 0x5c7   : > { %2049 = vrot.lane.b32.xlu1 %v2041_v45, %s3100_s21  ;;  %v1587_v26 = vsel %vm677_vm7, %v3753_v24, %v3835_v4  ;;  %v1061_v61 = vadd.f32 %v3695_v36, %v1040_v21  ;;  %v1372_v45 = vadd.f32 %v3697_v2, %v1351_v6  ;;  %v2349_v35 = vmul.f32 %v2348_v33, %v3367_v32  ;;  %v5301_v2 = vld [vmem:[#allocation63_spill] sm:$0xff] }
 0x5c8   : > { %v1562_v16 = vpop.permute.xlu0 %1561  ;;  %v1547_v9 = vadd.f32 %v1542_v20, %v1526_v7  ;;  %v1548_v18 = vadd.f32 %v1543_v56, %v1527_v5  ;;  %v2658_v7 = vstv %s4380_s15  ;;  %v1630_v20 = vsel %vm718_vm8, %v5301_v2, %v3764_v17 }
 0x5c9   : > { %v1564_v37 = vpop.permute.xlu1 %1563  ;;  %v1565_v52 = vsel %vm677_vm7, %v1560_v44, %v1562_v16  ;;  %v1084_v24 = vadd.f32 %v4217_v59, %v1061_v61  ;;  %v1395_v46 = vadd.f32 %v4314_v0, %v1372_v45  ;;  %v2660_v21 = vmul.f32 %v2658_v7, %v3364_v31  ;;  %v5309_v61 = vld [vmem:[#allocation53_spill] sm:$0xff] }
 0x5ca   : > { %v1566_v39 = vsel %vm677_vm7, %v1562_v16, %v1564_v37  ;;  %v1570_v38 = vadd.f32 %v1565_v52, %v1547_v9  ;;  %2047 = vrot.lane.b32.xlu0 %v2040_v19, %s3100_s21  ;;  %v1572_v12 = vadd.f32 %v1564_v37, %v1549_v62  ;;  %v2659_v9 = vmul.f32 %v2658_v7, %v3367_v32  ;;  %v5302_v19 = vld [vmem:[#allocation50_spill] sm:$0xff]  ;;  %v5303_v52 = vld [vmem:[#allocation65_spill] sm:$0xff] }
 0x5cb   : > { %v1571_v55 = vadd.f32 %v1566_v39, %v1548_v18  ;;  %2621 = vrot.lane.b32.xlu1 %v2615_v40, %s3099_s17  ;;  %v2351_v18 = vmul.f32 %v2348_v33, %v3812_v58  ;;  %v1105_v40 = vadd.f32 %v5302_v19, %v1084_v24  ;;  %v1416_v63 = vadd.f32 %v3713_v15, %v1395_v46 }
 0x5cc   : > { %v1606_v30 = vpop.permute.xlu0 %1605  ;;  %v1591_v23 = vadd.f32 %v1586_v1, %v1570_v38  ;;  %v1593_v0 = vadd.f32 %v3835_v4, %v1572_v12  ;;  %v1631_v39 = vsel %vm718_vm8, %v3764_v17, %v5303_v52  ;;  %v2661_v38 = vmul.f32 %v2658_v7, %v3812_v58  ;;  %v4439_v17 = vld [vmem:[%s5057_s3] sm:$0x7f] }
 0x5cd   : > { %v1604_v22 = vpop.permute.xlu1 %1603  ;;  %v1592_v3 = vadd.f32 %v1587_v26, %v1571_v55  ;;  %v1802_v4 = vstv %s4401_s14  ;;  %v5304_v55 = vld [vmem:[#allocation151_spill] sm:$0xff]  ;;  %v1439_v48 = vadd.f32 %v4341_v51, %v1416_v63  ;;  %5305 = vst [vmem:[#allocation63_spill] sm:$0xff] %v4439_v17  ;;  %v4445_v51 = vld [vmem:[%s5057_s3 + $0x8] sm:$0x7f] }
 0x5ce   : > { %v1609_v34 = vsel %vm718_vm8, %v1604_v22, %v1606_v30  ;;  %2623 = vrot.lane.b32.xlu0 %v2616_v8, %s3099_s17  ;;  %v1128_v1 = vadd.f32 %v5304_v55, %v1105_v40  ;;  %5306 = vst [vmem:[#allocation50_spill] sm:$0xff] %v4445_v51  ;;  %v2701_v22 = vrot.slane %v4445_v51, 6 }
 0x5cf   : > { %v1614_v44 = vadd.f32 %v1609_v34, %v1591_v23  ;;  %2625 = vrot.lane.b32.xlu1 %v2617_v10, %s3099_s17  ;;  %s4412_s17 = sld [smem:[#allocation2 + $0x35]]  ;;  %v2700_v23 = vrot.slane %v4439_v17, 6  ;;  %v5307_v34 = vld [vmem:[#allocation55_spill] sm:$0xff] }
 0x5d0   : > { %v1650_v49 = vpop.permute.xlu0 %1649  ;;  %v1149_v45 = vadd.f32 %v5309_v61, %v1128_v1 }
 0x5d1   : > { %v1608_v60 = vpop.permute.xlu1 %1607  ;;  %v1635_v28 = vadd.f32 %v1630_v20, %v1614_v44  ;;  %v5308_v44 = vld [vmem:[#allocation67_spill] sm:$0xff] }
 0x5d2   : > { %v1610_v54 = vsel %vm718_vm8, %v1606_v30, %v1608_v60  ;;  %2357 = vrot.lane.b32.xlu0 %v2350_v29, %s3100_s21  ;;  %v1616_v57 = vadd.f32 %v1608_v60, %v1593_v0  ;;  %v1674_v26 = vsel %vm759_vm9, %v5308_v44, %v5307_v34  ;;  %v1805_v29 = vmul.f32 %v1802_v4, %v3812_v58 }
 0x5d3   : > { %v1615_v5 = vadd.f32 %v1610_v54, %v1592_v3  ;;  %2355 = vrot.lane.b32.xlu1 %v2349_v35, %s3100_s21 }
 0x5d4   : > { %v1694_v56 = vpop.permute.xlu0 %1693  ;;  %v1637_v62 = vadd.f32 %v5303_v52, %v1616_v57  ;;  %v5314_v57 = vld [vmem:[#allocation56_spill] sm:$0xff] }
 0x5d5   : > { %v1648_v16 = vpop.permute.xlu1 %1647  ;;  %v1636_v15 = vadd.f32 %v1631_v39, %v1615_v5  ;;  %v1809_v10 = vstv %s4412_s17  ;;  %v5311_v5 = vld [vmem:[#allocation69_spill] sm:$0xff] }
 0x5d6   : > { %v1653_v37 = vsel %vm759_vm9, %v1648_v16, %v1650_v49  ;;  %2665 = vrot.lane.b32.xlu0 %v2659_v9, %s3100_s21  ;;  %v1812_v24 = vmul.f32 %v1809_v10, %v3285_v43  ;;  %v1675_v2 = vsel %vm759_vm9, %v5307_v34, %v5311_v5 }
 0x5d7   : > { %v1658_v13 = vadd.f32 %v1653_v37, %v1635_v28  ;;  %2359 = vrot.lane.b32.xlu1 %v2351_v18, %s3100_s21  ;;  %v5312_v28 = vld [vmem:[#allocation7_spill] sm:$0xff]  ;;  %v5313_v37 = vld [vmem:[#allocation6_spill] sm:$0xff] }
 0x5d8   : > { %v1738_v8 = vpop.permute.xlu0 %1737  ;;  %v1815_v20 = vadd.f32 %v1812_v24, %v1805_v29  ;;  %v1164_v40 = vmul.f32 %v5313_v37, %v1149_v45  ;;  %v1804_v29 = vmul.f32 %v1802_v4, %v3364_v31 }
 0x5d9   : > { %v1652_v33 = vpop.permute.xlu1 %1651  ;;  %v1679_v35 = vadd.f32 %v1674_v26, %v1658_v13 }
 0x5da   : > { %v1654_v6 = vsel %vm759_vm9, %v1650_v49, %v1652_v33  ;;  %2669 = vrot.lane.b32.xlu0 %v2661_v38, %s3100_s21  ;;  %v5310_v49 = vld [vmem:[#allocation54_spill] sm:$0xff]  ;;  %v1660_v54 = vadd.f32 %v1652_v33, %v1637_v62  ;;  %v5315_v38 = vld [vmem:[#allocation71_spill] sm:$0xff]  ;;  %v1803_v62 = vmul.f32 %v1802_v4, %v3367_v32 }
 0x5db   : > { %v1659_v30 = vadd.f32 %v1654_v6, %v1636_v15  ;;  %2667 = vrot.lane.b32.xlu1 %v2660_v21, %s3100_s21  ;;  %v1460_v3 = vadd.f32 %v5310_v49, %v1439_v48  ;;  %s3101_s21 = smov 6   ;;  %v1718_v1 = vsel %vm800_vm10, %v5315_v38, %v5314_v57 }
 0x5dc   : > { %v1826_v60 = vpop.permute.xlu0 %1825  ;;  %v1681_v13 = vadd.f32 %v5311_v5, %v1660_v54 }
 0x5dd   : > { %v1692_v12 = vpop.permute.xlu1 %1691  ;;  %v1473_v16 = vmul.f32 %v5312_v28, %v1460_v3  ;;  %v1680_v18 = vadd.f32 %v1675_v2, %v1659_v30 }
 0x5de   : > { %v1697_v7 = vsel %vm800_vm10, %v1692_v12, %v1694_v56  ;;  %2702 = vrot.lane.b32.xlu0 %v2700_v23, %s3101_s21  ;;  %v5317_v23 = vld [vmem:[#allocation73_spill] sm:$0xff]  ;;  %v5318_v12 = vld [vmem:[#allocation16_spill] sm:$0xff] }
 0x5df   : > { %v1702_v46 = vadd.f32 %v1697_v7, %v1679_v35  ;;  %2704 = vrot.lane.b32.xlu1 %v2701_v22, %s3101_s21  ;;  %v1810_v54 = vmul.f32 %v1809_v10, %v5318_v12  ;;  %v5319_v7 = vld [vmem:[#allocation15_spill] sm:$0xff] }
 0x5e0   : > { %v1830_v9 = vpop.permute.xlu0 %1829  ;;  %v1811_v24 = vmul.f32 %v1809_v10, %v5319_v7 }
 0x5e1   : > { %v1696_v0 = vpop.permute.xlu1 %1695  ;;  %v4463_v63 = vadd.f32 %v1830_v9, %v1815_v20  ;;  %v1723_v33 = vadd.f32 %v1718_v1, %v1702_v46  ;;  %v5320_v46 = vld [vmem:[#allocation77_spill] sm:$0xff]  ;;  %v1813_v20 = vadd.f32 %v1810_v54, %v1803_v62  ;;  %v5324_v1 = vld [vmem:[#allocation60_spill] sm:$0xff]  ;;  %v5327_v62 = vld [vmem:[#allocation62_spill] sm:$0xff] }
 0x5e2   : > { %v1698_v52 = vsel %vm800_vm10, %v1694_v56, %v1696_v0  ;;  %1481 = vrot.lane.b32.xlu0 %v1473_v16, %s3102_s24  ;;  %v1704_v48 = vadd.f32 %v1696_v0, %v1681_v13  ;;  %v1719_v56 = vsel %vm800_vm10, %v5314_v57, %v5317_v23  ;;  %v1814_v16 = vadd.f32 %v1811_v24, %v1804_v29  ;;  %v5321_v0 = vld [vmem:[#allocation10_spill] sm:$0xff]  ;;  %v5323_v57 = vld [vmem:[#allocation59_spill] sm:$0xff] }
 0x5e3   : > { %v1703_v39 = vadd.f32 %v1698_v52, %v1680_v18  ;;  %1172 = vrot.lane.b32.xlu1 %v1164_v40, %s3092_s27 }
 0x5e4   : > { %v1870_v15 = vpop.permute.xlu0 %1869  ;;  %v1725_v22 = vadd.f32 %v5317_v23, %v1704_v48 }
 0x5e5   : > { %v1736_v21 = vpop.permute.xlu1 %1735  ;;  %v1724_v44 = vadd.f32 %v1719_v56, %v1703_v39  ;;  %v5322_v39 = vld [vmem:[#allocation79_spill] sm:$0xff] }
 0x5e6   : > { %v1741_v6 = vsel %vm282_vm2, %v1736_v21, %v1738_v8  ;;  %v1852_v38 = vsel %vm636_vm6, %v5323_v57, %v5322_v39  ;;  %v1853_v10 = vsel %vm636_vm6, %v5322_v39, %v5324_v1 }
 0x5e7   : > { %v4473_v30 = vadd.f32 %v1741_v6, %v1723_v33 }
 0x5e8   : > { %v4479_v34 = vpop.permute.xlu0 %1873 }
 0x5e9   : > { %5316 = vst [vmem:[#allocation65_spill] sm:$0xff] %v4473_v30  ;;  %v1740_v26 = vpop.permute.xlu1 %1739 }
 0x5ea   : > { %v1742_v45 = vsel %vm282_vm2, %v1738_v8, %v1740_v26  ;;  %v1748_v3 = vadd.f32 %v1740_v26, %v1725_v22  ;;  %v5325_v22 = vld [vmem:[#allocation81_spill] sm:$0xff] }
 0x5eb   : > { %v4484_v35 = vadd.f32 %v1742_v45, %v1724_v44  ;;  %v5326_v44 = vld [vmem:[#allocation61_spill] sm:$0xff]  ;;  %v1897_v29 = vsel %vm677_vm7, %v5325_v22, %v5327_v62 }
 0x5ec   : > { %v1769_v5 = vadd.f32 %v5320_v46, %v1748_v3  ;;  %v1914_v2 = vpop.permute.xlu0 %1913  ;;  %v1896_v26 = vsel %vm677_vm7, %v5326_v44, %v5325_v22 }
 0x5ed   : > { %v1828_v18 = vpop.permute.xlu1 %1827 }
 0x5ee   : > { %v1783_v40 = vmul.f32 %v5321_v0, %v1769_v5  ;;  %v1831_v13 = vsel %vm636_vm6, %v1826_v60, %v1828_v18  ;;  %v1832_v4 = vsel %vm636_vm6, %v1828_v18, %v1830_v9  ;;  %v5328_v18 = vld [vmem:[#allocation83_spill] sm:$0xff] }
 0x5ef   : > { %v1836_v8 = vadd.f32 %v1831_v13, %v1813_v20  ;;  %v1837_v52 = vadd.f32 %v1832_v4, %v1814_v16  ;;  %v5330_v4 = vld [vmem:[#allocation66_spill] sm:$0xff] }
 0x5f0   : > { %1791 = vrot.lane.b32.xlu1 %v1783_v40, %s3103_s25  ;;  %v4499_v48 = vpop.permute.xlu0 %1917  ;;  %v5329_v40 = vld [vmem:[#allocation64_spill] sm:$0xff] }
 0x5f1   : > { %v1857_v33 = vadd.f32 %v1852_v38, %v1836_v8  ;;  %v1858_v21 = vadd.f32 %v1853_v10, %v1837_v52  ;;  %v1872_v60 = vpop.permute.xlu1 %1871  ;;  %v1940_v13 = vsel %vm718_vm8, %v5329_v40, %v5328_v18  ;;  %v1941_v8 = vsel %vm718_vm8, %v5328_v18, %v5330_v4 }
 0x5f2   : > { %v1875_v9 = vsel %vm677_vm7, %v1870_v15, %v1872_v60  ;;  %v1876_v6 = vsel %vm677_vm7, %v1872_v60, %v4479_v34  ;;  %v5331_v60 = vld [vmem:[#allocation85_spill] sm:$0xff] }
 0x5f3   : > { %v1880_v23 = vadd.f32 %v1875_v9, %v1857_v33  ;;  %v1881_v56 = vadd.f32 %v1876_v6, %v1858_v21  ;;  %v5332_v9 = vld [vmem:[#allocation68_spill] sm:$0xff] }
 0x5f4   : > { %v1958_v45 = vpop.permute.xlu0 %1957  ;;  %v1984_v6 = vsel %vm759_vm9, %v5332_v9, %v5331_v60 }
 0x5f5   : > { %v1901_v3 = vadd.f32 %v1896_v26, %v1880_v23  ;;  %v1902_v54 = vadd.f32 %v1897_v29, %v1881_v56  ;;  %v1916_v24 = vpop.permute.xlu1 %1915  ;;  %v4528_v26 = vstv %s2927_s28 }
 0x5f6   : > { %v1919_v5 = vsel %vm718_vm8, %v1914_v2, %v1916_v24  ;;  %v1920_v15 = vsel %vm718_vm8, %v1916_v24, %v4499_v48 }
 0x5f7   : > { %v1924_v20 = vadd.f32 %v1919_v5, %v1901_v3  ;;  %v1925_v16 = vadd.f32 %v1920_v15, %v1902_v54  ;;  %v5334_v3 = vld [vmem:[#allocation70_spill] sm:$0xff]  ;;  %v4535_v54 = vstv %s2928_s29 }
 0x5f8   : > { %v4519_v52 = vpop.permute.xlu0 %1961  ;;  %v2120_v40 = vmul.f32 %v4535_v54, %v5318_v12 }
 0x5f9   : > { %v1945_v39 = vadd.f32 %v1940_v13, %v1924_v20  ;;  %v1946_v57 = vadd.f32 %v1941_v8, %v1925_v16  ;;  %v1960_v2 = vpop.permute.xlu1 %1959  ;;  %v2113_v20 = vmul.f32 %v4528_v26, %v3367_v32 }
 0x5fa   : > { %v1963_v38 = vsel %vm759_vm9, %v1958_v45, %v1960_v2  ;;  %v1964_v10 = vsel %vm759_vm9, %v1960_v2, %v4519_v52  ;;  %v1985_v45 = vsel %vm759_vm9, %v5331_v60, %v5334_v3 }
 0x5fb   : > { %v1968_v33 = vadd.f32 %v1963_v38, %v1945_v39  ;;  %v1969_v21 = vadd.f32 %v1964_v10, %v1946_v57  ;;  %v2123_v13 = vadd.f32 %v2120_v40, %v2113_v20  ;;  %v5337_v20 = vld [vmem:[#allocation89_spill] sm:$0xff] }
 0x5fc   : > { %v2002_v23 = vpop.permute.xlu0 %2001 }
 0x5fd   : > { %v1989_v56 = vadd.f32 %v1984_v6, %v1968_v33  ;;  %v2004_v22 = vpop.permute.xlu1 %2003  ;;  %v1990_v5 = vadd.f32 %v1985_v45, %v1969_v21  ;;  %v2422_v33 = vstv %s2941_s19  ;;  %v4553_v21 = vstv %s2942_s26 }
 0x5fe   : > { %v2007_v44 = vsel %vm800_vm10, %v2002_v23, %v2004_v22  ;;  %v2424_v6 = vmul.f32 %v2422_v33, %v3364_v31  ;;  %v2431_v23 = vmul.f32 %v4553_v21, %v5319_v7 }
 0x5ff   : > { %v4530_v29 = vadd.f32 %v2007_v44, %v1989_v56 }
 0x600   : > { %v4537_v24 = vpop.permute.xlu0 %2005  ;;  %v2434_v56 = vadd.f32 %v2431_v23, %v2424_v6  ;;  %v5340_v6 = vld [vmem:[#allocation140_spill] sm:$0xff] }
 0x601   : > { %5333 = vst [vmem:[#allocation151_spill] sm:$0xff] %v4530_v29  ;;  %v4539_v15 = vpop.permute.xlu1 %2137  ;;  %v2008_v16 = vsel %vm800_vm10, %v2004_v22, %v4537_v24  ;;  %v902_v23 = vsel %vm636_vm6, %v5340_v6, %v4155_v11  ;;  %v5344_v11 = vld [vmem:[#allocation142_spill] sm:$0xff]  ;;  %v5349_v29 = vld [vmem:[#allocation143_spill] sm:$0xff] }
 0x602   : > { %v4545_v18 = vadd.f32 %v2008_v16, %v1990_v5  ;;  %v5338_v16 = vld [vmem:[#allocation76_spill] sm:$0xff] }
 0x603   : > { %v2162_v40 = vsel %vm636_vm6, %v5338_v16, %v5337_v20  ;;  %v5343_v16 = vld [vmem:[#allocation34_spill] sm:$0xff] }
 0x604   : > { %5335 = vst [vmem:[#allocation55_spill] sm:$0xff] %v4545_v18  ;;  %v2136_v8 = vpop.permute.xlu0 %2135 }
 0x605   : > { %v4549_v39 = vpop.permute.xlu1 %2447  ;;  %v2141_v57 = vsel %vm636_vm6, %v2136_v8, %v4539_v15 }
 0x606   : > { %v2146_v2 = vadd.f32 %v2141_v57, %v2123_v13 }
 0x608   : > { %v2140_v38 = vpop.permute.xlu0 %2139  ;;  %v2167_v8 = vadd.f32 %v2162_v40, %v2146_v2  ;;  %v923_v2 = vsel %vm636_vm6, %v5343_v16, %v3642_v27 }
 0x609   : > { %v2180_v10 = vpop.permute.xlu1 %2179 }
 0x60c   : > { %v4555_v60 = vpop.permute.xlu0 %2445 }
 0x60d   : > { %v4557_v9 = vpop.permute.xlu1 %2183 }
 0x610   : > { %v4562_v22 = vpop.permute.xlu0 %2449 }
 0x611   : > { %v4564_v44 = vpop.permute.xlu1 %2491  ;;  %v2452_v45 = vsel %vm636_vm6, %v4549_v39, %v4562_v22 }
 0x612   : > { %v4569_v5 = vadd.f32 %v2452_v45, %v2434_v56  ;;  %v5342_v56 = vld [vmem:[#allocation20_spill] sm:$0xff] }
 0x613   : > { %v907_v45 = vadd.f32 %v902_v23, %v5342_v56 }
 0x614   : > { %5336 = vst [vmem:[#allocation67_spill] sm:$0xff] %v4569_v5  ;;  %v4574_v13 = vpop.permute.xlu0 %2181  ;;  %v2423_v5 = vmul.f32 %v2422_v33, %v3367_v32 }
 0x615   : > { %v4576_v57 = vpop.permute.xlu1 %2223  ;;  %v2185_v17 = vsel %vm677_vm7, %v2180_v10, %v4574_v13  ;;  %v928_v40 = vadd.f32 %v923_v2, %v907_v45  ;;  %v1859_v10 = vadd.f32 %v5324_v1, %v4463_v63  ;;  %v5347_v2 = vld [vmem:[#allocation36_spill] sm:$0xff]  ;;  %v990_v63 = vsel %vm718_vm8, %v5349_v29, %v4187_v50 }
 0x616   : > { %5339 = vst [vmem:[#allocation53_spill] sm:$0xff] %v4576_v57  ;;  %v4583_v51 = vadd.f32 %v2185_v17, %v2167_v8  ;;  %v946_v17 = vsel %vm677_vm7, %v5344_v11, %v4171_v25  ;;  %v5345_v8 = vld [vmem:[#allocation138_spill] sm:$0xff]  ;;  %v5348_v57 = vld [vmem:[#allocation19_spill] sm:$0xff]  ;;  %v2115_v1 = vmul.f32 %v4528_v26, %v3812_v58  ;;  %v2114_v50 = vmul.f32 %v4528_v26, %v3364_v31 }
 0x617   : > { %v901_v23 = vsel %vm636_vm6, %v5345_v8, %v5340_v6  ;;  %v951_v56 = vadd.f32 %v946_v17, %v928_v40  ;;  %v1882_v45 = vadd.f32 %v4479_v34, %v1859_v10  ;;  %v2122_v10 = vmul.f32 %v4535_v54, %v3285_v43  ;;  %v5352_v26 = vld [vmem:[#allocation38_spill] sm:$0xff]  ;;  %v5380_v31 = vld [vmem:[#allocation87_spill] sm:$0xff] }
 0x618   : > { %5341 = vst [vmem:[#allocation69_spill] sm:$0xff] %v4583_v51  ;;  %v4586_v30 = vpop.permute.xlu0 %2489  ;;  %v967_v51 = vsel %vm677_vm7, %v5347_v2, %v3660_v14  ;;  %v906_v25 = vadd.f32 %v901_v23, %v5348_v57  ;;  %v5350_v14 = vld [vmem:[#allocation45_spill] sm:$0xff] }
 0x619   : > { %v4588_v18 = vpop.permute.xlu1 %2227  ;;  %v972_v6 = vadd.f32 %v967_v51, %v951_v56  ;;  %v1903_v34 = vadd.f32 %v5327_v62, %v1882_v45  ;;  %v922_v57 = vsel %vm636_vm6, %v5350_v14, %v5343_v16  ;;  %v2125_v56 = vadd.f32 %v2122_v10, %v2115_v1 }
 0x61a   : > { %v927_v23 = vadd.f32 %v922_v57, %v906_v25  ;;  %v2121_v45 = vmul.f32 %v4535_v54, %v5319_v7  ;;  %v1011_v25 = vsel %vm718_vm8, %v5352_v26, %v3678_v42  ;;  %v5354_v54 = vld [vmem:[#allocation5_spill] sm:$0xff]  ;;  %v2425_v14 = vmul.f32 %v2422_v33, %v3812_v58  ;;  %v5379_v7 = vld [vmem:[#allocation74_spill] sm:$0xff] }
 0x61b   : > { %v995_v8 = vadd.f32 %v990_v63, %v972_v6  ;;  %v1926_v51 = vadd.f32 %v4499_v48, %v1903_v34  ;;  %v5353_v48 = vld [vmem:[#allocation145_spill] sm:$0xff]  ;;  %v4653_v6 = vsel %vm276_vm1, %v5354_v54, %v5313_v37  ;;  %v2432_v58 = vmul.f32 %v4553_v21, %v3285_v43 }
 0x61c   : > { %v4593_v28 = vpop.permute.xlu0 %2493  ;;  %v1034_v1 = vsel %vm759_vm9, %v5353_v48, %v4203_v41  ;;  %v2124_v10 = vadd.f32 %v2121_v45, %v2114_v50  ;;  %v5355_v57 = vld [vmem:[#allocation9_spill] sm:$0xff]  ;;  %vm1793_vm1 = vcmask 1022976  }
 0x61d   : > { %v4595_v47 = vpop.permute.xlu1 %2535  ;;  %v1016_v34 = vadd.f32 %v1011_v25, %v995_v8  ;;  %v4659_v42 = vsel %vm1776_vm11, %v5355_v57, %v5321_v0  ;;  %v1947_v41 = vadd.f32 %v5330_v4, %v1926_v51  ;;  %v2451_v51 = vsel %vm636_vm6, %v4555_v60, %v4549_v39  ;;  %v5360_v25 = vld [vmem:[#allocation46_spill] sm:$0xff]  ;;  %v5383_v57 = vld [vmem:[#allocation97_spill] sm:$0xff] }
 0x61e   : > { %v5363_v60 = vld [vmem:[#allocation146_spill] sm:$0xff] }
 0x61f   : > { %v1039_v8 = vadd.f32 %v1034_v1, %v1016_v34  ;;  %v966_v1 = vsel %vm677_vm7, %v5360_v25, %v5347_v2  ;;  %v2186_v2 = vsel %vm677_vm7, %v4574_v13, %v4557_v9 }
 0x620   : > { %v4605_v49 = vpop.permute.xlu0 %2225 }
 0x621   : > { %v4607_v27 = vpop.permute.xlu1 %2267 }
 0x622   : > { %5346 = vst [vmem:[#allocation6_spill] sm:$0xff] %v4607_v27  ;;  %v5351_v27 = vld [vmem:[#allocation141_spill] sm:$0xff] }
 0x623   : > { %v945_v62 = vsel %vm677_vm7, %v5351_v27, %v5344_v11  ;;  %v2142_v11 = vsel %vm636_vm6, %v4539_v15, %v2140_v38  ;;  %v2148_v27 = vadd.f32 %v2140_v38, %v2125_v56  ;;  %v2430_v15 = vmul.f32 %v4553_v21, %v5318_v12  ;;  %v5356_v38 = vld [vmem:[#allocation14_spill] sm:$0xff]  ;;  %v5357_v56 = vld [vmem:[#allocation13_spill] sm:$0xff]  ;;  %v5362_v21 = vld [vmem:[#allocation40_spill] sm:$0xff] }
 0x624   : > { %v4619_v40 = vpop.permute.xlu0 %2533  ;;  %v950_v32 = vadd.f32 %v945_v62, %v927_v23  ;;  %v4667_v37 = vsel %vm2396_vm12, %v5357_v56, %v5356_v38  ;;  %v2147_v50 = vadd.f32 %v2142_v11, %v2124_v10  ;;  %v1970_v23 = vadd.f32 %v4519_v52, %v1947_v41  ;;  %v5359_v62 = vld [vmem:[#allocation78_spill] sm:$0xff]  ;;  %v5361_v11 = vld [vmem:[#allocation47_spill] sm:$0xff] }
 0x625   : > { %v4621_v17 = vpop.permute.xlu1 %2271  ;;  %5358 = vst [vmem:[#allocation56_spill] sm:$0xff] %v4667_v37  ;;  %v2433_v4 = vadd.f32 %v2430_v15, %v2423_v5  ;;  %v2169_v45 = vadd.f32 %v5359_v62, %v2148_v27  ;;  %v1010_v43 = vsel %vm718_vm8, %v5361_v11, %v5352_v26  ;;  %v1055_v34 = vsel %vm759_vm9, %v5362_v21, %v3695_v36  ;;  %v5364_v26 = vld [vmem:[#allocation144_spill] sm:$0xff]  ;;  %v5382_v56 = vld [vmem:[#allocation86_spill] sm:$0xff] }
 0x626   : > { %v2435_v52 = vadd.f32 %v2432_v58, %v2425_v14  ;;  %v2163_v5 = vsel %vm636_vm6, %v5337_v20, %v5359_v62  ;;  %v971_v39 = vadd.f32 %v966_v1, %v950_v32  ;;  %v1078_v27 = vsel %vm800_vm10, %v5363_v60, %v4217_v59  ;;  %v5365_v32 = vld [vmem:[#allocation48_spill] sm:$0xff]  ;;  %v5366_v59 = vld [vmem:[#allocation42_spill] sm:$0xff]  ;;  %v5367_v62 = vld [vmem:[#allocation49_spill] sm:$0xff] }
 0x627   : > { %v989_v10 = vsel %vm718_vm8, %v5364_v26, %v5349_v29  ;;  %v1060_v41 = vadd.f32 %v1055_v34, %v1039_v8  ;;  %v2456_v36 = vadd.f32 %v2451_v51, %v2433_v4  ;;  %v2168_v14 = vadd.f32 %v2163_v5, %v2147_v50  ;;  %v5368_v50 = vld [vmem:[#allocation80_spill] sm:$0xff]  ;;  %v5369_v4 = vld [vmem:[#allocation91_spill] sm:$0xff] }
 0x628   : > { %v4638_v16 = vpop.permute.xlu0 %2537  ;;  %v1054_v20 = vsel %vm759_vm9, %v5365_v32, %v5362_v21  ;;  %v4711_v25 = vsel %vm800_vm10, %v5367_v62, %v5366_v59  ;;  %v1991_v13 = vadd.f32 %v5334_v3, %v1970_v23  ;;  %v2192_v29 = vadd.f32 %v4557_v9, %v2169_v45  ;;  %v5370_v9 = vld [vmem:[#allocation44_spill] sm:$0xff] }
 0x629   : > { %v4640_v63 = vpop.permute.xlu1 %2579  ;;  %v1099_v8 = vsel %vm800_vm10, %v5366_v59, %v5302_v19  ;;  %v2472_v51 = vsel %vm636_vm6, %v5369_v4, %v5368_v50  ;;  %v1083_v1 = vadd.f32 %v1078_v27, %v1060_v41  ;;  %v2191_v11 = vadd.f32 %v2186_v2, %v2168_v14  ;;  %v5371_v19 = vld [vmem:[#allocation57_spill] sm:$0xff]  ;;  %v5372_v45 = vld [vmem:[#allocation52_spill] sm:$0xff]  ;;  %v5373_v27 = vld [vmem:[#allocation58_spill] sm:$0xff] }
 0x62a   : > { %v994_v21 = vadd.f32 %v989_v10, %v971_v39  ;;  %v2014_v34 = vadd.f32 %v4537_v24, %v1991_v13  ;;  %v2458_v5 = vadd.f32 %v4562_v22, %v2435_v52  ;;  %v2495_v3 = vsel %vm677_vm7, %v4586_v30, %v4564_v44  ;;  %v5374_v52 = vld [vmem:[#allocation84_spill] sm:$0xff]  ;;  %v5375_v10 = vld [vmem:[#allocation95_spill] sm:$0xff] }
 0x62b   : > { %v1143_v23 = vsel %vm282_vm2, %v5370_v9, %v5309_v61  ;;  %v1453_v26 = vsel %vm282_vm2, %v5372_v45, %v5371_v19  ;;  %v1763_v39 = vsel %vm282_vm2, %v5373_v27, %v5320_v46  ;;  %v2477_v2 = vadd.f32 %v2472_v51, %v2456_v36  ;;  %v5376_v41 = vld [vmem:[#allocation148_spill] sm:$0xff]  ;;  %v5377_v46 = vld [vmem:[#allocation147_spill] sm:$0xff]  ;;  %v5378_v45 = vld [vmem:[#allocation93_spill] sm:$0xff] }
 0x62c   : > { %v4671_v33 = vpop.permute.xlu0 %2269  ;;  %v2207_v30 = vsel %vm677_vm7, %v5375_v10, %v5374_v52  ;;  %v1122_v61 = vsel %vm282_vm2, %v5376_v41, %v5304_v55  ;;  %v2213_v14 = vadd.f32 %v5374_v52, %v2192_v29  ;;  %v2230_v32 = vsel %vm718_vm8, %v4605_v49, %v4588_v18  ;;  %v5381_v29 = vld [vmem:[#allocation72_spill] sm:$0xff] }
 0x62d   : > { %v4673_v0 = vpop.permute.xlu1 %2311  ;;  %v1033_v36 = vsel %vm759_vm9, %v5377_v46, %v5353_v48  ;;  %v1104_v59 = vadd.f32 %v1099_v8, %v1083_v1  ;;  %v2500_v62 = vadd.f32 %v2495_v3, %v2477_v2  ;;  %v2212_v13 = vadd.f32 %v2207_v30, %v2191_v11  ;;  %v5385_v3 = vld [vmem:[#allocation99_spill] sm:$0xff] }
 0x62e   : > { %v1015_v4 = vadd.f32 %v1010_v43, %v994_v21  ;;  %v2236_v51 = vadd.f32 %v4588_v18, %v2213_v14  ;;  %v2479_v12 = vadd.f32 %v5378_v45, %v2458_v5  ;;  %v2035_v55 = vadd.f32 %v5379_v7, %v2014_v34 }
 0x62f   : > { %v2028_v52 = vsel %vm800_vm10, %v5381_v29, %v5380_v31  ;;  %v2516_v27 = vsel %vm677_vm7, %v5383_v57, %v5382_v56  ;;  %v1127_v37 = vadd.f32 %v1122_v61, %v1104_v59  ;;  %v2235_v48 = vadd.f32 %v2230_v32, %v2212_v13  ;;  %v5384_v57 = vld [vmem:[#allocation82_spill] sm:$0xff]  ;;  %v5387_v61 = vld [vmem:[#allocation101_spill] sm:$0xff] }
 0x630   : > { %v4701_v15 = vpop.permute.xlu0 %2577  ;;  %v1038_v43 = vadd.f32 %v1033_v36, %v1015_v4  ;;  %v2502_v18 = vadd.f32 %v4593_v28, %v2479_v12  ;;  %v2539_v11 = vsel %vm718_vm8, %v4619_v40, %v4595_v47  ;;  %v2473_v34 = vsel %vm636_vm6, %v5368_v50, %v5378_v45  ;;  %v5386_v12 = vld [vmem:[#allocation90_spill] sm:$0xff]  ;;  %v5388_v50 = vld [vmem:[#allocation119_spill] sm:$0xff]  ;;  %v5389_v36 = vld [vmem:[#allocation149_spill] sm:$0xff] }
 0x631   : > { %v4703_v58 = vpop.permute.xlu1 %2315  ;;  %v2206_v5 = vsel %vm677_vm7, %v5384_v57, %v5375_v10  ;;  %v2517_v2 = vsel %vm677_vm7, %v5382_v56, %v5385_v3  ;;  %v2521_v30 = vadd.f32 %v2516_v27, %v2500_v62  ;;  %v2251_v14 = vsel %vm718_vm8, %v5387_v61, %v5386_v12  ;;  %v5391_v57 = vld [vmem:[#allocation88_spill] sm:$0xff] }
 0x632   : > { %v2257_v40 = vadd.f32 %v5386_v12, %v2236_v51  ;;  %v2274_v32 = vsel %vm759_vm9, %v4671_v33, %v4621_v17  ;;  %v1077_v10 = vsel %vm800_vm10, %v5389_v36, %v5363_v60  ;;  %v1148_v59 = vadd.f32 %v1143_v23, %v1127_v37  ;;  %v5392_v12 = vld [vmem:[#allocation92_spill] sm:$0xff]  ;;  %v5395_v23 = vld [vmem:[#allocation107_spill] sm:$0xff] }
 0x633   : > { %v2544_v13 = vadd.f32 %v2539_v11, %v2521_v30  ;;  %v2256_v56 = vadd.f32 %v2251_v14, %v2235_v48  ;;  %v1059_v4 = vadd.f32 %v1054_v20, %v1038_v43  ;;  %v2523_v51 = vadd.f32 %v5385_v3, %v2502_v18  ;;  %v5394_v60 = vld [vmem:[#allocation96_spill] sm:$0xff]  ;;  %v5396_v20 = vld [vmem:[#allocation98_spill] sm:$0xff]  ;;  %v5397_v43 = vld [vmem:[#allocation109_spill] sm:$0xff] }
 0x634   : > { %v4735_v24 = vpop.permute.xlu0 %2581  ;;  %v2280_v45 = vadd.f32 %v4621_v17, %v2257_v40  ;;  %v2295_v48 = vsel %vm759_vm9, %v5395_v23, %v5394_v60  ;;  %v2604_v17 = vsel %vm759_vm9, %v5397_v43, %v5396_v20  ;;  %v2583_v30 = vsel %vm759_vm9, %v4701_v15, %v4640_v63 }
 0x635   : > { %v4737_v22 = vpop.permute.xlu1 %2045  ;;  %v2279_v11 = vadd.f32 %v2274_v32, %v2256_v56  ;;  %v1082_v18 = vadd.f32 %v1077_v10, %v1059_v4  ;;  %v2546_v3 = vadd.f32 %v4638_v16, %v2523_v51  ;;  %v2496_v14 = vsel %vm677_vm7, %v4564_v44, %v4593_v28  ;;  %v5398_v10 = vld [vmem:[#allocation67_spill] sm:$0xff] }
 0x636   : > { %v1768_v36 = vadd.f32 %v1763_v39, %v4484_v35  ;;  %v2478_v15 = vadd.f32 %v2473_v34, %v5398_v10  ;;  %v2301_v56 = vadd.f32 %v5394_v60, %v2280_v45  ;;  %v5399_v28 = vld [vmem:[#allocation151_spill] sm:$0xff]  ;;  %v5401_v34 = vld [vmem:[#allocation105_spill] sm:$0xff] }
 0x637   : > { %v2300_v4 = vadd.f32 %v2295_v48, %v2279_v11  ;;  %v2033_v44 = vadd.f32 %v2028_v52, %v5399_v28  ;;  %v1103_v45 = vadd.f32 %v4711_v25, %v1082_v18  ;;  %v5405_v25 = vld [vmem:[#allocation115_spill] sm:$0xff]  ;;  %v5406_v18 = vld [vmem:[#allocation100_spill] sm:$0xff] }
 0x638   : > { %v4761_v8 = vpop.permute.xlu0 %2313  ;;  %v2501_v51 = vadd.f32 %v2496_v14, %v2478_v15  ;;  %v2324_v39 = vadd.f32 %v4703_v58, %v2301_v56  ;;  %v5408_v14 = vld [vmem:[#allocation117_spill] sm:$0xff]  ;;  %v1782_v15 = vmul.f32 %v4659_v42, %v1768_v36 }
 0x639   : > { %v4763_v1 = vpop.permute.xlu1 %2049 }
 0x63a   : > { %v2058_v21 = vadd.f32 %v4763_v1, %v2035_v55  ;;  %v5390_v55 = vld [vmem:[#allocation12_spill] sm:$0xff]  ;;  %v2345_v56 = vadd.f32 %v5405_v25, %v2324_v39 }
 0x63c   : > { %v2079_v46 = vadd.f32 %v5388_v50, %v2058_v21  ;;  %v4790_v27 = vpop.permute.xlu0 %2047  ;;  %v2250_v21 = vsel %vm718_vm8, %v5391_v57, %v5387_v61  ;;  %v5393_v50 = vld [vmem:[#allocation103_spill] sm:$0xff]  ;;  %v1458_v61 = vadd.f32 %v1453_v26, %v4332_v53  ;;  %v2318_v53 = vsel %vm800_vm10, %v4761_v8, %v4703_v58  ;;  %v5403_v57 = vld [vmem:[#allocation69_spill] sm:$0xff] }
 0x63d   : > { %v2622_v62 = vpop.permute.xlu1 %2621  ;;  %v2560_v37 = vsel %vm718_vm8, %v5393_v50, %v5392_v12 }
 0x63e   : > { %v2093_v29 = vmul.f32 %v5390_v55, %v2079_v46  ;;  %v2565_v40 = vadd.f32 %v2560_v37, %v2544_v13  ;;  %v1163_v46 = vmul.f32 %v4653_v6, %v1148_v59  ;;  %v2051_v13 = vsel %vm282_vm2, %v4737_v22, %v4790_v27  ;;  %v5400_v6 = vld [vmem:[#allocation53_spill] sm:$0xff] }
 0x63f   : > { %v2229_v35 = vsel %vm718_vm8, %v5400_v6, %v4605_v49  ;;  %v2567_v59 = vadd.f32 %v5401_v34, %v2546_v3  ;;  %v2211_v37 = vadd.f32 %v2206_v5, %v5403_v57  ;;  %v2323_v22 = vadd.f32 %v2318_v53, %v2300_v4  ;;  %v5404_v49 = vld [vmem:[#allocation8_spill] sm:$0xff]  ;;  %v5409_v53 = vld [vmem:[#allocation6_spill] sm:$0xff]  ;;  %v5410_v6 = vld [vmem:[#allocation111_spill] sm:$0xff] }
 0x640   : > { %2101 = vrot.lane.b32.xlu0 %v2093_v29, %s3104_s6  ;;  %v4816_v32 = vpop.permute.xlu0 %2623  ;;  %v2588_v26 = vadd.f32 %v2583_v30, %v2565_v40  ;;  %v5402_v29 = vld [vmem:[#allocation150_spill] sm:$0xff]  ;;  %v1471_v11 = vmul.f32 %v5404_v49, %v1458_v61  ;;  %v2056_v43 = vadd.f32 %v2051_v13, %v2033_v44  ;;  %v2339_v30 = vsel %vm800_vm10, %v5406_v18, %v5405_v25  ;;  %v5417_v25 = vld [vmem:[#allocation11_spill] sm:$0xff] }
 0x641   : > { %v4818_v50 = vpop.permute.xlu1 %2625  ;;  %v1121_v52 = vsel %vm282_vm2, %v5402_v29, %v5376_v41  ;;  %v2590_v58 = vadd.f32 %v4735_v24, %v2567_v59  ;;  %v2627_v3 = vsel %vm800_vm10, %v2622_v62, %v4816_v32  ;;  %v5407_v41 = vld [vmem:[#allocation102_spill] sm:$0xff]  ;;  %v2234_v40 = vadd.f32 %v2229_v35, %v2211_v37  ;;  %v5413_v59 = vld [vmem:[#allocation104_spill] sm:$0xff] }
 0x642   : > { %v2072_v5 = vsel %vm282_vm2, %v5408_v14, %v5407_v41  ;;  %v1126_v10 = vadd.f32 %v1121_v52, %v1103_v45  ;;  %v2522_v61 = vadd.f32 %v2517_v2, %v2501_v51  ;;  %v2540_v62 = vsel %vm718_vm8, %v4595_v47, %v4638_v16  ;;  %v5411_v51 = vld [vmem:[#allocation51_spill] sm:$0xff]  ;;  %v5412_v47 = vld [vmem:[#allocation54_spill] sm:$0xff]  ;;  %v5414_v45 = vld [vmem:[#allocation121_spill] sm:$0xff] }
 0x643   : > { %v2273_v4 = vsel %vm759_vm9, %v5409_v53, %v4671_v33  ;;  %v2344_v13 = vadd.f32 %v2339_v30, %v2323_v22  ;;  %v2611_v42 = vadd.f32 %v5410_v6, %v2590_v58  ;;  %v1142_v35 = vsel %vm282_vm2, %v5411_v51, %v5370_v9  ;;  %v5415_v37 = vld [vmem:[#allocation108_spill] sm:$0xff]  ;;  %v5420_v53 = vld [vmem:[#allocation110_spill] sm:$0xff] }
 0x644   : > { %1170 = vrot.lane.b32.xlu0 %v1163_v46, %s3092_s27  ;;  %v4842_v60 = vpop.permute.xlu0 %2357  ;;  %v2609_v46 = vadd.f32 %v2604_v17, %v2588_v26  ;;  %v2077_v26 = vadd.f32 %v2072_v5, %v2056_v43  ;;  %v1454_v16 = vsel %vm282_vm2, %v5371_v19, %v5412_v47  ;;  %v2255_v33 = vadd.f32 %v2250_v21, %v2234_v40 }
 0x645   : > { %v4844_v48 = vpop.permute.xlu1 %2355  ;;  %v2648_v29 = vsel %vm800_vm10, %v5414_v45, %v5413_v59  ;;  %v2545_v52 = vadd.f32 %v2540_v62, %v2522_v61  ;;  %v2634_v57 = vadd.f32 %v4818_v50, %v2611_v42  ;;  %v1147_v58 = vadd.f32 %v1142_v35, %v1126_v10  ;;  %v5419_v62 = vld [vmem:[#allocation127_spill] sm:$0xff] }
 0x646   : > { %v2632_v28 = vadd.f32 %v2627_v3, %v2609_v46  ;;  %v2278_v43 = vadd.f32 %v2273_v4, %v2255_v33  ;;  %v2091_v30 = vmul.f32 %v5417_v25, %v2077_v26  ;;  %v2561_v46 = vsel %vm718_vm8, %v5392_v12, %v5401_v34 }
 0x647   : > { %v2584_v10 = vsel %vm759_vm9, %v4640_v63, %v4735_v24  ;;  %v2692_v4 = vsel %vm282_vm2, %v5420_v53, %v5419_v62  ;;  %v1162_v12 = vmul.f32 %v5354_v54, %v1147_v58  ;;  %v2317_v63 = vsel %vm800_vm10, %v4673_v0, %v4761_v8  ;;  %v5426_v0 = vld [vmem:[#allocation75_spill] sm:$0xff] }
 0x648   : > { %1477 = vrot.lane.b32.xlu0 %v1471_v11, %s3102_s24  ;;  %v2666_v44 = vpop.permute.xlu0 %2665  ;;  %v5416_v11 = vld [vmem:[#allocation125_spill] sm:$0xff]  ;;  %v2653_v21 = vadd.f32 %v2648_v29, %v2632_v28  ;;  %v5421_v28 = vld [vmem:[#allocation123_spill] sm:$0xff]  ;;  %v2029_v54 = vsel %vm800_vm10, %v5380_v31, %v5379_v7  ;;  %v2052_v35 = vsel %vm282_vm2, %v4790_v27, %v4763_v1  ;;  %v2605_v31 = vsel %vm759_vm9, %v5396_v20, %v5410_v6 }
 0x649   : > { %v2360_v17 = vpop.permute.xlu1 %2359  ;;  %v2383_v9 = vsel %vm282_vm2, %v5416_v11, %v5415_v37  ;;  %v2628_v1 = vsel %vm800_vm10, %v4816_v32, %v4818_v50  ;;  %v2361_v20 = vsel %vm282_vm2, %v4844_v48, %v4842_v60  ;;  %v5431_v32 = vld [vmem:[#allocation119_spill] sm:$0xff] }
 0x64a   : > { %v2362_v2 = vsel %vm282_vm2, %v4842_v60, %v2360_v17  ;;  %v2368_v36 = vadd.f32 %v2360_v17, %v2345_v56  ;;  %v5423_v17 = vld [vmem:[#allocation56_spill] sm:$0xff]  ;;  %v2073_v50 = vsel %vm282_vm2, %v5407_v41, %v5431_v32  ;;  %v2649_v60 = vsel %vm800_vm10, %v5413_v59, %v5421_v28  ;;  %v5433_v41 = vld [vmem:[#allocation106_spill] sm:$0xff] }
 0x64b   : > { %v2367_v39 = vadd.f32 %v2362_v2, %v2344_v13 }
 0x64c   : > { %v2389_v22 = vadd.f32 %v5415_v37, %v2368_v36  ;;  %1789 = vrot.lane.b32.xlu0 %v1782_v15, %s3103_s25  ;;  %v2670_v19 = vpop.permute.xlu0 %2669  ;;  %v5418_v15 = vld [vmem:[#allocation94_spill] sm:$0xff]  ;;  %v5424_v36 = vld [vmem:[#allocation7_spill] sm:$0xff]  ;;  %v5429_v37 = vld [vmem:[#allocation112_spill] sm:$0xff] }
 0x64d   : > { %v2668_v3 = vpop.permute.xlu1 %2667  ;;  %v2388_v14 = vadd.f32 %v2383_v9, %v2367_v39  ;;  %v2294_v61 = vsel %vm759_vm9, %v5418_v15, %v5395_v23  ;;  %v5422_v23 = vld [vmem:[#allocation152_spill] sm:$0xff]  ;;  %v1467_v51 = vsel %vm361_vm3, %v5404_v49, %v5424_v36  ;;  %v5427_v39 = vld [vmem:[#allocation55_spill] sm:$0xff]  ;;  %v5428_v49 = vld [vmem:[#allocation65_spill] sm:$0xff]  ;;  %v2087_v15 = vsel %vm2086_vm13, %v5417_v25, %v5390_v55 }
 0x64e   : > { %v2403_v5 = vmul.f32 %v5356_v38, %v2389_v22  ;;  %v2671_v40 = vsel %vm282_vm2, %v2666_v44, %v2668_v3  ;;  %v2566_v38 = vadd.f32 %v2561_v46, %v2545_v52  ;;  %v2655_v44 = vadd.f32 %v5421_v28, %v2634_v57  ;;  %v5430_v9 = vld [vmem:[#allocation113_spill] sm:$0xff]  ;;  %v5441_v36 = vld [vmem:[#allocation114_spill] sm:$0xff] }
 0x64f   : > { %v2676_v56 = vadd.f32 %v2671_v40, %v2653_v21  ;;  %v1459_v34 = vadd.f32 %v1454_v16, %v5422_v23  ;;  %v2299_v13 = vadd.f32 %v2294_v61, %v2278_v43  ;;  %v2402_v26 = vmul.f32 %v5423_v17, %v2388_v14  ;;  %v5425_v16 = vld [vmem:[#allocation58_spill] sm:$0xff]  ;;  %v5435_v28 = vld [vmem:[#allocation17_spill] sm:$0xff] }
 0x650   : > { %2097 = vrot.lane.b32.xlu0 %v2091_v30, %s3104_s6  ;;  %2411 = vrot.lane.b32.xlu1 %v2403_v5, %s3105_s7  ;;  %v2589_v24 = vadd.f32 %v2584_v10, %v2566_v38  ;;  %v2678_v42 = vadd.f32 %v2670_v19, %v2655_v44  ;;  %v2703_v47 = vpop.permute.xlu0 %2702  ;;  %v1762_v8 = vsel %vm282_vm2, %v5426_v0, %v5425_v16  ;;  %v5432_v30 = vld [vmem:[#allocation9_spill] sm:$0xff]  ;;  %v616_v25 = vstv %s2858_s9 }
 0x651   : > { %v2697_v2 = vadd.f32 %v2692_v4, %v2676_v56  ;;  %v2322_v33 = vadd.f32 %v2317_v63, %v2299_v13  ;;  %v2034_v45 = vadd.f32 %v2029_v54, %v5427_v39  ;;  %v1472_v7 = vmul.f32 %v1467_v51, %v1459_v34  ;;  %v2705_v6 = vpop.permute.xlu1 %2704  ;;  %v5437_v34 = vld [vmem:[#allocation116_spill] sm:$0xff]  ;;  %v5438_v13 = vld [vmem:[#allocation129_spill] sm:$0xff]  ;;  %v5439_v63 = vld [vmem:[#allocation18_spill] sm:$0xff] }
 0x652   : > { %v1767_v29 = vadd.f32 %v1762_v8, %v5428_v49  ;;  %v2610_v52 = vadd.f32 %v2605_v31, %v2589_v24  ;;  %v2699_v22 = vadd.f32 %v5429_v37, %v2678_v42  ;;  %v2338_v58 = vsel %vm800_vm10, %v5430_v9, %v5406_v18  ;;  %v5445_v39 = vld [vmem:[#allocation131_spill] sm:$0xff]  ;;  %v5446_v31 = vld [vmem:[#allocation21_spill] sm:$0xff] }
 0x653   : > { %v2057_v27 = vadd.f32 %v2052_v35, %v2034_v45  ;;  %v2711_v57 = vmul.f32 %v2703_v47, %v2697_v2  ;;  %v2343_v21 = vadd.f32 %v2338_v58, %v2322_v33  ;;  %v2672_v48 = vsel %vm282_vm2, %v2668_v3, %v2670_v19  ;;  %v5434_v19 = vld [vmem:[#allocation13_spill] sm:$0xff]  ;;  %v5442_v35 = vld [vmem:[#allocation23_spill] sm:$0xff]  ;;  %v5444_v33 = vld [vmem:[#allocation120_spill] sm:$0xff] }
 0x654   : > { %1168 = vrot.lane.b32.xlu1 %v1162_v12, %s3092_s27  ;;  %2409 = vrot.lane.b32.xlu0 %v2402_v26, %s3105_s7  ;;  %v2633_v43 = vadd.f32 %v2628_v1, %v2610_v52  ;;  %s3106_s27 = smov 122   ;;  %v1781_v14 = vmul.f32 %v5432_v30, %v1767_v29  ;;  %v2713_v40 = vmul.f32 %v2705_v6, %v2699_v22  ;;  %v5436_v12 = vld [vmem:[#allocation15_spill] sm:$0xff]  ;;  %v5440_v26 = vld [vmem:[#allocation16_spill] sm:$0xff]  ;;  %v5447_v1 = vld [vmem:[#allocation118_spill] sm:$0xff]  ;;  %vm2103_vm3 = vcmask 1014784  }
 0x655   : > { %v2078_v5 = vadd.f32 %v2073_v50, %v2057_v27  ;;  %v2366_v18 = vadd.f32 %v2361_v20, %v2343_v21  ;;  %v2382_v61 = vsel %vm282_vm2, %v5433_v41, %v5416_v11  ;;  %v2693_v59 = vsel %vm282_vm2, %v5419_v62, %v5429_v37  ;;  %v5448_v52 = vld [vmem:[#allocation27_spill] sm:$0xff]  ;;  %v5450_v58 = vld [vmem:[#allocation124_spill] sm:$0xff]  ;;  %v5451_v20 = vld [vmem:[#allocation133_spill] sm:$0xff] }
 0x656   : > { %v2654_v46 = vadd.f32 %v2649_v60, %v2633_v43  ;;  %v2707_v38 = vsel %vm2706_vm14, %v2703_v47, %v2705_v6  ;;  %v611_v11 = vstv %s609_s8  ;;  %v618_v23 = vmul.f32 %v616_v25, %v5436_v12  ;;  %v5443_v47 = vld [vmem:[#allocation22_spill] sm:$0xff]  ;;  %v5452_v43 = vld [vmem:[#allocation25_spill] sm:$0xff]  ;;  %v5457_v41 = vld [vmem:[#allocation135_spill] sm:$0xff] }
 0x657   : > { %v2092_v10 = vmul.f32 %v2087_v15, %v2078_v5  ;;  %v2387_v56 = vadd.f32 %v2382_v61, %v2366_v18  ;;  %v613_v44 = vmul.f32 %v611_v11, %v5435_v28  ;;  %v638_v62 = vsel %vm636_vm6, %v5438_v13, %v5437_v34  ;;  %v5453_v30 = vld [vmem:[#allocation122_spill] sm:$0xff]  ;;  %v1482_v5 = vpop.permute.xlu0 %1481  ;;  %v5454_v18 = vld [vmem:[#allocation31_spill] sm:$0xff]  ;;  %v5456_v15 = vld [vmem:[#allocation128_spill] sm:$0xff] }
 0x658   : > { %1479 = vrot.lane.b32.xlu1 %v1472_v7, %s3102_s24  ;;  %2717 = vrot.lane.b32.xlu0 %v2711_v57, %s3106_s27  ;;  %v2677_v53 = vadd.f32 %v2672_v48, %v2654_v46  ;;  %v612_v24 = vmul.f32 %v611_v11, %v5439_v63  ;;  %v617_v42 = vmul.f32 %v616_v25, %v5440_v26  ;;  %v5449_v57 = vld [vmem:[#allocation24_spill] sm:$0xff] }
 0x659   : > { %v2401_v3 = vmul.f32 %v5434_v19, %v2387_v56  ;;  %v620_v17 = vadd.f32 %v618_v23, %v613_v44  ;;  %v637_v51 = vsel %vm636_vm6, %v5441_v36, %v5438_v13  ;;  %v657_v16 = vsel %vm636_vm6, %v5443_v47, %v5442_v35  ;;  %v5458_v56 = vld [vmem:[#allocation29_spill] sm:$0xff]  ;;  %v5461_v11 = vld [vmem:[#allocation28_spill] sm:$0xff]  ;;  %v1173_v13 = vpop.permute.xlu1 %1172 }
 0x65a   : > { %v2698_v4 = vadd.f32 %v2693_v59, %v2677_v53  ;;  %v619_v54 = vadd.f32 %v617_v42, %v612_v24  ;;  %v679_v45 = vsel %vm677_vm7, %v5445_v39, %v5444_v33  ;;  %v656_v7 = vsel %vm636_vm6, %v5446_v31, %v5443_v47  ;;  %v5462_v12 = vld [vmem:[#allocation132_spill] sm:$0xff]  ;;  %v5463_v23 = vld [vmem:[#allocation137_spill] sm:$0xff]  ;;  %v5465_v42 = vld [vmem:[#allocation130_spill] sm:$0xff] }
 0x65b   : > { %v642_v2 = vadd.f32 %v638_v62, %v620_v17  ;;  %v678_v27 = vsel %vm677_vm7, %v5447_v1, %v5445_v39  ;;  %v698_v37 = vsel %vm677_vm7, %v5449_v57, %v5448_v52  ;;  %v720_v6 = vsel %vm718_vm8, %v5451_v20, %v5450_v58  ;;  %v5464_v62 = vld [vmem:[#allocation33_spill] sm:$0xff]  ;;  %v5471_v1 = vld [vmem:[#allocation134_spill] sm:$0xff] }
 0x65c   : > { %1787 = vrot.lane.b32.xlu1 %v1781_v14, %s3103_s25  ;;  %2721 = vrot.lane.b32.xlu0 %v2713_v40, %s3106_s27  ;;  %v2712_v55 = vmul.f32 %v2707_v38, %v2698_v4  ;;  %v641_v0 = vadd.f32 %v637_v51, %v619_v54  ;;  %v697_v21 = vsel %vm677_vm7, %v5452_v43, %v5449_v57  ;;  %v5455_v40 = vld [vmem:[#allocation26_spill] sm:$0xff]  ;;  %v5466_v51 = vld [vmem:[#allocation39_spill] sm:$0xff]  ;;  %v5470_v31 = vld [vmem:[#allocation37_spill] sm:$0xff] }
 0x65d   : > { %v661_v8 = vadd.f32 %v657_v16, %v642_v2  ;;  %v719_v14 = vsel %vm718_vm8, %v5453_v30, %v5451_v20  ;;  %v739_v60 = vsel %vm718_vm8, %v5455_v40, %v5454_v18  ;;  %v761_v61 = vsel %vm759_vm9, %v5457_v41, %v5456_v15  ;;  %v5467_v54 = vld [vmem:[#allocation30_spill] sm:$0xff]  ;;  %v5472_v57 = vld [vmem:[#allocation43_spill] sm:$0xff]  ;;  %v5474_v43 = vld [vmem:[#allocation41_spill] sm:$0xff] }
 0x65e   : > { %v660_v49 = vadd.f32 %v656_v7, %v641_v0  ;;  %v738_v53 = vsel %vm718_vm8, %v5458_v56, %v5455_v40  ;;  %v802_v34 = vsel %vm800_vm10, %v5463_v23, %v5462_v12  ;;  %v779_v63 = vsel %vm759_vm9, %v5464_v62, %v5461_v11  ;;  %v5468_v0 = vld [vmem:[#allocation136_spill] sm:$0xff]  ;;  %v5475_v30 = vld [vmem:[#allocation50_spill] sm:$0xff]  ;;  %v5476_v15 = vld [vmem:[#allocation63_spill] sm:$0xff] }
 0x65f   : > { %v683_v29 = vadd.f32 %v679_v45, %v661_v8  ;;  %v801_v2 = vsel %vm800_vm10, %v5465_v42, %v5463_v23  ;;  %v821_v35 = vsel %vm800_vm10, %v5467_v54, %v5466_v51  ;;  %v5469_v8 = vld [vmem:[#allocation139_spill] sm:$0xff]  ;;  %v820_v7 = vsel %vm800_vm10, %v5470_v31, %v5467_v54 }
 0x660   : > { %2099 = vrot.lane.b32.xlu1 %v2092_v10, %s3104_s6  ;;  %v682_v22 = vadd.f32 %v678_v27, %v660_v49  ;;  %v842_v33 = vsel %vm282_vm2, %v5469_v8, %v5468_v0  ;;  %v841_v27 = vsel %vm282_vm2, %v5471_v1, %v5469_v8  ;;  %v2750_v8 = vlaneseq  ;;  %v2742_v1 = vld [vmem:[%s3258_s30] sm:$0xff] }
 0x661   : > { %v702_v9 = vadd.f32 %v698_v37, %v683_v29  ;;  %v5473_v37 = vld [vmem:[#allocation32_spill] sm:$0xff] }
 0x662   : > { %v701_v32 = vadd.f32 %v697_v21, %v682_v22  ;;  %v1792_v36 = vpop.permute.xlu1 %1791  ;;  %v861_v22 = vsel %vm282_vm2, %v5473_v37, %v5472_v57  ;;  %v860_v21 = vsel %vm282_vm2, %v5474_v43, %v5473_v37  ;;  %vm2413_vm2 = vcmask 1006592   ;;  %v2743_v37 = vld [vmem:[%s3258_s30 + $0x8] sm:$0xff] }
 0x663   : > { %v724_v50 = vadd.f32 %v720_v6, %v702_v9 }
 0x664   : > { %2407 = vrot.lane.b32.xlu1 %v2401_v3, %s3105_s7  ;;  %v723_v48 = vadd.f32 %v719_v14, %v701_v32  ;;  %v5459_v3 = vld [vmem:[#allocation126_spill] sm:$0xff] }
 0x665   : > { %v743_v46 = vadd.f32 %v739_v60, %v724_v50  ;;  %v760_v4 = vsel %vm759_vm9, %v5459_v3, %v5457_v41 }
 0x666   : > { %v742_v59 = vadd.f32 %v738_v53, %v723_v48 }
 0x667   : > { %v765_v19 = vadd.f32 %v761_v61, %v743_v46 }
 0x668   : > { %2719 = vrot.lane.b32.xlu1 %v2712_v55, %s3106_s27  ;;  %v5460_v55 = vld [vmem:[#allocation35_spill] sm:$0xff]  ;;  %v764_v28 = vadd.f32 %v760_v4, %v742_v59 }
 0x669   : > { %v780_v25 = vsel %vm759_vm9, %v5461_v11, %v5460_v55 }
 0x66a   : > { %v784_v44 = vadd.f32 %v780_v25, %v765_v19  ;;  %v783_v24 = vadd.f32 %v779_v63, %v764_v28 }
 0x66c   : > { %v806_v17 = vadd.f32 %v802_v34, %v784_v44  ;;  %v805_v47 = vadd.f32 %v801_v2, %v783_v24 }
 0x66e   : > { %v825_v16 = vadd.f32 %v821_v35, %v806_v17  ;;  %v824_v49 = vadd.f32 %v820_v7, %v805_v47  ;;  %v2744_v7 = vld [vmem:[%s3258_s30 + $0x10] sm:$0xff] }
 0x670   : > { %v846_v29 = vadd.f32 %v842_v33, %v825_v16  ;;  %v845_v9 = vadd.f32 %v841_v27, %v824_v49  ;;  %v2751_v33 = vshrl.u32 %v2750_v8, 7  ;;  %v2745_v49 = vld [vmem:[%s3258_s30 + $0x18] sm:$0xff]  ;;  %v2748_v27 = vld [vmem:[%s3258_s30 + $0x30] sm:$0xff] }
 0x672   : > { %v865_v58 = vadd.f32 %v861_v22, %v846_v29  ;;  %v864_v50 = vadd.f32 %v860_v21, %v845_v9  ;;  %v2747_v22 = vld [vmem:[%s3258_s30 + $0x28] sm:$0xff]  ;;  %v2749_v9 = vld [vmem:[%s3258_s30 + $0x38] sm:$0xff] }
 0x674   : > { %v867_v14 = vmul.f32 %v5475_v30, %v865_v58  ;;  %v866_v41 = vmul.f32 %v5476_v15, %v864_v50 }
 0x6b2   : > { %v2102_v10 = vpop.permute.xlu0 %2101 }
 0x6b6   : > { %v1171_v38 = vpop.permute.xlu0 %1170 }
 0x6b7   : > { %v1176_v32 = vsel %vm1174_vm15, %v1171_v38, %v1173_v13 }
 0x6b8   : > { %v1180_v40 = vadd.f32 %v1176_v32, %v867_v14 }
 0x6ba   : > { %v1478_v26 = vpop.permute.xlu0 %1477 }
 0x6be   : > { %v1790_v39 = vpop.permute.xlu0 %1789 }
 0x6bf   : > { %v1795_v19 = vsel %vm1793_vm1, %v1790_v39, %v1792_v36 }
 0x6c2   : > { %v2412_v45 = vpop.permute.xlu1 %2411  ;;  %v2098_v20 = vpop.permute.xlu0 %2097 }
 0x6c6   : > { %v1169_v52 = vpop.permute.xlu1 %1168  ;;  %v2410_v60 = vpop.permute.xlu0 %2409 }
 0x6c7   : > { %v1175_v46 = vsel %vm1174_vm15, %v1169_v52, %v1171_v38  ;;  %v2415_v34 = vsel %vm2413_vm2, %v2410_v60, %v2412_v45  ;;  %v2746_v52 = vld [vmem:[%s3258_s30 + $0x20] sm:$0xff] }
 0x6c8   : > { %v1179_v53 = vadd.f32 %v1175_v46, %v866_v41 }
 0x6ca   : > { %v1480_v6 = vpop.permute.xlu1 %1479  ;;  %v2718_v55 = vpop.permute.xlu0 %2717 }
 0x6cb   : > { %v1485_v18 = vsel %vm1483_vm0, %v1480_v6, %v1482_v5  ;;  %v1484_v56 = vsel %vm1483_vm0, %v1478_v26, %v1480_v6 }
 0x6cc   : > { %v1489_v61 = vadd.f32 %v1485_v18, %v1180_v40  ;;  %v1488_v11 = vadd.f32 %v1484_v56, %v1179_v53 }
 0x6ce   : > { %v1788_v48 = vpop.permute.xlu1 %1787  ;;  %v1799_v25 = vadd.f32 %v1795_v19, %v1489_v61  ;;  %v2722_v13 = vpop.permute.xlu0 %2721 }
 0x6cf   : > { %v1794_v3 = vsel %vm1793_vm1, %v1788_v48, %v1790_v39  ;;  %v2752_v39 = vsub.s32 0, %v2751_v33 }
 0x6d0   : > { %v1798_v5 = vadd.f32 %v1794_v3, %v1488_v11 }
 0x6d2   : > { %v2100_v59 = vpop.permute.xlu1 %2099 }
 0x6d3   : > { %v2105_v4 = vsel %vm2103_vm3, %v2100_v59, %v2102_v10  ;;  %v2104_v28 = vsel %vm2103_vm3, %v2098_v20, %v2100_v59 }
 0x6d4   : > { %v2109_v44 = vadd.f32 %v2105_v4, %v1799_v25  ;;  %v2108_v23 = vadd.f32 %v2104_v28, %v1798_v5 }
 0x6d6   : > { %v2408_v12 = vpop.permute.xlu1 %2407  ;;  %v2419_v63 = vadd.f32 %v2415_v34, %v2109_v44 }
 0x6d7   : > { %v2414_v38 = vsel %vm2413_vm2, %v2408_v12, %v2410_v60 }
 0x6d8   : > { %v2418_v62 = vadd.f32 %v2414_v38, %v2108_v23 }
 0x6da   : > { %v2720_v24 = vpop.permute.xlu1 %2719 }
 0x6db   : > { %v2724_v17 = vsel %vm2723_vm4, %v2718_v55, %v2720_v24  ;;  %v2725_v26 = vsel %vm2723_vm4, %v2720_v24, %v2722_v13 }
 0x6dc   : > { %v2728_v42 = vadd.f32 %v2724_v17, %v2418_v62  ;;  %v2729_v10 = vadd.f32 %v2725_v26, %v2419_v63 }
 0x6de   : > { %v2730_v2 = vsub.f32 0.0, %v2728_v42  ;;  %v2731_v36 = vsub.f32 0.0, %v2729_v10 }
 0x6e0   : > { %v2732_v51 = vmul.f32 1.442695, %v2730_v2  ;;  %v2734_v54 = vmul.f32 1.442695, %v2731_v36 }
 0x6e2   : > { %3047 = vpow2.f32 %v2732_v51 }
 0x6e3   : > { %3049 = vpow2.f32 %v2734_v54 }
 0x6ef   : > { %v3048_v35 = vpop.eup %3047 }
 0x6f0   : > { %v3050_v47 = vpop.eup %3049  ;;  %v2736_v16 = vadd.f32 1.0, %v3048_v35 }
 0x6f1   : > { %v2737_v0 = vadd.f32 1.0, %v3050_v47 }
 0x6f2   : > { %3051 = vrcp.f32 %v2736_v16 }
 0x6f3   : > { %3053 = vrcp.f32 %v2737_v0 }
 0x6ff   : > { %v3052_v45 = vpop.eup %3051 }
 0x700   : > { %v3054_v31 = vpop.eup %3053  ;;  %v2753_v29 = vrot.slane %v3052_v45, %v2752_v39 }
 0x701   : > { %v2757_v57 = vrot.slane %v3054_v31, %v2752_v39 }
 0x702   : > { %v2758_v58 = vmul.f32 %v2753_v29, %v2742_v1  ;;  %v2760_v20 = vmul.f32 %v2753_v29, %v2744_v7  ;;  %v2762_v6 = vmul.f32 %v2753_v29, %v2746_v52  ;;  %v2764_v43 = vmul.f32 %v2753_v29, %v2748_v27 }
 0x703   : > { %v2759_v21 = vmul.f32 %v2757_v57, %v2743_v37  ;;  %v2761_v32 = vmul.f32 %v2757_v57, %v2745_v49  ;;  %v2763_v50 = vmul.f32 %v2757_v57, %v2747_v22  ;;  %v2765_v30 = vmul.f32 %v2757_v57, %v2749_v9 }
 0x704   : > { %2766 = vst [vmem:[%s3258_s30] sm:$0xff] %v2758_v58  ;;  %2768 = vst [vmem:[%s3258_s30 + $0x10] sm:$0xff] %v2760_v20 }
 0x705   : > { %2770 = vst [vmem:[%s3258_s30 + $0x20] sm:$0xff] %v2762_v6  ;;  %2772 = vst [vmem:[%s3258_s30 + $0x30] sm:$0xff] %v2764_v43 }
 0x706   : > { %2767 = vst [vmem:[%s3258_s30 + $0x8] sm:$0xff] %v2759_v21  ;;  %2769 = vst [vmem:[%s3258_s30 + $0x18] sm:$0xff] %v2761_v32 }
 0x707   : > { %2771 = vst [vmem:[%s3258_s30 + $0x28] sm:$0xff] %v2763_v50  ;;  %2773 = vst [vmem:[%s3258_s30 + $0x38] sm:$0xff] %v2765_v30 }
 0x708 PF: > { %s16_s18 = sadd.s32 1, %s3082_s18  }
 0x709   : > { %p13_p1 = scmp.ge.s32.totalorder %s16_s18, 4  }
 0x70b   :  { %15 = sbr.rel (!%p13_p1) target bundleno = 1 (0x1), region = 75 }
 0x710   :  { %2795 = vsyncpa [#allocation3], 1 }
 0x711   :  { %2797 = vsyncpa [#allocation3 + $0x1], 1 }

</bundles_post_ra>
